<compile_context>
chip_gen: v7x
topology: tpu7x:2x2x1
jax: 0.10.0
libtpu: 0.0.40
codegen_flags: <defaults>
</compile_context>

<pallas_src>
import numpy as np
import jax
import jax.numpy as jnp
from jax import lax
from jax.experimental import pallas as pl
from jax.experimental.pallas import tpu as pltpu


# --------------------------------------------------------------------------
# One-time parameter lowering (host/XLA side, outside the kernel)
# --------------------------------------------------------------------------
def _lower_conv_weight(w, h_in):
    """w: (Cout, Cin, k, k) -> (k, Cout*OH, Cin*h_in) lowered matrices W_j s.t.
    with the image stored as x2d (Cin*h_in, w_in) (rows = ci*h_in + h):
        conv_out2d = sum_j  W_j @ x2d[:, j:j+OW]     (rows = co*OH + oh)."""
    cout, cin, k, _ = w.shape
    oh = h_in - k + 1
    r = jnp.arange(h_in)[None, None, :]
    o = jnp.arange(oh)[:, None, None]
    i = jnp.arange(k)[None, :, None]
    onehot = (r == o + i).astype(jnp.float32)                   # (OH, k, h_in)
    wl = jnp.einsum("ocij,hir->johcr", w.astype(jnp.float32), onehot)
    return wl.reshape(k, cout * oh, cin * h_in)


def _pool_matrices(c, h, w):
    """2x2 stride-2 average pool of a (c*h, w) slab:  pooled = LEFT @ A @ RIGHT."""
    right = np.zeros((w, w // 2), np.float32)
    right[np.arange(w), np.arange(w) // 2] = 0.5
    left = np.zeros((c * (h // 2), c * h), np.float32)
    for ci in range(c):
        for r in range(h // 2):
            left[ci * (h // 2) + r, ci * h + 2 * r] = 0.5
            left[ci * (h // 2) + r, ci * h + 2 * r + 1] = 0.5
    return jnp.asarray(left), jnp.asarray(right)


def prepare_weights(params):
    pl1, pr1 = _pool_matrices(6, 24, 24)     # (72, 144), (24, 12)
    pl2, pr2 = _pool_matrices(16, 8, 8)      # (64, 128), (8, 4)
    return {
        "w1l": _lower_conv_weight(params["conv1_w"], 28),            # (5, 144, 28)
        "b1":  jnp.repeat(params["conv1_b"], 24)[:, None],           # (144, 1)
        "pr1": pr1, "pl1": pl1,
        "w2l": _lower_conv_weight(params["conv2_w"], 12),            # (5, 128, 72)
        "b2":  jnp.repeat(params["conv2_b"], 8)[:, None],            # (128, 1)
        "pr2": pr2, "pl2": pl2,
        # fc1: feature index f = co*16 + ho*4 + wo = (co*4+ho)*4 + wo = r*4 + c
        "wf1": params["fc1_w"].reshape(120, 64, 4).transpose(2, 0, 1),  # (4,120,64)
        "bf1": params["fc1_b"][:, None],                              # (120, 1)
        "wf2": params["fc2_w"],                                       # (84, 120)
        "bf2": params["fc2_b"][:, None],                              # (84, 1)
        "wf3": params["fc3_w"],                                       # (10, 84)
        "bf3": params["fc3_b"][:, None],                              # (10, 1)
    }


_CONST_ORDER = ["w1l", "b1", "pr1", "pl1", "w2l", "b2", "pr2", "pl2",
                "wf1", "bf1", "wf2", "bf2", "wf3", "bf3"]


# --------------------------------------------------------------------------
# Fused Pallas kernel: one grid step == one image, everything in VMEM
# --------------------------------------------------------------------------
def _lenet_kernel(x_ref, w1l_ref, b1_ref, pr1_ref, pl1_ref,
                  w2l_ref, b2_ref, pr2_ref, pl2_ref,
                  wf1_ref, bf1_ref, wf2_ref, bf2_ref, wf3_ref, bf3_ref,
                  o_ref):
    f32 = jnp.float32
    x = x_ref[0]                                                  # (28, 28)

    # conv1 (1->6, k=5) + bias + ReLU, as 5 shifted MXU matmuls; rows = co*24+oh
    acc1 = jnp.dot(w1l_ref[0], x[:, 0:24], preferred_element_type=f32)
    for j in range(1, 5):
        acc1 = acc1 + jnp.dot(w1l_ref[j], x[:, j:j + 24],
                              preferred_element_type=f32)
    a1 = jnp.maximum(acc1 + b1_ref[...], 0.0)                     # (144, 24)

    # 2x2 avg-pool: PL1 @ (a1 @ PR1) -> (72, 12), rows = ci*12 + h
    p1 = jnp.dot(pl1_ref[...],
                 jnp.dot(a1, pr1_ref[...], preferred_element_type=f32),
                 preferred_element_type=f32)

    # conv2 (6->16, k=5) + bias + ReLU, as 5 shifted MXU matmuls; rows = co*8+oh
    acc2 = jnp.dot(w2l_ref[0], p1[:, 0:8], preferred_element_type=f32)
    for j in range(1, 5):
        acc2 = acc2 + jnp.dot(w2l_ref[j], p1[:, j:j + 8],
                              preferred_element_type=f32)
    a2 = jnp.maximum(acc2 + b2_ref[...], 0.0)                     # (128, 8)

    # 2x2 avg-pool -> (64, 4): rows = co*4 + ho, cols = wo (PyTorch .view order)
    p2 = jnp.dot(pl2_ref[...],
                 jnp.dot(a2, pr2_ref[...], preferred_element_type=f32),
                 preferred_element_type=f32)

    # fc1 + ReLU: contract the 64 (co,ho) rows per wo-column on the MXU
    h1 = bf1_ref[...]                                             # (120, 1)
    for c in range(4):
        h1 = h1 + jnp.dot(wf1_ref[c], p2[:, c:c + 1],
                          preferred_element_type=f32)
    h1 = jnp.maximum(h1, 0.0)

    # fc2 + ReLU, fc3
    h2 = jnp.maximum(jnp.dot(wf2_ref[...], h1, preferred_element_type=f32)
                     + bf2_ref[...], 0.0)                         # (84, 1)
    logits = jnp.dot(wf3_ref[...], h2, preferred_element_type=f32) \
        + bf3_ref[...]                                            # (10, 1)

    o_ref[0] = logits


def lenet_forward(weights, x):
    """x: (B, 1, 28, 28) float32 -> (B, 10) float32 logits."""
    b = x.shape[0]
    x3 = x.reshape(b, 28, 28).astype(jnp.float32)
    consts = [weights[k] for k in _CONST_ORDER]

    def const_spec(a):
        nd = a.ndim
        return pl.BlockSpec(a.shape, lambda i, _n=nd: (0,) * _n)

    out = pl.pallas_call(
        _lenet_kernel,
        out_shape=jax.ShapeDtypeStruct((b, 10, 1), jnp.float32),
        grid=(b,),
        in_specs=[pl.BlockSpec((1, 28, 28), lambda i: (i, 0, 0))]
        + [const_spec(a) for a in consts],
        out_specs=pl.BlockSpec((1, 10, 1), lambda i: (i, 0, 0)),
        compiler_params=pltpu.CompilerParams(
            dimension_semantics=("parallel",)),
    )(x3, *consts)
    return out[:, :, 0]


# --------------------------------------------------------------------------
# Parameters (deterministic, PyTorch-style uniform init) and pure-JAX reference
# --------------------------------------------------------------------------
def init_params(key):
    keys = jax.random.split(key, 10)

    def u(k, shape, fan_in):
        bound = 1.0 / np.sqrt(fan_in)
        return jax.random.uniform(k, shape, jnp.float32, -bound, bound)

    return {
        "conv1_w": u(keys[0], (6, 1, 5, 5), 1 * 5 * 5),
        "conv1_b": u(keys[1], (6,), 1 * 5 * 5),
        "conv2_w": u(keys[2], (16, 6, 5, 5), 6 * 5 * 5),
        "conv2_b": u(keys[3], (16,), 6 * 5 * 5),
        "fc1_w": u(keys[4], (120, 256), 256),
        "fc1_b": u(keys[5], (120,), 256),
        "fc2_w": u(keys[6], (84, 120), 120),
        "fc2_b": u(keys[7], (84,), 120),
        "fc3_w": u(keys[8], (10, 84), 84),
        "fc3_b": u(keys[9], (10,), 84),
    }


def reference_forward(params, x):
    def conv(x, w, b):
        out = lax.conv_general_dilated(
            x, w, (1, 1), "VALID", dimension_numbers=("NCHW", "OIHW", "NCHW"))
        return jnp.maximum(out + b[None, :, None, None], 0.0)

    def pool(x):
        B, C, H, W = x.shape
        return x.reshape(B, C, H // 2, 2, W // 2, 2).mean(axis=(3, 5))

    x = pool(conv(x, params["conv1_w"], params["conv1_b"]))
    x = pool(conv(x, params["conv2_w"], params["conv2_b"]))
    x = x.reshape(x.shape[0], -1)
    x = jnp.maximum(x @ params["fc1_w"].T + params["fc1_b"], 0.0)
    x = jnp.maximum(x @ params["fc2_w"].T + params["fc2_b"], 0.0)
    return x @ params["fc3_w"].T + params["fc3_b"]


if __name__ == "__main__":
    key = jax.random.PRNGKey(0)
    k_param, k_x = jax.random.split(key)

    params = init_params(k_param)
    # MNIST-shaped input: batch=2, 1 channel, 28x28 (required by fc1 = 16*4*4).
    x = jax.random.normal(k_x, (2, 1, 28, 28), jnp.float32)

    weights = prepare_weights(params)          # one-time parameter lowering
    fwd = jax.jit(lenet_forward)
    out = jax.block_until_ready(fwd(weights, x))

    ref = jax.block_until_ready(reference_forward(params, x))
    assert out.shape == (2, 10) and out.dtype == jnp.float32
    np.testing.assert_allclose(np.asarray(out), np.asarray(ref),
                               rtol=1e-3, atol=1e-3)
    print("KERNEL_OK")
</pallas_src>

<mosaic_0001>
module attributes {stable_mosaic.version = 11 : i64} {
  func.func @_lenet_kernel(%arg0: i32, %arg1: memref<1x28x28xf32, #tpu.memory_space<vmem>>, %arg2: memref<5x144x28xf32, #tpu.memory_space<vmem>>, %arg3: memref<144x1xf32, #tpu.memory_space<vmem>>, %arg4: memref<24x12xf32, #tpu.memory_space<vmem>>, %arg5: memref<72x144xf32, #tpu.memory_space<vmem>>, %arg6: memref<5x128x72xf32, #tpu.memory_space<vmem>>, %arg7: memref<128x1xf32, #tpu.memory_space<vmem>>, %arg8: memref<8x4xf32, #tpu.memory_space<vmem>>, %arg9: memref<64x128xf32, #tpu.memory_space<vmem>>, %arg10: memref<4x120x64xf32, #tpu.memory_space<vmem>>, %arg11: memref<120x1xf32, #tpu.memory_space<vmem>>, %arg12: memref<84x120xf32, #tpu.memory_space<vmem>>, %arg13: memref<84x1xf32, #tpu.memory_space<vmem>>, %arg14: memref<10x84xf32, #tpu.memory_space<vmem>>, %arg15: memref<10x1xf32, #tpu.memory_space<vmem>>, %arg16: memref<1x10x1xf32, #tpu.memory_space<vmem>>) attributes {dimension_semantics = [#tpu.dimension_semantics<parallel>], iteration_bounds = array<i64: 2>, scalar_prefetch = 0 : i64, scratch_operands = 0 : i64, tpu.core_type = #tpu.core_type<tc>, window_params = [{transform_indices = @transform_0, window_bounds = array<i64: 1, 28, 28>}, {pipeline_mode = #tpu.pipeline_mode<synchronous>, transform_indices = @transform_1, window_bounds = array<i64: 5, 144, 28>}, {pipeline_mode = #tpu.pipeline_mode<synchronous>, transform_indices = @transform_2, window_bounds = array<i64: 144, 1>}, {pipeline_mode = #tpu.pipeline_mode<synchronous>, transform_indices = @transform_3, window_bounds = array<i64: 24, 12>}, {pipeline_mode = #tpu.pipeline_mode<synchronous>, transform_indices = @transform_4, window_bounds = array<i64: 72, 144>}, {pipeline_mode = #tpu.pipeline_mode<synchronous>, transform_indices = @transform_5, window_bounds = array<i64: 5, 128, 72>}, {pipeline_mode = #tpu.pipeline_mode<synchronous>, transform_indices = @transform_6, window_bounds = array<i64: 128, 1>}, {pipeline_mode = #tpu.pipeline_mode<synchronous>, transform_indices = @transform_7, window_bounds = array<i64: 8, 4>}, {pipeline_mode = #tpu.pipeline_mode<synchronous>, transform_indices = @transform_8, window_bounds = array<i64: 64, 128>}, {pipeline_mode = #tpu.pipeline_mode<synchronous>, transform_indices = @transform_9, window_bounds = array<i64: 4, 120, 64>}, {pipeline_mode = #tpu.pipeline_mode<synchronous>, transform_indices = @transform_10, window_bounds = array<i64: 120, 1>}, {pipeline_mode = #tpu.pipeline_mode<synchronous>, transform_indices = @transform_11, window_bounds = array<i64: 84, 120>}, {pipeline_mode = #tpu.pipeline_mode<synchronous>, transform_indices = @transform_12, window_bounds = array<i64: 84, 1>}, {pipeline_mode = #tpu.pipeline_mode<synchronous>, transform_indices = @transform_13, window_bounds = array<i64: 10, 84>}, {pipeline_mode = #tpu.pipeline_mode<synchronous>, transform_indices = @transform_14, window_bounds = array<i64: 10, 1>}, {transform_indices = @transform_15, window_bounds = array<i64: 1, 10, 1>}]} {
    %c0 = arith.constant 0 : index
    %c0_0 = arith.constant 0 : index
    %c0_1 = arith.constant 0 : index
    %0 = vector.load %arg1[%c0, %c0_0, %c0_1] : memref<1x28x28xf32, #tpu.memory_space<vmem>>, vector<1x28x28xf32>
    %1 = vector.shape_cast %0 : vector<1x28x28xf32> to vector<28x28xf32>
    %c0_2 = arith.constant 0 : index
    %c0_3 = arith.constant 0 : index
    %c0_4 = arith.constant 0 : index
    %2 = vector.load %arg2[%c0_2, %c0_3, %c0_4] : memref<5x144x28xf32, #tpu.memory_space<vmem>>, vector<1x144x28xf32>
    %3 = vector.shape_cast %2 : vector<1x144x28xf32> to vector<144x28xf32>
    %4 = vector.extract_strided_slice %1 {offsets = [0, 0], sizes = [28, 24], strides = [1, 1]} : vector<28x28xf32> to vector<28x24xf32>
    %cst = arith.constant dense<0.000000e+00> : vector<144x24xf32>
    %5 = tpu.matmul %3, %4, %cst {dimension_numbers = #tpu.dot_dimension_numbers<[1], [0], [0], [1], [0, 0, 1, 1], [], []>} : vector<144x28xf32>, vector<28x24xf32>, vector<144x24xf32> -> vector<144x24xf32>
    %c1 = arith.constant 1 : index
    %c0_5 = arith.constant 0 : index
    %c0_6 = arith.constant 0 : index
    %6 = vector.load %arg2[%c1, %c0_5, %c0_6] : memref<5x144x28xf32, #tpu.memory_space<vmem>>, vector<1x144x28xf32>
    %7 = vector.shape_cast %6 : vector<1x144x28xf32> to vector<144x28xf32>
    %8 = vector.extract_strided_slice %1 {offsets = [0, 1], sizes = [28, 24], strides = [1, 1]} : vector<28x28xf32> to vector<28x24xf32>
    %cst_7 = arith.constant dense<0.000000e+00> : vector<144x24xf32>
    %9 = tpu.matmul %7, %8, %cst_7 {dimension_numbers = #tpu.dot_dimension_numbers<[1], [0], [0], [1], [0, 0, 1, 1], [], []>} : vector<144x28xf32>, vector<28x24xf32>, vector<144x24xf32> -> vector<144x24xf32>
    %10 = arith.addf %5, %9 : vector<144x24xf32>
    %c2 = arith.constant 2 : index
    %c0_8 = arith.constant 0 : index
    %c0_9 = arith.constant 0 : index
    %11 = vector.load %arg2[%c2, %c0_8, %c0_9] : memref<5x144x28xf32, #tpu.memory_space<vmem>>, vector<1x144x28xf32>
    %12 = vector.shape_cast %11 : vector<1x144x28xf32> to vector<144x28xf32>
    %13 = vector.extract_strided_slice %1 {offsets = [0, 2], sizes = [28, 24], strides = [1, 1]} : vector<28x28xf32> to vector<28x24xf32>
    %cst_10 = arith.constant dense<0.000000e+00> : vector<144x24xf32>
    %14 = tpu.matmul %12, %13, %cst_10 {dimension_numbers = #tpu.dot_dimension_numbers<[1], [0], [0], [1], [0, 0, 1, 1], [], []>} : vector<144x28xf32>, vector<28x24xf32>, vector<144x24xf32> -> vector<144x24xf32>
    %15 = arith.addf %10, %14 : vector<144x24xf32>
    %c3 = arith.constant 3 : index
    %c0_11 = arith.constant 0 : index
    %c0_12 = arith.constant 0 : index
    %16 = vector.load %arg2[%c3, %c0_11, %c0_12] : memref<5x144x28xf32, #tpu.memory_space<vmem>>, vector<1x144x28xf32>
    %17 = vector.shape_cast %16 : vector<1x144x28xf32> to vector<144x28xf32>
    %18 = vector.extract_strided_slice %1 {offsets = [0, 3], sizes = [28, 24], strides = [1, 1]} : vector<28x28xf32> to vector<28x24xf32>
    %cst_13 = arith.constant dense<0.000000e+00> : vector<144x24xf32>
    %19 = tpu.matmul %17, %18, %cst_13 {dimension_numbers = #tpu.dot_dimension_numbers<[1], [0], [0], [1], [0, 0, 1, 1], [], []>} : vector<144x28xf32>, vector<28x24xf32>, vector<144x24xf32> -> vector<144x24xf32>
    %20 = arith.addf %15, %19 : vector<144x24xf32>
    %c4 = arith.constant 4 : index
    %c0_14 = arith.constant 0 : index
    %c0_15 = arith.constant 0 : index
    %21 = vector.load %arg2[%c4, %c0_14, %c0_15] : memref<5x144x28xf32, #tpu.memory_space<vmem>>, vector<1x144x28xf32>
    %22 = vector.shape_cast %21 : vector<1x144x28xf32> to vector<144x28xf32>
    %23 = vector.extract_strided_slice %1 {offsets = [0, 4], sizes = [28, 24], strides = [1, 1]} : vector<28x28xf32> to vector<28x24xf32>
    %cst_16 = arith.constant dense<0.000000e+00> : vector<144x24xf32>
    %24 = tpu.matmul %22, %23, %cst_16 {dimension_numbers = #tpu.dot_dimension_numbers<[1], [0], [0], [1], [0, 0, 1, 1], [], []>} : vector<144x28xf32>, vector<28x24xf32>, vector<144x24xf32> -> vector<144x24xf32>
    %25 = arith.addf %20, %24 : vector<144x24xf32>
    %c0_17 = arith.constant 0 : index
    %c0_18 = arith.constant 0 : index
    %26 = vector.load %arg3[%c0_17, %c0_18] : memref<144x1xf32, #tpu.memory_space<vmem>>, vector<144x1xf32>
    %27 = vector.broadcast %26 : vector<144x1xf32> to vector<144x24xf32>
    %28 = arith.addf %25, %27 : vector<144x24xf32>
    %cst_19 = arith.constant 0.000000e+00 : f32
    %29 = vector.broadcast %cst_19 : f32 to vector<144x24xf32>
    %30 = arith.maximumf %28, %29 : vector<144x24xf32>
    %c0_20 = arith.constant 0 : index
    %c0_21 = arith.constant 0 : index
    %31 = vector.load %arg5[%c0_20, %c0_21] : memref<72x144xf32, #tpu.memory_space<vmem>>, vector<72x144xf32>
    %c0_22 = arith.constant 0 : index
    %c0_23 = arith.constant 0 : index
    %32 = vector.load %arg4[%c0_22, %c0_23] : memref<24x12xf32, #tpu.memory_space<vmem>>, vector<24x12xf32>
    %cst_24 = arith.constant dense<0.000000e+00> : vector<144x12xf32>
    %33 = tpu.matmul %30, %32, %cst_24 {dimension_numbers = #tpu.dot_dimension_numbers<[1], [0], [0], [1], [0, 0, 1, 1], [], []>} : vector<144x24xf32>, vector<24x12xf32>, vector<144x12xf32> -> vector<144x12xf32>
    %cst_25 = arith.constant dense<0.000000e+00> : vector<72x12xf32>
    %34 = tpu.matmul %31, %33, %cst_25 {dimension_numbers = #tpu.dot_dimension_numbers<[1], [0], [0], [1], [0, 0, 1, 1], [], []>} : vector<72x144xf32>, vector<144x12xf32>, vector<72x12xf32> -> vector<72x12xf32>
    %c0_26 = arith.constant 0 : index
    %c0_27 = arith.constant 0 : index
    %c0_28 = arith.constant 0 : index
    %35 = vector.load %arg6[%c0_26, %c0_27, %c0_28] : memref<5x128x72xf32, #tpu.memory_space<vmem>>, vector<1x128x72xf32>
    %36 = vector.shape_cast %35 : vector<1x128x72xf32> to vector<128x72xf32>
    %37 = vector.extract_strided_slice %34 {offsets = [0, 0], sizes = [72, 8], strides = [1, 1]} : vector<72x12xf32> to vector<72x8xf32>
    %cst_29 = arith.constant dense<0.000000e+00> : vector<128x8xf32>
    %38 = tpu.matmul %36, %37, %cst_29 {dimension_numbers = #tpu.dot_dimension_numbers<[1], [0], [0], [1], [0, 0, 1, 1], [], []>} : vector<128x72xf32>, vector<72x8xf32>, vector<128x8xf32> -> vector<128x8xf32>
    %c1_30 = arith.constant 1 : index
    %c0_31 = arith.constant 0 : index
    %c0_32 = arith.constant 0 : index
    %39 = vector.load %arg6[%c1_30, %c0_31, %c0_32] : memref<5x128x72xf32, #tpu.memory_space<vmem>>, vector<1x128x72xf32>
    %40 = vector.shape_cast %39 : vector<1x128x72xf32> to vector<128x72xf32>
    %41 = vector.extract_strided_slice %34 {offsets = [0, 1], sizes = [72, 8], strides = [1, 1]} : vector<72x12xf32> to vector<72x8xf32>
    %cst_33 = arith.constant dense<0.000000e+00> : vector<128x8xf32>
    %42 = tpu.matmul %40, %41, %cst_33 {dimension_numbers = #tpu.dot_dimension_numbers<[1], [0], [0], [1], [0, 0, 1, 1], [], []>} : vector<128x72xf32>, vector<72x8xf32>, vector<128x8xf32> -> vector<128x8xf32>
    %43 = arith.addf %38, %42 : vector<128x8xf32>
    %c2_34 = arith.constant 2 : index
    %c0_35 = arith.constant 0 : index
    %c0_36 = arith.constant 0 : index
    %44 = vector.load %arg6[%c2_34, %c0_35, %c0_36] : memref<5x128x72xf32, #tpu.memory_space<vmem>>, vector<1x128x72xf32>
    %45 = vector.shape_cast %44 : vector<1x128x72xf32> to vector<128x72xf32>
    %46 = vector.extract_strided_slice %34 {offsets = [0, 2], sizes = [72, 8], strides = [1, 1]} : vector<72x12xf32> to vector<72x8xf32>
    %cst_37 = arith.constant dense<0.000000e+00> : vector<128x8xf32>
    %47 = tpu.matmul %45, %46, %cst_37 {dimension_numbers = #tpu.dot_dimension_numbers<[1], [0], [0], [1], [0, 0, 1, 1], [], []>} : vector<128x72xf32>, vector<72x8xf32>, vector<128x8xf32> -> vector<128x8xf32>
    %48 = arith.addf %43, %47 : vector<128x8xf32>
    %c3_38 = arith.constant 3 : index
    %c0_39 = arith.constant 0 : index
    %c0_40 = arith.constant 0 : index
    %49 = vector.load %arg6[%c3_38, %c0_39, %c0_40] : memref<5x128x72xf32, #tpu.memory_space<vmem>>, vector<1x128x72xf32>
    %50 = vector.shape_cast %49 : vector<1x128x72xf32> to vector<128x72xf32>
    %51 = vector.extract_strided_slice %34 {offsets = [0, 3], sizes = [72, 8], strides = [1, 1]} : vector<72x12xf32> to vector<72x8xf32>
    %cst_41 = arith.constant dense<0.000000e+00> : vector<128x8xf32>
    %52 = tpu.matmul %50, %51, %cst_41 {dimension_numbers = #tpu.dot_dimension_numbers<[1], [0], [0], [1], [0, 0, 1, 1], [], []>} : vector<128x72xf32>, vector<72x8xf32>, vector<128x8xf32> -> vector<128x8xf32>
    %53 = arith.addf %48, %52 : vector<128x8xf32>
    %c4_42 = arith.constant 4 : index
    %c0_43 = arith.constant 0 : index
    %c0_44 = arith.constant 0 : index
    %54 = vector.load %arg6[%c4_42, %c0_43, %c0_44] : memref<5x128x72xf32, #tpu.memory_space<vmem>>, vector<1x128x72xf32>
    %55 = vector.shape_cast %54 : vector<1x128x72xf32> to vector<128x72xf32>
    %56 = vector.extract_strided_slice %34 {offsets = [0, 4], sizes = [72, 8], strides = [1, 1]} : vector<72x12xf32> to vector<72x8xf32>
    %cst_45 = arith.constant dense<0.000000e+00> : vector<128x8xf32>
    %57 = tpu.matmul %55, %56, %cst_45 {dimension_numbers = #tpu.dot_dimension_numbers<[1], [0], [0], [1], [0, 0, 1, 1], [], []>} : vector<128x72xf32>, vector<72x8xf32>, vector<128x8xf32> -> vector<128x8xf32>
    %58 = arith.addf %53, %57 : vector<128x8xf32>
    %c0_46 = arith.constant 0 : index
    %c0_47 = arith.constant 0 : index
    %59 = vector.load %arg7[%c0_46, %c0_47] : memref<128x1xf32, #tpu.memory_space<vmem>>, vector<128x1xf32>
    %60 = vector.broadcast %59 : vector<128x1xf32> to vector<128x8xf32>
    %61 = arith.addf %58, %60 : vector<128x8xf32>
    %cst_48 = arith.constant 0.000000e+00 : f32
    %62 = vector.broadcast %cst_48 : f32 to vector<128x8xf32>
    %63 = arith.maximumf %61, %62 : vector<128x8xf32>
    %c0_49 = arith.constant 0 : index
    %c0_50 = arith.constant 0 : index
    %64 = vector.load %arg9[%c0_49, %c0_50] : memref<64x128xf32, #tpu.memory_space<vmem>>, vector<64x128xf32>
    %c0_51 = arith.constant 0 : index
    %c0_52 = arith.constant 0 : index
    %65 = vector.load %arg8[%c0_51, %c0_52] : memref<8x4xf32, #tpu.memory_space<vmem>>, vector<8x4xf32>
    %cst_53 = arith.constant dense<0.000000e+00> : vector<128x4xf32>
    %66 = tpu.matmul %63, %65, %cst_53 {dimension_numbers = #tpu.dot_dimension_numbers<[1], [0], [0], [1], [0, 0, 1, 1], [], []>} : vector<128x8xf32>, vector<8x4xf32>, vector<128x4xf32> -> vector<128x4xf32>
    %cst_54 = arith.constant dense<0.000000e+00> : vector<64x4xf32>
    %67 = tpu.matmul %64, %66, %cst_54 {dimension_numbers = #tpu.dot_dimension_numbers<[1], [0], [0], [1], [0, 0, 1, 1], [], []>} : vector<64x128xf32>, vector<128x4xf32>, vector<64x4xf32> -> vector<64x4xf32>
    %c0_55 = arith.constant 0 : index
    %c0_56 = arith.constant 0 : index
    %68 = vector.load %arg11[%c0_55, %c0_56] : memref<120x1xf32, #tpu.memory_space<vmem>>, vector<120x1xf32>
    %c0_57 = arith.constant 0 : index
    %c0_58 = arith.constant 0 : index
    %c0_59 = arith.constant 0 : index
    %69 = vector.load %arg10[%c0_57, %c0_58, %c0_59] : memref<4x120x64xf32, #tpu.memory_space<vmem>>, vector<1x120x64xf32>
    %70 = vector.shape_cast %69 : vector<1x120x64xf32> to vector<120x64xf32>
    %71 = vector.extract_strided_slice %67 {offsets = [0, 0], sizes = [64, 1], strides = [1, 1]} : vector<64x4xf32> to vector<64x1xf32>
    %cst_60 = arith.constant dense<0.000000e+00> : vector<120x1xf32>
    %72 = tpu.matmul %70, %71, %cst_60 {dimension_numbers = #tpu.dot_dimension_numbers<[1], [0], [0], [1], [0, 0, 1, 1], [], []>} : vector<120x64xf32>, vector<64x1xf32>, vector<120x1xf32> -> vector<120x1xf32>
    %73 = arith.addf %68, %72 : vector<120x1xf32>
    %c1_61 = arith.constant 1 : index
    %c0_62 = arith.constant 0 : index
    %c0_63 = arith.constant 0 : index
    %74 = vector.load %arg10[%c1_61, %c0_62, %c0_63] : memref<4x120x64xf32, #tpu.memory_space<vmem>>, vector<1x120x64xf32>
    %75 = vector.shape_cast %74 : vector<1x120x64xf32> to vector<120x64xf32>
    %76 = vector.extract_strided_slice %67 {offsets = [0, 1], sizes = [64, 1], strides = [1, 1]} : vector<64x4xf32> to vector<64x1xf32>
    %cst_64 = arith.constant dense<0.000000e+00> : vector<120x1xf32>
    %77 = tpu.matmul %75, %76, %cst_64 {dimension_numbers = #tpu.dot_dimension_numbers<[1], [0], [0], [1], [0, 0, 1, 1], [], []>} : vector<120x64xf32>, vector<64x1xf32>, vector<120x1xf32> -> vector<120x1xf32>
    %78 = arith.addf %73, %77 : vector<120x1xf32>
    %c2_65 = arith.constant 2 : index
    %c0_66 = arith.constant 0 : index
    %c0_67 = arith.constant 0 : index
    %79 = vector.load %arg10[%c2_65, %c0_66, %c0_67] : memref<4x120x64xf32, #tpu.memory_space<vmem>>, vector<1x120x64xf32>
    %80 = vector.shape_cast %79 : vector<1x120x64xf32> to vector<120x64xf32>
    %81 = vector.extract_strided_slice %67 {offsets = [0, 2], sizes = [64, 1], strides = [1, 1]} : vector<64x4xf32> to vector<64x1xf32>
    %cst_68 = arith.constant dense<0.000000e+00> : vector<120x1xf32>
    %82 = tpu.matmul %80, %81, %cst_68 {dimension_numbers = #tpu.dot_dimension_numbers<[1], [0], [0], [1], [0, 0, 1, 1], [], []>} : vector<120x64xf32>, vector<64x1xf32>, vector<120x1xf32> -> vector<120x1xf32>
    %83 = arith.addf %78, %82 : vector<120x1xf32>
    %c3_69 = arith.constant 3 : index
    %c0_70 = arith.constant 0 : index
    %c0_71 = arith.constant 0 : index
    %84 = vector.load %arg10[%c3_69, %c0_70, %c0_71] : memref<4x120x64xf32, #tpu.memory_space<vmem>>, vector<1x120x64xf32>
    %85 = vector.shape_cast %84 : vector<1x120x64xf32> to vector<120x64xf32>
    %86 = vector.extract_strided_slice %67 {offsets = [0, 3], sizes = [64, 1], strides = [1, 1]} : vector<64x4xf32> to vector<64x1xf32>
    %cst_72 = arith.constant dense<0.000000e+00> : vector<120x1xf32>
    %87 = tpu.matmul %85, %86, %cst_72 {dimension_numbers = #tpu.dot_dimension_numbers<[1], [0], [0], [1], [0, 0, 1, 1], [], []>} : vector<120x64xf32>, vector<64x1xf32>, vector<120x1xf32> -> vector<120x1xf32>
    %88 = arith.addf %83, %87 : vector<120x1xf32>
    %cst_73 = arith.constant 0.000000e+00 : f32
    %89 = vector.broadcast %cst_73 : f32 to vector<120x1xf32>
    %90 = arith.maximumf %88, %89 : vector<120x1xf32>
    %c0_74 = arith.constant 0 : index
    %c0_75 = arith.constant 0 : index
    %91 = vector.load %arg12[%c0_74, %c0_75] : memref<84x120xf32, #tpu.memory_space<vmem>>, vector<84x120xf32>
    %cst_76 = arith.constant dense<0.000000e+00> : vector<84x1xf32>
    %92 = tpu.matmul %91, %90, %cst_76 {dimension_numbers = #tpu.dot_dimension_numbers<[1], [0], [0], [1], [0, 0, 1, 1], [], []>} : vector<84x120xf32>, vector<120x1xf32>, vector<84x1xf32> -> vector<84x1xf32>
    %c0_77 = arith.constant 0 : index
    %c0_78 = arith.constant 0 : index
    %93 = vector.load %arg13[%c0_77, %c0_78] : memref<84x1xf32, #tpu.memory_space<vmem>>, vector<84x1xf32>
    %94 = arith.addf %92, %93 : vector<84x1xf32>
    %cst_79 = arith.constant 0.000000e+00 : f32
    %95 = vector.broadcast %cst_79 : f32 to vector<84x1xf32>
    %96 = arith.maximumf %94, %95 : vector<84x1xf32>
    %c0_80 = arith.constant 0 : index
    %c0_81 = arith.constant 0 : index
    %97 = vector.load %arg14[%c0_80, %c0_81] : memref<10x84xf32, #tpu.memory_space<vmem>>, vector<10x84xf32>
    %cst_82 = arith.constant dense<0.000000e+00> : vector<10x1xf32>
    %98 = tpu.matmul %97, %96, %cst_82 {dimension_numbers = #tpu.dot_dimension_numbers<[1], [0], [0], [1], [0, 0, 1, 1], [], []>} : vector<10x84xf32>, vector<84x1xf32>, vector<10x1xf32> -> vector<10x1xf32>
    %c0_83 = arith.constant 0 : index
    %c0_84 = arith.constant 0 : index
    %99 = vector.load %arg15[%c0_83, %c0_84] : memref<10x1xf32, #tpu.memory_space<vmem>>, vector<10x1xf32>
    %100 = arith.addf %98, %99 : vector<10x1xf32>
    %c0_85 = arith.constant 0 : index
    %c0_86 = arith.constant 0 : index
    %c0_87 = arith.constant 0 : index
    %101 = vector.load %arg16[%c0_85, %c0_86, %c0_87] : memref<1x10x1xf32, #tpu.memory_space<vmem>>, vector<1x10x1xf32>
    %102 = vector.shape_cast %101 : vector<1x10x1xf32> to vector<10x1xf32>
    %103 = vector.shape_cast %100 : vector<10x1xf32> to vector<1x10x1xf32>
    tpu.vector_store %arg16[%c0_85, %c0_86, %c0_87], %103 {strides = array<i32>} : memref<1x10x1xf32, #tpu.memory_space<vmem>>, vector<1x10x1xf32>,
    return
  }
  func.func @transform_0(%arg0: i32) -> (i32, i32, i32) {
    %c0_i32 = arith.constant 0 : i32
    %c0_i32_0 = arith.constant 0 : i32
    %c0_i32_1 = arith.constant 0 : i32
    return %arg0, %c0_i32, %c0_i32_0 : i32, i32, i32
  }
  func.func @transform_1(%arg0: i32) -> (i32, i32, i32) {
    %c0_i32 = arith.constant 0 : i32
    %c0_i32_0 = arith.constant 0 : i32
    %c0_i32_1 = arith.constant 0 : i32
    %c0_i32_2 = arith.constant 0 : i32
    return %c0_i32, %c0_i32_0, %c0_i32_1 : i32, i32, i32
  }
  func.func @transform_2(%arg0: i32) -> (i32, i32) {
    %c0_i32 = arith.constant 0 : i32
    %c0_i32_0 = arith.constant 0 : i32
    %c0_i32_1 = arith.constant 0 : i32
    return %c0_i32, %c0_i32_0 : i32, i32
  }
  func.func @transform_3(%arg0: i32) -> (i32, i32) {
    %c0_i32 = arith.constant 0 : i32
    %c0_i32_0 = arith.constant 0 : i32
    %c0_i32_1 = arith.constant 0 : i32
    return %c0_i32, %c0_i32_0 : i32, i32
  }
  func.func @transform_4(%arg0: i32) -> (i32, i32) {
    %c0_i32 = arith.constant 0 : i32
    %c0_i32_0 = arith.constant 0 : i32
    %c0_i32_1 = arith.constant 0 : i32
    return %c0_i32, %c0_i32_0 : i32, i32
  }
  func.func @transform_5(%arg0: i32) -> (i32, i32, i32) {
    %c0_i32 = arith.constant 0 : i32
    %c0_i32_0 = arith.constant 0 : i32
    %c0_i32_1 = arith.constant 0 : i32
    %c0_i32_2 = arith.constant 0 : i32
    return %c0_i32, %c0_i32_0, %c0_i32_1 : i32, i32, i32
  }
  func.func @transform_6(%arg0: i32) -> (i32, i32) {
    %c0_i32 = arith.constant 0 : i32
    %c0_i32_0 = arith.constant 0 : i32
    %c0_i32_1 = arith.constant 0 : i32
    return %c0_i32, %c0_i32_0 : i32, i32
  }
  func.func @transform_7(%arg0: i32) -> (i32, i32) {
    %c0_i32 = arith.constant 0 : i32
    %c0_i32_0 = arith.constant 0 : i32
    %c0_i32_1 = arith.constant 0 : i32
    return %c0_i32, %c0_i32_0 : i32, i32
  }
  func.func @transform_8(%arg0: i32) -> (i32, i32) {
    %c0_i32 = arith.constant 0 : i32
    %c0_i32_0 = arith.constant 0 : i32
    %c0_i32_1 = arith.constant 0 : i32
    return %c0_i32, %c0_i32_0 : i32, i32
  }
  func.func @transform_9(%arg0: i32) -> (i32, i32, i32) {
    %c0_i32 = arith.constant 0 : i32
    %c0_i32_0 = arith.constant 0 : i32
    %c0_i32_1 = arith.constant 0 : i32
    %c0_i32_2 = arith.constant 0 : i32
    return %c0_i32, %c0_i32_0, %c0_i32_1 : i32, i32, i32
  }
  func.func @transform_10(%arg0: i32) -> (i32, i32) {
    %c0_i32 = arith.constant 0 : i32
    %c0_i32_0 = arith.constant 0 : i32
    %c0_i32_1 = arith.constant 0 : i32
    return %c0_i32, %c0_i32_0 : i32, i32
  }
  func.func @transform_11(%arg0: i32) -> (i32, i32) {
    %c0_i32 = arith.constant 0 : i32
    %c0_i32_0 = arith.constant 0 : i32
    %c0_i32_1 = arith.constant 0 : i32
    return %c0_i32, %c0_i32_0 : i32, i32
  }
  func.func @transform_12(%arg0: i32) -> (i32, i32) {
    %c0_i32 = arith.constant 0 : i32
    %c0_i32_0 = arith.constant 0 : i32
    %c0_i32_1 = arith.constant 0 : i32
    return %c0_i32, %c0_i32_0 : i32, i32
  }
  func.func @transform_13(%arg0: i32) -> (i32, i32) {
    %c0_i32 = arith.constant 0 : i32
    %c0_i32_0 = arith.constant 0 : i32
    %c0_i32_1 = arith.constant 0 : i32
    return %c0_i32, %c0_i32_0 : i32, i32
  }
  func.func @transform_14(%arg0: i32) -> (i32, i32) {
    %c0_i32 = arith.constant 0 : i32
    %c0_i32_0 = arith.constant 0 : i32
    %c0_i32_1 = arith.constant 0 : i32
    return %c0_i32, %c0_i32_0 : i32, i32
  }
  func.func @transform_15(%arg0: i32) -> (i32, i32, i32) {
    %c0_i32 = arith.constant 0 : i32
    %c0_i32_0 = arith.constant 0 : i32
    %c0_i32_1 = arith.constant 0 : i32
    return %arg0, %c0_i32, %c0_i32_0 : i32, i32, i32
  }
}

</mosaic_0001>

<bundles_post_ra>
// kernel: lenet_forward.1
= control target key start
LH: loop header
LB: loop body
LE: loop exit
PB: predicated region body
PF: predicated region fallthrough
CT: control target
= control target key end

     0   :  { %s7763_s18 = smov 0   ;;  %s9393_s0 = inlined_call_operand.vmem [shape: f32[2,28,28], index: 0, kind: input, shape index: {}]   ;;  %s9394_s1 = inlined_call_operand.vmem [shape: f32[5,144,28], index: 1, kind: input, shape index: {}]   ;;  %s9395_s2 = inlined_call_operand.vmem [shape: f32[144,1], index: 2, kind: input, shape index: {}]   ;;  %s9396_s3 = inlined_call_operand.vmem [shape: f32[24,12], index: 3, kind: input, shape index: {}]   ;;  %s9397_s4 = inlined_call_operand.vmem [shape: f32[72,144], index: 4, kind: input, shape index: {}]   ;;  %s9398_s5 = inlined_call_operand.vmem [shape: f32[5,128,72], index: 5, kind: input, shape index: {}]   ;;  %s9399_s6 = inlined_call_operand.vmem [shape: f32[128,1], index: 6, kind: input, shape index: {}]   ;;  %s9400_s7 = inlined_call_operand.vmem [shape: f32[8,4], index: 7, kind: input, shape index: {}]   ;;  %s9401_s8 = inlined_call_operand.vmem [shape: f32[64,128], index: 8, kind: input, shape index: {}]   ;;  %s9402_s9 = inlined_call_operand.vmem [shape: f32[4,120,64], index: 9, kind: input, shape index: {}]   ;;  %s9403_s10 = inlined_call_operand.vmem [shape: f32[120,1], index: 10, kind: input, shape index: {}]   ;;  %s9404_s11 = inlined_call_operand.vmem [shape: f32[84,120], index: 11, kind: input, shape index: {}]   ;;  %s9405_s12 = inlined_call_operand.vmem [shape: f32[84,1], index: 12, kind: input, shape index: {}]   ;;  %s9406_s13 = inlined_call_operand.vmem [shape: f32[10,84], index: 13, kind: input, shape index: {}]   ;;  %s9407_s14 = inlined_call_operand.vmem [shape: f32[10,1], index: 14, kind: input, shape index: {}]   ;;  %s9408_s15 = inlined_call_operand.vmem [shape: f32[2,10,1], index: 15, kind: output, shape index: {}]  }
   0x1 LB: > { %s5225_s19 = sadd.s32 4294967295, %s7672_s18   ;;  %p5229_p0 = scmp.ge.s32.totalorder %s7672_s18, 1  ;;  %s7672_s18 = sphi %s7763_s18, %s25_s18  }
   0x2   : > { %p437_p1 = scmp.lt.s32.totalorder %s7672_s18, 3 }
   0x4   : > { %p438_p2 = pnand %p5229_p0, %p437_p1 }
   0x5   : > { %p485_p3 = scmp.lt.s32.totalorder (!%p438_p2), %s5225_s19, 1  ;;  %v499_v0 = vld [vmem:[%s9394_s1] sm:$0xff] (!%p438_p2)  ;;  %vm551_vm0 = vcmask (!%p438_p2), 228352   ;;  %vm606_vm1 = vcmask (!%p438_p2), 1043456   ;;  %s7674_s26 = smov (!%p438_p2), 126   ;;  %vm7676_vm2 = vmmov (!%p438_p2), 1  }
   0x6   : > { %441 = sbr.rel (%p438_p2) target bundleno = 2868 (0xb34), region = 80  ;;  %6182 = vmatprep.mubr.msk.f32.mxu0 (!%p438_p2), %vm551_vm0, %v499_v0  ;;  %s7675_s27 = smov (!%p438_p2), 125   ;;  %vm7784_vm3 = vmpackc.low (!%p438_p2), %vm606_vm1, %vm7676_vm2  ;;  %v500_v10 = vld [vmem:[%s9394_s1 + $0x8] sm:$0xff] (!%p438_p2)  ;;  %v501_v11 = vld [vmem:[%s9394_s1 + $0x10] sm:$0xff] (!%p438_p2)  ;;  %v7679_v31 = vmov (!%p438_p2), 0   ;;  %vm1917_vm4 = vcmask (!%p438_p2), 195584  }
   0x7   : > { %s7677_s30 = smov (!%p438_p2), 124   ;;  %s7678_s16 = smov (!%p438_p2), 127   ;;  %v502_v12 = vld [vmem:[%s9394_s1 + $0x18] sm:$0xff] (!%p438_p2)  ;;  %v503_v13 = vld [vmem:[%s9394_s1 + $0x20] sm:$0xff] (!%p438_p2)  ;;  %v504_v14 = vld [vmem:[%s9394_s1 + $0x28] sm:$0xff] (!%p438_p2)  ;;  %7525 = vset.pattern.permute.xlu1 (!%p438_p2), %v7679_v31  ;;  %7524 = vset.pattern.permute.xlu0 (!%p438_p2), %v7679_v31  ;;  %vm2127_vm5 = vcmask (!%p438_p2), 130048  }
   0x8   : > { %v505_v15 = vld [vmem:[%s9394_s1 + $0x30] sm:$0xff] (!%p438_p2)  ;;  %v506_v16 = vld [vmem:[%s9394_s1 + $0x38] sm:$0xff] (!%p438_p2)  ;;  %v507_v17 = vld [vmem:[%s9394_s1 + $0x40] sm:$0xff] (!%p438_p2)  ;;  %vm2334_vm6 = vcmask (!%p438_p2), 588800   ;;  %vm3617_vm7 = vcmask (!%p438_p2), 64512   ;;  %vm7681_vm8 = vmmov (!%p438_p2), 0  }
   0x9   : > { %v508_v18 = vld [vmem:[%s9394_s1 + $0x48] sm:$0xff] (!%p438_p2)  ;;  %v509_v19 = vld [vmem:[%s9394_s1 + $0x50] sm:$0xff] (!%p438_p2)  ;;  %v510_v20 = vld [vmem:[%s9394_s1 + $0x58] sm:$0xff] (!%p438_p2)  ;;  %vm3946_vm9 = vcmask (!%p438_p2), 523264   ;;  %vm4912_vm10 = vcmask (!%p438_p2), 982016   ;;  %vm5081_vm11 = vcmask (!%p438_p2), 687104  }
   0xa   : > { %v511_v21 = vld [vmem:[%s9394_s1 + $0x60] sm:$0xff] (!%p438_p2)  ;;  %v512_v22 = vld [vmem:[%s9394_s1 + $0x68] sm:$0xff] (!%p438_p2)  ;;  %v513_v23 = vld [vmem:[%s9394_s1 + $0x70] sm:$0xff] (!%p438_p2)  ;;  %vm5168_vm12 = vcmask (!%p438_p2), 1024   ;;  %vm5166_vm13 = vcmask (!%p438_p2), 7168  }
   0xb   : > { %v514_v24 = vld [vmem:[%s9394_s1 + $0x78] sm:$0xff] (!%p438_p2)  ;;  %v515_v25 = vld [vmem:[%s9394_s1 + $0x80] sm:$0xff] (!%p438_p2)  ;;  %v516_v26 = vld [vmem:[%s9394_s1 + $0x88] sm:$0xff] (!%p438_p2) }
   0xc   : > { %v5290_v27 = vld [vmem:[%s9394_s1 + $0x120] sm:$0xff] (!%p438_p2)  ;;  %v5234_v28 = vld [vmem:[%s9394_s1 + $0x90] sm:$0xff] (!%p438_p2)  ;;  %v1753_v29 = vld [vmem:[%s9395_s2 + $0x8] sm:$0xff] (!%p438_p2) }
   0xd   : > { %s9412_s19 = smov (!%p485_p3, %s5225_s19), 1  ;;  %6147 = vmatprep.mubr.msk.f32.mxu1 %vm551_vm0, %v5234_v28  ;;  %v1752_v30 = vld [vmem:[%s9395_s2] sm:$0xff]  ;;  %v1754_v32 = vld [vmem:[%s9395_s2 + $0x10] sm:$0xff]  ;;  %v1755_v33 = vld [vmem:[%s9395_s2 + $0x18] sm:$0xff] }
   0xe   : > { %s5709_s22 = sshll.u32 %s9412_s19, 5  ;;  %v1756_v34 = vld [vmem:[%s9395_s2 + $0x20] sm:$0xff]  ;;  %v1757_v35 = vld [vmem:[%s9395_s2 + $0x28] sm:$0xff]  ;;  %v1758_v38 = vld [vmem:[%s9395_s2 + $0x30] sm:$0xff] }
   0xf   : > { %s489_s25 = scalar_lea.vmem %s9393_s0, %s5709_s22  ;;  %v1759_v39 = vld [vmem:[%s9395_s2 + $0x38] sm:$0xff]  ;;  %v1760_v47 = vld [vmem:[%s9395_s2 + $0x40] sm:$0xff]  ;;  %v1761_v48 = vld [vmem:[%s9395_s2 + $0x48] sm:$0xff]  ;;  %s5710_s22 = sshll.u32 %s9412_s19, 4 }
  0x10   : > { %v495_v1 = vld [vmem:[%s489_s25] sm:$0xff]  ;;  %v496_v2 = vld [vmem:[%s489_s25 + $0x8] sm:$0xff]  ;;  %v497_v3 = vld [vmem:[%s489_s25 + $0x10] sm:$0xff]  ;;  %s494_s17 = scalar_lea.vmem %s9408_s15, %s5710_s22 }
  0x11   : > { %v7484_v4 = vpack.i.bf16 %v496_v2, %v495_v1  ;;  %v498_v5 = vld [vmem:[%s489_s25 + $0x18] sm:$0xf]  ;;  %v6969_v7 = vpack.c.bf16 %v496_v2, %v495_v1  ;;  %v1762_v57 = vld [vmem:[%s9395_s2 + $0x50] sm:$0xff]  ;;  %v5291_v61 = vld [vmem:[%s9394_s1 + $0x128] sm:$0xff] }
  0x12   : > { %v7489_v6 = vpack.i.bf16 %v498_v5, %v497_v3  ;;  %v6973_v8 = vpack.c.bf16 %v498_v5, %v497_v3  ;;  %v1763_v60 = vld [vmem:[%s9395_s2 + $0x58] sm:$0xff]  ;;  %v5292_v62 = vld [vmem:[%s9394_s1 + $0x130] sm:$0xff]  ;;  %v5240_v28 = vld [vmem:[%s9394_s1 + $0xc0] sm:$0xff] }
  0x13   : > { %7485 = vrot.lane.b32.xlu0 %v7484_v4, %s7674_s26  ;;  %7495 = vrot.lane.b32.xlu1 %v7484_v4, %s7675_s27  ;;  %v5241_v31 = vld [vmem:[%s9394_s1 + $0xc8] sm:$0xff]  ;;  %v5336_v9 = vld [vmem:[%s9394_s1 + $0x1f8] sm:$0xff] }
  0x14   : > { %6970 = vmatprep.subr.bf16.mxu0 %v6969_v7 }
  0x15   : > { %6972 = vmatpush3.bf16.msra.mxu0 %v6969_v7  ;;  %v1765_v7 = vld [vmem:[%s9395_s2 + $0x68] sm:$0xff] }
  0x16   : > { %6975 = vmatprep.subr.msk.bf16.mxu0 %vm7784_vm3, %v6973_v8 }
  0x17   : > { %7490 = vrot.lane.b32.xlu0 %v7489_v6, %s7674_s26  ;;  %7500 = vrot.lane.b32.xlu1 %v7489_v6, %s7675_s27 }
  0x19   : > { %6978 = vmatpush3.bf16.msk.msra.mxu0 %vm7784_vm3, %v6973_v8  ;;  %v5293_v8 = vld [vmem:[%s9394_s1 + $0x138] sm:$0xff] }
  0x1b   : > { %7510 = vrot.lane.b32.xlu1 %v7484_v4, %s7677_s30  ;;  %7505 = vrot.lane.b32.xlu0 %v7484_v4, %s7678_s16 }
  0x1c   : > { %6183 = vmatmul.mubr.msk.f32.vlgmr.msra.gmra.mrb[0].mxu0 %vm551_vm0, %v500_v10  ;;  %v5294_v10 = vld [vmem:[%s9394_s1 + $0x140] sm:$0xff] }
  0x1d   : > { %6185 = vmatprep.mubr.msk.f32.mxu0 %vm551_vm0, %v501_v11 }
  0x1f   : > { %7520 = vrot.lane.b32.xlu1 %v7489_v6, %s7677_s30  ;;  %7515 = vrot.lane.b32.xlu0 %v7489_v6, %s7678_s16  ;;  %v1764_v6 = vld [vmem:[%s9395_s2 + $0x60] sm:$0xff] }
  0x20   : > { %6186 = vmatmul.mubr.msk.f32.gmra.mrb[2].mxu0 %vm551_vm0, %v502_v12 }
  0x21   : > { %6188 = vmatprep.mubr.msk.f32.mxu0 %vm551_vm0, %v503_v13  ;;  %v1766_v13 = vld [vmem:[%s9395_s2 + $0x70] sm:$0xff] }
  0x23   : > { %1777 = vperm.xlu1 %7525, %v1753_v29   ;;  %1772 = vperm.xlu0 %7524, %v1752_v30   ;;  %v5301_v29 = vld [vmem:[%s9394_s1 + $0x178] sm:$0xff]  ;;  %v5302_v30 = vld [vmem:[%s9394_s1 + $0x180] sm:$0xff] }
  0x24   : > { %6189 = vmatmul.mubr.msk.f32.gmra.mrb[4].mxu0 %vm551_vm0, %v504_v14  ;;  %v1767_v14 = vld [vmem:[%s9395_s2 + $0x78] sm:$0xff] }
  0x25   : > { %6191 = vmatprep.mubr.msk.f32.mxu0 %vm551_vm0, %v505_v15  ;;  %v5295_v15 = vld [vmem:[%s9394_s1 + $0x148] sm:$0xff] }
  0x27   : > { %1782 = vperm.xlu1 %7525, %v1754_v32   ;;  %1787 = vperm.xlu0 %7524, %v1755_v33   ;;  %v5242_v32 = vld [vmem:[%s9394_s1 + $0xd0] sm:$0xff]  ;;  %v5303_v33 = vld [vmem:[%s9394_s1 + $0x188] sm:$0xff] }
  0x28   : > { %6192 = vmatmul.mubr.msk.f32.gmra.mrb[6].mxu0 %vm551_vm0, %v506_v16  ;;  %v5296_v16 = vld [vmem:[%s9394_s1 + $0x150] sm:$0xff] }
  0x29   : > { %6194 = vmatprep.mubr.msk.f32.mxu0 %vm551_vm0, %v507_v17  ;;  %v5235_v17 = vld [vmem:[%s9394_s1 + $0x98] sm:$0xff] }
  0x2b   : > { %1792 = vperm.xlu1 %7525, %v1756_v34   ;;  %1797 = vperm.xlu0 %7524, %v1757_v35   ;;  %v5304_v34 = vld [vmem:[%s9394_s1 + $0x190] sm:$0xff]  ;;  %v5243_v35 = vld [vmem:[%s9394_s1 + $0xd8] sm:$0xff] }
  0x2c   : > { %6195 = vmatmul.mubr.msk.f32.gmra.mrb[8].mxu0 %vm551_vm0, %v508_v18  ;;  %v5236_v18 = vld [vmem:[%s9394_s1 + $0xa0] sm:$0xff] }
  0x2d   : > { %6197 = vmatprep.mubr.msk.f32.mxu0 %vm551_vm0, %v509_v19  ;;  %v1768_v19 = vld [vmem:[%s9395_s2 + $0x80] sm:$0xff] }
  0x2f   : > { %1802 = vperm.xlu1 %7525, %v1758_v38   ;;  %1807 = vperm.xlu0 %7524, %v1759_v39   ;;  %v5306_v38 = vld [vmem:[%s9394_s1 + $0x1a0] sm:$0xff]  ;;  %v5245_v39 = vld [vmem:[%s9394_s1 + $0xe8] sm:$0xff] }
  0x30   : > { %6198 = vmatmul.mubr.msk.f32.gmra.mrb[10].mxu0 %vm551_vm0, %v510_v20  ;;  %v1769_v20 = vld [vmem:[%s9395_s2 + $0x88] sm:$0xff] }
  0x31   : > { %6200 = vmatprep.mubr.msk.f32.mxu0 %vm551_vm0, %v511_v21  ;;  %v5297_v21 = vld [vmem:[%s9394_s1 + $0x158] sm:$0xff] }
  0x33   : > { %1812 = vperm.xlu1 %7525, %v1760_v47   ;;  %1817 = vperm.xlu0 %7524, %v1761_v48   ;;  %v5248_v47 = vld [vmem:[%s9394_s1 + $0x100] sm:$0xff]  ;;  %v5328_v48 = vld [vmem:[%s9394_s1 + $0x1b8] sm:$0xff] }
  0x34   : > { %6201 = vmatmul.mubr.msk.f32.gmra.mrb[12].mxu0 %vm551_vm0, %v512_v22  ;;  %v5298_v22 = vld [vmem:[%s9394_s1 + $0x160] sm:$0xff] }
  0x35   : > { %6203 = vmatprep.mubr.msk.f32.mxu0 %vm551_vm0, %v513_v23  ;;  %v5237_v23 = vld [vmem:[%s9394_s1 + $0xa8] sm:$0xff] }
  0x37   : > { %1822 = vperm.xlu1 %7525, %v1762_v57   ;;  %1827 = vperm.xlu0 %7524, %v1763_v60   ;;  %v5333_v57 = vld [vmem:[%s9394_s1 + $0x1e0] sm:$0xff] }
  0x38   : > { %6204 = vmatmul.mubr.msk.f32.gmra.mrb[14].mxu0 %vm551_vm0, %v514_v24  ;;  %v5238_v24 = vld [vmem:[%s9394_s1 + $0xb0] sm:$0xff]  ;;  %v5337_v60 = vld [vmem:[%s9394_s1 + $0x200] sm:$0xff] }
  0x39   : > { %6206 = vmatprep.mubr.msk.f32.mxu0 %vm551_vm0, %v515_v25  ;;  %v5299_v25 = vld [vmem:[%s9394_s1 + $0x168] sm:$0xff] }
  0x3b   : > { %1832 = vperm.xlu1 %7525, %v1764_v6   ;;  %1837 = vperm.xlu0 %7524, %v1765_v7   ;;  %v5366_v6 = vld [vmem:[%s9394_s1 + $0x250] sm:$0xff]  ;;  %v5367_v7 = vld [vmem:[%s9394_s1 + $0x258] sm:$0xff] }
  0x3c   : > { %6207 = vmatmul.mubr.msk.f32.gmra.mrb[16].mxu0 %vm551_vm0, %v516_v26  ;;  %v5300_v26 = vld [vmem:[%s9394_s1 + $0x170] sm:$0xff] }
  0x3d   : > { %6217 = vmatprep.mubr.msk.f32.mxu0 %vm551_vm0, %v5290_v27  ;;  %v5239_v27 = vld [vmem:[%s9394_s1 + $0xb8] sm:$0xff] }
  0x3f   : > { %1842 = vperm.xlu1 %7525, %v1766_v13   ;;  %1847 = vperm.xlu0 %7524, %v1767_v14   ;;  %v5372_v13 = vld [vmem:[%s9394_s1 + $0x280] sm:$0xff]  ;;  %v5373_v14 = vld [vmem:[%s9394_s1 + $0x288] sm:$0xff] }
  0x43   : > { %1852 = vperm.xlu1 %7525, %v1768_v19   ;;  %1857 = vperm.xlu0 %7524, %v1769_v20   ;;  %v5378_v19 = vld [vmem:[%s9394_s1 + $0x2b0] sm:$0xff]  ;;  %v5379_v20 = vld [vmem:[%s9394_s1 + $0x2b8] sm:$0xff] }
  0x85   : > { %v7486_v36 = vpop.permute.xlu0 %7485  ;;  %v7496_v37 = vpop.permute.xlu1 %7495 }
  0x86   : > { %v7488_v40 = vunpack.i.h.bf16 %v7486_v36  ;;  %v7487_v41 = vunpack.i.l.bf16 %v7486_v36  ;;  %v7498_v43 = vunpack.i.h.bf16 %v7496_v37  ;;  %v7497_v44 = vunpack.i.l.bf16 %v7496_v37  ;;  %v5244_v36 = vld [vmem:[%s9394_s1 + $0xe0] sm:$0xff]  ;;  %v5305_v37 = vld [vmem:[%s9394_s1 + $0x198] sm:$0xff] }
  0x88   : > { %v6979_v42 = vpack.c.bf16 %v7488_v40, %v7487_v41  ;;  %v6989_v52 = vpack.c.bf16 %v7498_v43, %v7497_v44  ;;  %v5246_v41 = vld [vmem:[%s9394_s1 + $0xf0] sm:$0xff] }
  0x89   : > { %v7491_v45 = vpop.permute.xlu0 %7490  ;;  %v7501_v46 = vpop.permute.xlu1 %7500  ;;  %v5327_v43 = vld [vmem:[%s9394_s1 + $0x1b0] sm:$0xff] }
  0x8a   : > { %v7493_v49 = vunpack.i.h.bf16 %v7491_v45  ;;  %v7492_v50 = vunpack.i.l.bf16 %v7491_v45  ;;  %6980 = vmatprep.subr.bf16.mxu0 %v6979_v42  ;;  %v7503_v53 = vunpack.i.h.bf16 %v7501_v46  ;;  %v7502_v54 = vunpack.i.l.bf16 %v7501_v46  ;;  %v5247_v46 = vld [vmem:[%s9394_s1 + $0xf8] sm:$0xff] }
  0x8b   : > { %6982 = vmatpush3.bf16.msra.mxu0 %v6979_v42  ;;  %v5307_v42 = vld [vmem:[%s9394_s1 + $0x1a8] sm:$0xff] }
  0x8c   : > { %v6983_v51 = vpack.c.bf16 %v7493_v49, %v7492_v50  ;;  %v6993_v63 = vpack.c.bf16 %v7503_v53, %v7502_v54  ;;  %v5329_v49 = vld [vmem:[%s9394_s1 + $0x1c0] sm:$0xff]  ;;  %v5330_v53 = vld [vmem:[%s9394_s1 + $0x1c8] sm:$0xff]  ;;  %v5331_v54 = vld [vmem:[%s9394_s1 + $0x1d0] sm:$0xff] }
  0x8d   : > { %v7511_v55 = vpop.permute.xlu1 %7510  ;;  %v7506_v56 = vpop.permute.xlu0 %7505 }
  0x8e   : > { %6985 = vmatprep.subr.msk.bf16.mxu0 %vm7784_vm3, %v6983_v51  ;;  %v7508_v58 = vunpack.i.h.bf16 %v7506_v56  ;;  %v7507_v59 = vunpack.i.l.bf16 %v7506_v56  ;;  %v7513_v0 = vunpack.i.h.bf16 %v7511_v55  ;;  %v7512_v1 = vunpack.i.l.bf16 %v7511_v55  ;;  %v5251_v55 = vld [vmem:[%s9394_s1 + $0x118] sm:$0xff] }
  0x8f   : > { %6988 = vmatpush3.bf16.msk.msra.mxu0 %vm7784_vm3, %v6983_v51  ;;  %v5249_v51 = vld [vmem:[%s9394_s1 + $0x108] sm:$0xff]  ;;  %v5332_v56 = vld [vmem:[%s9394_s1 + $0x1d8] sm:$0xff] }
  0x90   : > { %6990 = vmatprep.subr.bf16.mxu0 %v6989_v52  ;;  %v6959_v2 = vpack.c.bf16 %v7508_v58, %v7507_v59  ;;  %v7936_v11 = vpack.c.bf16 %v7513_v0, %v7512_v1  ;;  %v5334_v58 = vld [vmem:[%s9394_s1 + $0x1e8] sm:$0xff]  ;;  %v5335_v59 = vld [vmem:[%s9394_s1 + $0x1f0] sm:$0xff]  ;;  %v5341_v0 = vld [vmem:[%s9394_s1 + $0x220] sm:$0xff] }
  0x91   : > { %v7516_v3 = vpop.permute.xlu0 %7515  ;;  %v7521_v40 = vpop.permute.xlu1 %7520  ;;  %v5342_v1 = vld [vmem:[%s9394_s1 + $0x228] sm:$0xff] }
  0x92   : > { %6218 = vmatmul.mubr.msk.f32.vlgmr.msra.gmra.mrb[0].mxu0 %vm551_vm0, %v5291_v61  ;;  %v7518_v4 = vunpack.i.h.bf16 %v7516_v3  ;;  %v7517_v5 = vunpack.i.l.bf16 %v7516_v3  ;;  %6960 = vmatprep.subr.bf16.mxu1 %v6959_v2  ;;  %v7523_v44 = vunpack.i.h.bf16 %v7521_v40  ;;  %v7522_v45 = vunpack.i.l.bf16 %v7521_v40  ;;  %v5338_v61 = vld [vmem:[%s9394_s1 + $0x208] sm:$0xff]  ;;  %v5344_v3 = vld [vmem:[%s9394_s1 + $0x238] sm:$0xff] }
  0x93   : > { %6220 = vmatprep.mubr.msk.f32.mxu0 %vm551_vm0, %v5292_v62  ;;  %6992 = vmatpush3.bf16.msra.mxu0 %v6989_v52  ;;  %v5250_v52 = vld [vmem:[%s9394_s1 + $0x110] sm:$0xff] }
  0x94   : > { %6995 = vmatprep.subr.msk.bf16.mxu0 %vm7784_vm3, %v6993_v63  ;;  %v6963_v12 = vpack.c.bf16 %v7518_v4, %v7517_v5  ;;  %6962 = vmatpush3.bf16.msra.mxu1 %v6959_v2  ;;  %v7003_v50 = vpack.c.bf16 %v7523_v44, %v7522_v45  ;;  %v5339_v62 = vld [vmem:[%s9394_s1 + $0x210] sm:$0xff]  ;;  %v5364_v4 = vld [vmem:[%s9394_s1 + $0x240] sm:$0xff]  ;;  %v5365_v5 = vld [vmem:[%s9394_s1 + $0x248] sm:$0xff] }
  0x95   : > { %v5343_v2 = vld [vmem:[%s9394_s1 + $0x230] sm:$0xff] }
  0x96   : > { %6221 = vmatmul.mubr.msk.f32.gmra.mrb[2].mxu0 %vm551_vm0, %v5293_v8  ;;  %6965 = vmatprep.subr.msk.bf16.mxu1 %vm7784_vm3, %v6963_v12  ;;  %v5368_v8 = vld [vmem:[%s9394_s1 + $0x260] sm:$0xff] }
  0x97   : > { %6223 = vmatprep.mubr.msk.f32.mxu0 %vm551_vm0, %v5294_v10  ;;  %6998 = vmatpush3.bf16.msk.msra.mxu0 %vm7784_vm3, %v6993_v63  ;;  %v5340_v63 = vld [vmem:[%s9394_s1 + $0x218] sm:$0xff]  ;;  %v5369_v10 = vld [vmem:[%s9394_s1 + $0x268] sm:$0xff] }
  0x98   : > { %7000 = vmatprep.subr.bf16.mxu0 %v7936_v11  ;;  %6968 = vmatpush3.bf16.msk.msra.mxu1 %vm7784_vm3, %v6963_v12  ;;  %v5371_v12 = vld [vmem:[%s9394_s1 + $0x278] sm:$0xff] }
  0x9a   : > { %6224 = vmatmul.mubr.msk.f32.gmra.mrb[4].mxu0 %vm551_vm0, %v5295_v15  ;;  %v5374_v15 = vld [vmem:[%s9394_s1 + $0x290] sm:$0xff] }
  0x9b   : > { %6226 = vmatprep.mubr.msk.f32.mxu0 %vm551_vm0, %v5296_v16  ;;  %6148 = vmatmul.mubr.msk.f32.vlgmr.msra.gmra.mrb[0].mxu1 %vm551_vm0, %v5235_v17  ;;  %v5375_v16 = vld [vmem:[%s9394_s1 + $0x298] sm:$0xff]  ;;  %v5376_v17 = vld [vmem:[%s9394_s1 + $0x2a0] sm:$0xff] }
  0x9c   : > { %6150 = vmatprep.mubr.msk.f32.mxu1 %vm551_vm0, %v5236_v18  ;;  %v5377_v18 = vld [vmem:[%s9394_s1 + $0x2a8] sm:$0xff] }
  0x9e   : > { %6227 = vmatmul.mubr.msk.f32.gmra.mrb[6].mxu0 %vm551_vm0, %v5297_v21  ;;  %v5380_v21 = vld [vmem:[%s9394_s1 + $0x2c0] sm:$0xff] }
  0x9f   : > { %6229 = vmatprep.mubr.msk.f32.mxu0 %vm551_vm0, %v5298_v22  ;;  %6151 = vmatmul.mubr.msk.f32.gmra.mrb[2].mxu1 %vm551_vm0, %v5237_v23  ;;  %v5381_v22 = vld [vmem:[%s9394_s1 + $0x2c8] sm:$0xff]  ;;  %v1914_v23 = vld [vmem:[%s9396_s3] sm:$0xff] }
  0xa0   : > { %6153 = vmatprep.mubr.msk.f32.mxu1 %vm551_vm0, %v5238_v24  ;;  %v1915_v24 = vld [vmem:[%s9396_s3 + $0x8] sm:$0xff] }
  0xa2   : > { %6230 = vmatmul.mubr.msk.f32.gmra.mrb[8].mxu0 %vm551_vm0, %v5299_v25  ;;  %v7009_v25 = vpack.c.bf16 %v1915_v24, %v1914_v23  ;;  %v1773_v45 = vpop.permute.xlu0 %1772 }
  0xa3   : > { %6232 = vmatprep.mubr.msk.f32.mxu0 %vm551_vm0, %v5300_v26  ;;  %6154 = vmatmul.mubr.msk.f32.gmra.mrb[4].mxu1 %vm551_vm0, %v5239_v27  ;;  %v1916_v26 = vld [vmem:[%s9396_s3 + $0x10] sm:$0xff] }
  0xa4   : > { %6156 = vmatprep.mubr.msk.f32.mxu1 %vm551_vm0, %v5240_v28  ;;  %7010 = vmatprep.subr.bf16.mxu1 %v7009_v25 }
  0xa5   : > { %7012 = vmatpush3.bf16.msra.mxu1 %v7009_v25 }
  0xa6   : > { %6233 = vmatmul.mubr.msk.f32.gmra.mrb[10].mxu0 %vm551_vm0, %v5301_v29  ;;  %6318 = vmatprep.subr.mxu1 %v1916_v26 }
  0xa7   : > { %6235 = vmatprep.mubr.msk.f32.mxu0 %vm551_vm0, %v5302_v30  ;;  %6157 = vmatmul.mubr.msk.f32.gmra.mrb[6].mxu1 %vm551_vm0, %v5241_v31 }
  0xa8   : > { %6159 = vmatprep.mubr.msk.f32.mxu1 %vm551_vm0, %v5242_v32 }
  0xa9   : > { %6319 = vmatpush3.msra.mxu1 %v1916_v26 }
  0xaa   : > { %6236 = vmatmul.mubr.msk.f32.gmra.mrb[12].mxu0 %vm551_vm0, %v5303_v33 }
  0xab   : > { %6238 = vmatprep.mubr.msk.f32.mxu0 %vm551_vm0, %v5304_v34  ;;  %6160 = vmatmul.mubr.msk.f32.gmra.mrb[8].mxu1 %vm551_vm0, %v5243_v35 }
  0xac   : > { %6162 = vmatprep.mubr.msk.f32.mxu1 %vm551_vm0, %v5244_v36 }
  0xae   : > { %6239 = vmatmul.mubr.msk.f32.gmra.mrb[14].mxu0 %vm551_vm0, %v5305_v37 }
  0xaf   : > { %6241 = vmatprep.mubr.msk.f32.mxu0 %vm551_vm0, %v5306_v38  ;;  %6163 = vmatmul.mubr.msk.f32.gmra.mrb[10].mxu1 %vm551_vm0, %v5245_v39 }
  0xb0   : > { %6165 = vmatprep.mubr.msk.f32.mxu1 %vm551_vm0, %v5246_v41 }
  0xb2   : > { %6242 = vmatmul.mubr.msk.f32.gmra.mrb[16].mxu0 %vm551_vm0, %v5307_v42 }
  0xb3   : > { %6252 = vmatprep.mubr.msk.f32.mxu0 %vm551_vm0, %v5327_v43  ;;  %6166 = vmatmul.mubr.msk.f32.gmra.mrb[12].mxu1 %vm551_vm0, %v5247_v46  ;;  %v1778_v46 = vpop.permute.xlu1 %1777 }
  0xb4   : > { %6168 = vmatprep.mubr.msk.f32.mxu1 %vm551_vm0, %v5248_v47  ;;  %v1788_v47 = vpop.permute.xlu0 %1787 }
  0xb6   : > { %6253 = vmatmul.mubr.msk.f32.vlgmr.msra.gmra.mrb[0].mxu0 %vm551_vm0, %v5328_v48 }
  0xb7   : > { %6255 = vmatprep.mubr.msk.f32.mxu0 %vm551_vm0, %v5329_v49  ;;  %7002 = vmatpush3.bf16.msra.mxu0 %v7936_v11  ;;  %v5370_v11 = vld [vmem:[%s9394_s1 + $0x270] sm:$0xff]  ;;  %v1783_v48 = vpop.permute.xlu1 %1782 }
  0xb8   : > { %7005 = vmatprep.subr.msk.bf16.mxu0 %vm7784_vm3, %v7003_v50  ;;  %6169 = vmatmul.mubr.msk.f32.gmra.mrb[14].mxu1 %vm551_vm0, %v5249_v51  ;;  %v1798_v49 = vpop.permute.xlu0 %1797 }
  0xb9   : > { %6171 = vmatprep.mubr.msk.f32.mxu1 %vm551_vm0, %v5250_v52 }
  0xba   : > { %6256 = vmatmul.mubr.msk.f32.gmra.mrb[2].mxu0 %vm551_vm0, %v5330_v53 }
  0xbb   : > { %6258 = vmatprep.mubr.msk.f32.mxu0 %vm551_vm0, %v5331_v54  ;;  %7008 = vmatpush3.bf16.msk.msra.mxu0 %vm7784_vm3, %v7003_v50  ;;  %v1793_v50 = vpop.permute.xlu1 %1792 }
  0xbc   : > { %6172 = vmatmul.mubr.msk.f32.gmra.mrb[16].mxu1 %vm551_vm0, %v5251_v55 }
  0xbe   : > { %6259 = vmatmul.mubr.msk.f32.gmra.mrb[4].mxu0 %vm551_vm0, %v5332_v56 }
  0xbf   : > { %6261 = vmatprep.mubr.msk.f32.mxu0 %vm551_vm0, %v5333_v57  ;;  %v1808_v57 = vpop.permute.xlu0 %1807 }
  0xc2   : > { %6262 = vmatmul.mubr.msk.f32.gmra.mrb[6].mxu0 %vm551_vm0, %v5334_v58 }
  0xc3   : > { %6264 = vmatprep.mubr.msk.f32.mxu0 %vm551_vm0, %v5335_v59  ;;  %v1803_v59 = vpop.permute.xlu1 %1802 }
  0xc6   : > { %6265 = vmatmul.mubr.msk.f32.gmra.mrb[8].mxu0 %vm551_vm0, %v5336_v9 }
  0xc7   : > { %6267 = vmatprep.mubr.msk.f32.mxu0 %vm551_vm0, %v5337_v60 }
  0xca   : > { %6268 = vmatmul.mubr.msk.f32.gmra.mrb[10].mxu0 %vm551_vm0, %v5338_v61 }
  0xcb   : > { %6270 = vmatprep.mubr.msk.f32.mxu0 %vm551_vm0, %v5339_v62 }
  0xce   : > { %6271 = vmatmul.mubr.msk.f32.gmra.mrb[12].mxu0 %vm551_vm0, %v5340_v63 }
  0xcf   : > { %6273 = vmatprep.mubr.msk.f32.mxu0 %vm551_vm0, %v5341_v0 }
  0xd2   : > { %6274 = vmatmul.mubr.msk.f32.gmra.mrb[14].mxu0 %vm551_vm0, %v5342_v1 }
  0xd3   : > { %6276 = vmatprep.mubr.msk.f32.mxu0 %vm551_vm0, %v5343_v2 }
  0xd6   : > { %6277 = vmatmul.mubr.msk.f32.gmra.mrb[16].mxu0 %vm551_vm0, %v5344_v3 }
  0xd7   : > { %6287 = vmatprep.mubr.msk.f32.mxu0 %vm551_vm0, %v5364_v4 }
  0xda   : > { %6288 = vmatmul.mubr.msk.f32.vlgmr.msra.gmra.mrb[0].mxu0 %vm551_vm0, %v5365_v5 }
  0xdb   : > { %6290 = vmatprep.mubr.msk.f32.mxu0 %vm551_vm0, %v5366_v6  ;;  %v1818_v6 = vpop.permute.xlu0 %1817 }
  0xde   : > { %6291 = vmatmul.mubr.msk.f32.gmra.mrb[2].mxu0 %vm551_vm0, %v5367_v7 }
  0xdf   : > { %6293 = vmatprep.mubr.msk.f32.mxu0 %vm551_vm0, %v5368_v8 }
  0xe2   : > { %6294 = vmatmul.mubr.msk.f32.gmra.mrb[4].mxu0 %vm551_vm0, %v5369_v10  ;;  %v1813_v10 = vpop.permute.xlu1 %1812 }
  0xe3   : > { %6296 = vmatprep.mubr.msk.f32.mxu0 %vm551_vm0, %v5370_v11 }
  0xe6   : > { %6297 = vmatmul.mubr.msk.f32.gmra.mrb[6].mxu0 %vm551_vm0, %v5371_v12  ;;  %v1823_v23 = vpop.permute.xlu1 %1822 }
  0xe7   : > { %6299 = vmatprep.mubr.msk.f32.mxu0 %vm551_vm0, %v5372_v13 }
  0xea   : > { %6300 = vmatmul.mubr.msk.f32.gmra.mrb[8].mxu0 %vm551_vm0, %v5373_v14 }
  0xeb   : > { %6302 = vmatprep.mubr.msk.f32.mxu0 %vm551_vm0, %v5374_v15 }
  0xee   : > { %6303 = vmatmul.mubr.msk.f32.gmra.mrb[10].mxu0 %vm551_vm0, %v5375_v16 }
  0xef   : > { %6305 = vmatprep.mubr.msk.f32.mxu0 %vm551_vm0, %v5376_v17 }
  0xf2   : > { %6306 = vmatmul.mubr.msk.f32.gmra.mrb[12].mxu0 %vm551_vm0, %v5377_v18 }
  0xf3   : > { %6308 = vmatprep.mubr.msk.f32.mxu0 %vm551_vm0, %v5378_v19 }
  0xf6   : > { %6309 = vmatmul.mubr.msk.f32.gmra.mrb[14].mxu0 %vm551_vm0, %v5379_v20  ;;  %v1828_v20 = vpop.permute.xlu0 %1827 }
  0xf7   : > { %6311 = vmatprep.mubr.msk.f32.mxu0 %vm551_vm0, %v5380_v21 }
  0xfa   : > { %6312 = vmatmul.mubr.msk.f32.gmra.mrb[16].mxu0 %vm551_vm0, %v5381_v22 }
 0x16e   : > { %v6149_v27 = vpop.f32.mrb[0].mxu1 }
 0x16f   : > { %v675_v28 = vpop.f32.mrb[1].mxu1 }
 0x172   : > { %v6152_v29 = vpop.f32.mrb[2].mxu1 }
 0x173   : > { %v685_v30 = vpop.f32.mrb[3].mxu1 }
 0x176   : > { %v6155_v31 = vpop.f32.mrb[4].mxu1 }
 0x177   : > { %v695_v32 = vpop.f32.mrb[5].mxu1 }
 0x17a   : > { %v6158_v33 = vpop.f32.mrb[6].mxu1 }
 0x17b   : > { %v705_v34 = vpop.f32.mrb[7].mxu1 }
 0x17e   : > { %v6161_v35 = vpop.f32.mrb[8].mxu1 }
 0x17f   : > { %v715_v36 = vpop.f32.mrb[9].mxu1 }
 0x182   : > { %v8237_v37 = vpop.f32.mrb[10].mxu1 }
 0x183   : > { %v8239_v38 = vpop.f32.mrb[11].mxu1 }
 0x186   : > { %v8241_v39 = vpop.f32.mrb[12].mxu1 }
 0x187   : > { %v8243_v40 = vpop.f32.mrb[13].mxu1 }
 0x18b   : > { %v8245_v41 = vpop.f32.mrb[14].mxu1 }
 0x18c   : > { %v8247_v42 = vpop.f32.mrb[15].mxu1 }
 0x18f   : > { %v8249_v43 = vpop.f32.mrb[16].mxu1 }
 0x190   : > { %v8251_v44 = vpop.f32.mrb[17].mxu1 }
 0x1ad   : > { %v6289_v51 = vpop.f32.mrb[0].mxu0 }
 0x1ae   : > { %v7241_v52 = vadd.f32 %v6289_v51, %v6149_v27  ;;  %v1645_v53 = vpop.f32.mrb[1].mxu0 }
 0x1af   : > { %v7242_v54 = vadd.f32 %v1645_v53, %v675_v28 }
 0x1b0   : > { %v1861_v55 = vadd.f32 %v7241_v52, %v1778_v46  ;;  %v1833_v46 = vpop.permute.xlu1 %1832 }
 0x1b1   : > { %v1860_v56 = vadd.f32 %v7242_v54, %v1773_v45  ;;  %v6292_v58 = vpop.f32.mrb[2].mxu0 }
 0x1b2   : > { %v7243_v9 = vadd.f32 %v6292_v58, %v6152_v29  ;;  %v1655_v60 = vpop.f32.mrb[3].mxu0  ;;  %v1879_v63 = vmax.f32 %v1861_v55, 0.0 }
 0x1b3   : > { %v1878_v61 = vmax.f32 %v1860_v56, 0.0  ;;  %v7244_v62 = vadd.f32 %v1655_v60, %v685_v30 }
 0x1b4   : > { %v1863_v0 = vadd.f32 %v7243_v9, %v1788_v47 }
 0x1b5   : > { %v1862_v1 = vadd.f32 %v7244_v62, %v1783_v48  ;;  %v6295_v2 = vpop.f32.mrb[4].mxu0  ;;  %6320 = vmatprep.mubr.msk.f32.mxu1 %vm1917_vm4, %v1878_v61 }
 0x1b6   : > { %v7245_v3 = vadd.f32 %v6295_v2, %v6155_v31  ;;  %v1665_v4 = vpop.f32.mrb[5].mxu0  ;;  %6321 = vmatmul.mubr.msk.f32.vlgmr.msra.gmra.mrb[18].mxu1 %vm1917_vm4, %v1879_v63  ;;  %v1881_v8 = vmax.f32 %v1863_v0, 0.0 }
 0x1b7   : > { %v1880_v5 = vmax.f32 %v1862_v1, 0.0  ;;  %v7246_v7 = vadd.f32 %v1665_v4, %v695_v32 }
 0x1b8   : > { %v1865_v11 = vadd.f32 %v7245_v3, %v1798_v49 }
 0x1b9   : > { %v1864_v12 = vadd.f32 %v7246_v7, %v1793_v50  ;;  %v6298_v13 = vpop.f32.mrb[6].mxu0  ;;  %6323 = vmatprep.mubr.msk.f32.mxu1 %vm1917_vm4, %v1880_v5 }
 0x1ba   : > { %v7247_v14 = vadd.f32 %v6298_v13, %v6158_v33  ;;  %v1675_v15 = vpop.f32.mrb[7].mxu0  ;;  %6324 = vmatmul.mubr.msk.f32.gmra.mrb[20].mxu1 %vm1917_vm4, %v1881_v8  ;;  %v1883_v18 = vmax.f32 %v1865_v11, 0.0 }
 0x1bb   : > { %v1882_v16 = vmax.f32 %v1864_v12, 0.0  ;;  %v7248_v17 = vadd.f32 %v1675_v15, %v705_v34  ;;  %v1838_v34 = vpop.permute.xlu0 %1837 }
 0x1bc   : > { %v1867_v19 = vadd.f32 %v7247_v14, %v1808_v57  ;;  %v1843_v57 = vpop.permute.xlu1 %1842 }
 0x1bd   : > { %v1866_v21 = vadd.f32 %v7248_v17, %v1803_v59  ;;  %v6301_v22 = vpop.f32.mrb[8].mxu0  ;;  %6326 = vmatprep.mubr.msk.f32.mxu1 %vm1917_vm4, %v1882_v16 }
 0x1be   : > { %v7249_v24 = vadd.f32 %v6301_v22, %v6161_v35  ;;  %v1685_v25 = vpop.f32.mrb[9].mxu0  ;;  %6327 = vmatmul.mubr.msk.f32.gmra.mrb[22].mxu1 %vm1917_vm4, %v1883_v18  ;;  %v1885_v28 = vmax.f32 %v1867_v19, 0.0 }
 0x1bf   : > { %v1884_v26 = vmax.f32 %v1866_v21, 0.0  ;;  %v7250_v27 = vadd.f32 %v1685_v25, %v715_v36  ;;  %v1848_v55 = vpop.permute.xlu0 %1847 }
 0x1c0   : > { %v1869_v29 = vadd.f32 %v7249_v24, %v1818_v6  ;;  %v1853_v3 = vpop.permute.xlu1 %1852 }
 0x1c1   : > { %v1868_v30 = vadd.f32 %v7250_v27, %v1813_v10  ;;  %v6304_v31 = vpop.f32.mrb[10].mxu0  ;;  %6329 = vmatprep.mubr.msk.f32.mxu1 %vm1917_vm4, %v1884_v26 }
 0x1c2   : > { %v7251_v32 = vadd.f32 %v6304_v31, %v8237_v37  ;;  %v1695_v33 = vpop.f32.mrb[11].mxu0  ;;  %6330 = vmatmul.mubr.msk.f32.gmra.mrb[24].mxu1 %vm1917_vm4, %v1885_v28  ;;  %v1887_v47 = vmax.f32 %v1869_v29, 0.0 }
 0x1c3   : > { %v1886_v45 = vmax.f32 %v1868_v30, 0.0  ;;  %v7252_v35 = vadd.f32 %v1695_v33, %v8239_v38  ;;  %v1858_v1 = vpop.permute.xlu0 %1857 }
 0x1c4   : > { %v1871_v48 = vadd.f32 %v7251_v32, %v1828_v20 }
 0x1c5   : > { %v1870_v49 = vadd.f32 %v7252_v35, %v1823_v23  ;;  %v6307_v36 = vpop.f32.mrb[12].mxu0  ;;  %6332 = vmatprep.mubr.msk.f32.mxu1 %vm1917_vm4, %v1886_v45  ;;  %v1896_v35 = vld [vmem:[%s9397_s4] sm:$0xff] }
 0x1c6   : > { %v7253_v50 = vadd.f32 %v6307_v36, %v8241_v39  ;;  %v1705_v51 = vpop.f32.mrb[13].mxu0  ;;  %6333 = vmatmul.mubr.msk.f32.gmra.mrb[26].mxu1 %vm1917_vm4, %v1887_v47  ;;  %v1889_v53 = vmax.f32 %v1871_v48, 0.0  ;;  %v1898_v47 = vld [vmem:[%s9397_s4 + $0x10] sm:$0xff]  ;;  %v1901_v48 = vld [vmem:[%s9397_s4 + $0x28] sm:$0xff]  ;;  %v1903_v36 = vld [vmem:[%s9397_s4 + $0x38] sm:$0xff] }
 0x1c7   : > { %v1888_v37 = vmax.f32 %v1870_v49, 0.0  ;;  %v7254_v52 = vadd.f32 %v1705_v51, %v8243_v40  ;;  %v1900_v49 = vld [vmem:[%s9397_s4 + $0x20] sm:$0xff]  ;;  %v1905_v51 = vld [vmem:[%s9397_s4 + $0x48] sm:$0xff] }
 0x1c8   : > { %v1873_v54 = vadd.f32 %v7253_v50, %v1838_v34  ;;  %v1902_v50 = vld [vmem:[%s9397_s4 + $0x30] sm:$0xff] }
 0x1c9   : > { %v1872_v56 = vadd.f32 %v7254_v52, %v1833_v46  ;;  %v6310_v38 = vpop.f32.mrb[14].mxu0  ;;  %6335 = vmatprep.mubr.msk.f32.mxu1 %vm1917_vm4, %v1888_v37  ;;  %v1899_v46 = vld [vmem:[%s9397_s4 + $0x18] sm:$0xff]  ;;  %v1904_v37 = vld [vmem:[%s9397_s4 + $0x40] sm:$0xff] }
 0x1ca   : > { %v7255_v58 = vadd.f32 %v6310_v38, %v8245_v41  ;;  %v1715_v59 = vpop.f32.mrb[15].mxu0  ;;  %6336 = vmatmul.mubr.msk.f32.gmra.mrb[28].mxu1 %vm1917_vm4, %v1889_v53  ;;  %v1891_v60 = vmax.f32 %v1873_v54, 0.0  ;;  %v1907_v52 = vld [vmem:[%s9397_s4 + $0x58] sm:$0xff]  ;;  %v1906_v53 = vld [vmem:[%s9397_s4 + $0x50] sm:$0xff]  ;;  %v1909_v54 = vld [vmem:[%s9397_s4 + $0x68] sm:$0xff] }
 0x1cb   : > { %v1890_v39 = vmax.f32 %v1872_v56, 0.0  ;;  %v7256_v9 = vadd.f32 %v1715_v59, %v8247_v42  ;;  %v1911_v56 = vld [vmem:[%s9397_s4 + $0x78] sm:$0xff]  ;;  %v1910_v38 = vld [vmem:[%s9397_s4 + $0x70] sm:$0xff] }
 0x1cc   : > { %v1875_v61 = vadd.f32 %v7255_v58, %v1848_v55  ;;  %v1908_v55 = vld [vmem:[%s9397_s4 + $0x60] sm:$0xff] }
 0x1cd   : > { %v1874_v62 = vadd.f32 %v7256_v9, %v1843_v57  ;;  %v6313_v40 = vpop.f32.mrb[16].mxu0  ;;  %6338 = vmatprep.mubr.msk.f32.mxu1 %vm1917_vm4, %v1890_v39  ;;  %v1913_v57 = vld [vmem:[%s9397_s4 + $0x88] sm:$0xff]  ;;  %v1912_v58 = vld [vmem:[%s9397_s4 + $0x80] sm:$0xff] }
 0x1ce   : > { %v7257_v63 = vadd.f32 %v6313_v40, %v8249_v43  ;;  %v1725_v0 = vpop.f32.mrb[17].mxu0  ;;  %6339 = vmatmul.mubr.msk.f32.gmra.mrb[30].mxu1 %vm1917_vm4, %v1891_v60  ;;  %v1893_v4 = vmax.f32 %v1875_v61, 0.0  ;;  %v7680_v43 = vmov 0.0|0.0  }
 0x1cf   : > { %v1892_v2 = vmax.f32 %v1874_v62, 0.0  ;;  %v7258_v41 = vadd.f32 %v1725_v0, %v8251_v44  ;;  %7013 = vmatprep.subr.bf16.mxu1 %v7680_v43  ;;  %v1897_v44 = vld [vmem:[%s9397_s4 + $0x8] sm:$0xff] }
 0x1d0   : > { %v1877_v5 = vadd.f32 %v7257_v63, %v1858_v1 }
 0x1d1   : > { %v1876_v6 = vadd.f32 %v7258_v41, %v1853_v3  ;;  %6341 = vmatprep.mubr.msk.f32.mxu1 %vm1917_vm4, %v1892_v2 }
 0x1d2   : > { %6342 = vmatmul.mubr.msk.f32.gmra.mrb[32].mxu1 %vm1917_vm4, %v1893_v4  ;;  %v1895_v7 = vmax.f32 %v1877_v5, 0.0 }
 0x1d3   : > { %v1894_v42 = vmax.f32 %v1876_v6, 0.0 }
 0x1d5   : > { %6344 = vmatprep.mubr.msk.f32.mxu1 %vm1917_vm4, %v1894_v42 }
 0x1d6   : > { %6345 = vmatmul.mubr.msk.f32.gmra.mrb[34].mxu1 %vm1917_vm4, %v1895_v7 }
 0x1d7   : > { %5419 = vmatprep.mubr.msk.f32.mxu1 %vm2127_vm5, %v1897_v44 }
 0x289   : > { %v6322_v8 = vpop.f32.mrb[18].mxu1 }
 0x28a   : > { %v2038_v10 = vpop.f32.mrb[19].mxu1 }
 0x28b   : > { %v7014_v11 = vpack.c.bf16 %v6322_v8, %v2038_v10  ;;  %v5428_v10 = vld [vmem:[%s9398_s5 + $0x80] sm:$0xff] }
 0x28d   : > { %v6325_v12 = vpop.f32.mrb[20].mxu1  ;;  %7015 = vmatpush1.bf16.msra.mxu1 %v7014_v11 }
 0x28e   : > { %v2048_v13 = vpop.f32.mrb[21].mxu1  ;;  %7016 = vmatprep.subr.bf16.mxu1 %v7680_v43 }
 0x28f   : > { %v7017_v14 = vpack.c.bf16 %v6325_v12, %v2048_v13 }
 0x291   : > { %v6328_v15 = vpop.f32.mrb[22].mxu1  ;;  %7018 = vmatpush1.bf16.msra.mxu1 %v7017_v14 }
 0x292   : > { %v2058_v16 = vpop.f32.mrb[23].mxu1  ;;  %7019 = vmatprep.subr.bf16.mxu1 %v7680_v43 }
 0x293   : > { %v7020_v17 = vpack.c.bf16 %v6328_v15, %v2058_v16 }
 0x295   : > { %v6331_v18 = vpop.f32.mrb[24].mxu1  ;;  %7021 = vmatpush1.bf16.msra.mxu1 %v7020_v17  ;;  %v3480_v17 = vld [vmem:[%s9399_s6] sm:$0xff] }
 0x296   : > { %v2068_v19 = vpop.f32.mrb[25].mxu1  ;;  %7022 = vmatprep.subr.bf16.mxu1 %v7680_v43 }
 0x297   : > { %v7023_v20 = vpack.c.bf16 %v6331_v18, %v2068_v19  ;;  %v3481_v18 = vld [vmem:[%s9399_s6 + $0x8] sm:$0xff]  ;;  %v3482_v19 = vld [vmem:[%s9399_s6 + $0x10] sm:$0xff] }
 0x299   : > { %v6334_v21 = vpop.f32.mrb[26].mxu1  ;;  %7024 = vmatpush1.bf16.msra.mxu1 %v7023_v20  ;;  %v3483_v20 = vld [vmem:[%s9399_s6 + $0x18] sm:$0xff] }
 0x29a   : > { %v2078_v22 = vpop.f32.mrb[27].mxu1  ;;  %7025 = vmatprep.subr.bf16.mxu1 %v7680_v43 }
 0x29b   : > { %v7026_v23 = vpack.c.bf16 %v6334_v21, %v2078_v22  ;;  %v3484_v21 = vld [vmem:[%s9399_s6 + $0x20] sm:$0xff]  ;;  %v3485_v22 = vld [vmem:[%s9399_s6 + $0x28] sm:$0xff] }
 0x29d   : > { %v6337_v24 = vpop.f32.mrb[28].mxu1  ;;  %7027 = vmatpush1.bf16.msra.mxu1 %v7026_v23  ;;  %v3486_v23 = vld [vmem:[%s9399_s6 + $0x30] sm:$0xff] }
 0x29e   : > { %v2088_v25 = vpop.f32.mrb[29].mxu1  ;;  %7028 = vmatprep.subr.bf16.mxu1 %v7680_v43 }
 0x29f   : > { %v7029_v26 = vpack.c.bf16 %v6337_v24, %v2088_v25  ;;  %v3487_v24 = vld [vmem:[%s9399_s6 + $0x38] sm:$0xff]  ;;  %v3488_v25 = vld [vmem:[%s9399_s6 + $0x40] sm:$0xff] }
 0x2a1   : > { %v6340_v27 = vpop.f32.mrb[30].mxu1  ;;  %7030 = vmatpush1.bf16.msra.mxu1 %v7029_v26  ;;  %v3489_v26 = vld [vmem:[%s9399_s6 + $0x48] sm:$0xff] }
 0x2a2   : > { %v2098_v28 = vpop.f32.mrb[31].mxu1  ;;  %7031 = vmatprep.subr.bf16.mxu1 %v7680_v43 }
 0x2a3   : > { %v7032_v29 = vpack.c.bf16 %v6340_v27, %v2098_v28  ;;  %v3490_v27 = vld [vmem:[%s9399_s6 + $0x50] sm:$0xff]  ;;  %v3491_v28 = vld [vmem:[%s9399_s6 + $0x58] sm:$0xff] }
 0x2a5   : > { %v6343_v30 = vpop.f32.mrb[32].mxu1  ;;  %7033 = vmatpush1.bf16.msra.mxu1 %v7032_v29  ;;  %v3492_v29 = vld [vmem:[%s9399_s6 + $0x60] sm:$0xff] }
 0x2a6   : > { %v2108_v31 = vpop.f32.mrb[33].mxu1  ;;  %7034 = vmatprep.subr.bf16.mxu1 %v7680_v43 }
 0x2a7   : > { %v7035_v32 = vpack.c.bf16 %v6343_v30, %v2108_v31  ;;  %v3493_v30 = vld [vmem:[%s9399_s6 + $0x68] sm:$0xff]  ;;  %v3494_v31 = vld [vmem:[%s9399_s6 + $0x70] sm:$0xff] }
 0x2a9   : > { %v6346_v33 = vpop.f32.mrb[34].mxu1  ;;  %7036 = vmatpush1.bf16.msra.mxu1 %v7035_v32  ;;  %v3495_v32 = vld [vmem:[%s9399_s6 + $0x78] sm:$0xff] }
 0x2aa   : > { %v2118_v34 = vpop.f32.mrb[35].mxu1  ;;  %7037 = vmatprep.subr.bf16.mxu1 %v7680_v43 }
 0x2ab   : > { %v7038_v45 = vpack.c.bf16 %v6346_v33, %v2118_v34 }
 0x2ad   : > { %7039 = vmatpush1.bf16.msra.mxu1 %v7038_v45 }
 0x2b0   : > { %2220 = vmatmul.mubr.f32.vlgmr.msra.gmra.mrb[36].mxu1 %v1896_v35 }
 0x2b1   : > { %5420 = vmatprep.mubr.msk.f32.mxu1 %vm2127_vm5, %v1899_v46 }
 0x2b4   : > { %2225 = vmatmul.mubr.f32.gmra.mrb[38].mxu1 %v1898_v47 }
 0x2b5   : > { %5421 = vmatprep.mubr.msk.f32.mxu1 %vm2127_vm5, %v1901_v48 }
 0x2b8   : > { %2230 = vmatmul.mubr.f32.gmra.mrb[40].mxu1 %v1900_v49 }
 0x2b9   : > { %5422 = vmatprep.mubr.msk.f32.mxu1 %vm2127_vm5, %v1903_v36 }
 0x2bc   : > { %2235 = vmatmul.mubr.f32.gmra.mrb[42].mxu1 %v1902_v50 }
 0x2bd   : > { %5423 = vmatprep.mubr.msk.f32.mxu1 %vm2127_vm5, %v1905_v51 }
 0x2c0   : > { %2240 = vmatmul.mubr.f32.gmra.mrb[44].mxu1 %v1904_v37 }
 0x2c1   : > { %5424 = vmatprep.mubr.msk.f32.mxu1 %vm2127_vm5, %v1907_v52 }
 0x2c4   : > { %2245 = vmatmul.mubr.f32.gmra.mrb[46].mxu1 %v1906_v53 }
 0x2c5   : > { %5425 = vmatprep.mubr.msk.f32.mxu1 %vm2127_vm5, %v1909_v54 }
 0x2c8   : > { %2250 = vmatmul.mubr.f32.gmra.mrb[48].mxu1 %v1908_v55 }
 0x2c9   : > { %5426 = vmatprep.mubr.msk.f32.mxu1 %vm2127_vm5, %v1911_v56 }
 0x2cc   : > { %2255 = vmatmul.mubr.f32.gmra.mrb[50].mxu1 %v1910_v38  ;;  %v5429_v38 = vld [vmem:[%s9398_s5 + $0x88] sm:$0xff] }
 0x2cd   : > { %5427 = vmatprep.mubr.msk.f32.mxu1 %vm2127_vm5, %v1913_v57  ;;  %v5430_v57 = vld [vmem:[%s9398_s5 + $0x90] sm:$0xff] }
 0x2d0   : > { %2260 = vmatmul.mubr.f32.gmra.mrb[52].mxu1 %v1912_v58  ;;  %v5431_v58 = vld [vmem:[%s9398_s5 + $0x98] sm:$0xff] }
 0x2d1   : > { %6365 = vmatprep.mubr.msk.f32.mxu1 %vm2334_vm6, %v5428_v10  ;;  %v3616_v10 = vld [vmem:[%s9400_s7] sm:$0xff] }
 0x2d2   : > { %6557 = vmatprep.subr.mxu0 %v3616_v10 }
 0x2d3   : > { %6558 = vmatpush3.msra.mxu0 %v3616_v10  ;;  %v5491_v10 = vld [vmem:[%s9398_s5 + $0x178] sm:$0xff] }
 0x383   : > { %v2221_v59 = vpop.f32.mrb[36].mxu1 }
 0x384   : > { %v2223_v39 = vpop.f32.mrb[37].mxu1 }
 0x385   : > { %v5433_v39 = vld [vmem:[%s9398_s5 + $0xa8] sm:$0xff] }
 0x387   : > { %v2226_v9 = vpop.f32.mrb[38].mxu1 }
 0x388   : > { %v2228_v60 = vpop.f32.mrb[39].mxu1  ;;  %v7526_v61 = vpack.i.bf16 %v2226_v9, %v2221_v59  ;;  %v8351_v62 = vpack.c.bf16 %v2226_v9, %v2221_v59  ;;  %v5432_v59 = vld [vmem:[%s9398_s5 + $0xa0] sm:$0xff]  ;;  %v5434_v9 = vld [vmem:[%s9398_s5 + $0xb0] sm:$0xff] }
 0x38a   : > { %7527 = vrot.lane.b32.xlu1 %v7526_v61, %s7678_s16 }
 0x38b   : > { %v2231_v40 = vpop.f32.mrb[40].mxu1 }
 0x38c   : > { %v2233_v63 = vpop.f32.mrb[41].mxu1 }
 0x38f   : > { %v2236_v0 = vpop.f32.mrb[42].mxu1 }
 0x390   : > { %v2238_v1 = vpop.f32.mrb[43].mxu1  ;;  %v7531_v2 = vpack.i.bf16 %v2236_v0, %v2231_v40  ;;  %v8354_v41 = vpack.c.bf16 %v2236_v0, %v2231_v40  ;;  %v5437_v0 = vld [vmem:[%s9398_s5 + $0xc8] sm:$0xff] }
 0x391   : > { %v5438_v1 = vld [vmem:[%s9398_s5 + $0xd0] sm:$0xff] }
 0x392   : > { %7532 = vrot.lane.b32.xlu0 %v7531_v2, %s7678_s16 }
 0x393   : > { %v2241_v3 = vpop.f32.mrb[44].mxu1 }
 0x394   : > { %v2243_v4 = vpop.f32.mrb[45].mxu1 }
 0x395   : > { %v5441_v4 = vld [vmem:[%s9398_s5 + $0xe8] sm:$0xff] }
 0x397   : > { %v2246_v5 = vpop.f32.mrb[46].mxu1 }
 0x398   : > { %v2248_v6 = vpop.f32.mrb[47].mxu1  ;;  %v7536_v42 = vpack.i.bf16 %v2246_v5, %v2241_v3  ;;  %v8357_v7 = vpack.c.bf16 %v2246_v5, %v2241_v3  ;;  %v5440_v3 = vld [vmem:[%s9398_s5 + $0xe0] sm:$0xff]  ;;  %v5442_v5 = vld [vmem:[%s9398_s5 + $0xf0] sm:$0xff] }
 0x39a   : > { %7537 = vrot.lane.b32.xlu1 %v7536_v42, %s7678_s16 }
 0x39b   : > { %v2251_v44 = vpop.f32.mrb[48].mxu1 }
 0x39c   : > { %v2253_v8 = vpop.f32.mrb[49].mxu1 }
 0x39f   : > { %v2256_v11 = vpop.f32.mrb[50].mxu1 }
 0x3a0   : > { %v7541_v12 = vpack.i.bf16 %v2256_v11, %v2251_v44  ;;  %v2258_v13 = vpop.f32.mrb[51].mxu1  ;;  %v8364_v14 = vpack.c.bf16 %v2256_v11, %v2251_v44 }
 0x3a1   : > { %v2267_v13 = vld [vmem:[%s9398_s5 + $0x10] sm:$0xff] }
 0x3a2   : > { %7542 = vrot.lane.b32.xlu0 %v7541_v12, %s7678_s16 }
 0x3a3   : > { %v8367_v15 = vpop.f32.mrb[52].mxu1 }
 0x3a4   : > { %2323 = vrot.lane.b32.xlu1 %v8367_v15, %s7678_s16  ;;  %v2263_v16 = vpop.f32.mrb[53].mxu1 }
 0x3a6   : > { %7547 = vrot.lane.b32.xlu0 %v7526_v61, %s7674_s26 }
 0x3a8   : > { %7552 = vrot.lane.b32.xlu1 %v7531_v2, %s7674_s26 }
 0x3aa   : > { %7557 = vrot.lane.b32.xlu0 %v7536_v42, %s7674_s26 }
 0x3ac   : > { %7562 = vrot.lane.b32.xlu1 %v7541_v12, %s7674_s26 }
 0x3ae   : > { %2754 = vrot.lane.b32.xlu0 %v8367_v15, %s7674_s26 }
 0x3b0   : > { %7567 = vrot.lane.b32.xlu1 %v7526_v61, %s7675_s27 }
 0x3b2   : > { %7572 = vrot.lane.b32.xlu0 %v7531_v2, %s7675_s27 }
 0x3b4   : > { %7577 = vrot.lane.b32.xlu1 %v7536_v42, %s7675_s27 }
 0x3b6   : > { %7582 = vrot.lane.b32.xlu0 %v7541_v12, %s7675_s27 }
 0x3b8   : > { %3007 = vrot.lane.b32.xlu1 %v8367_v15, %s7675_s27 }
 0x3ba   : > { %7587 = vrot.lane.b32.xlu0 %v7526_v61, %s7677_s30  ;;  %v5435_v61 = vld [vmem:[%s9398_s5 + $0xb8] sm:$0xff] }
 0x3bc   : > { %7592 = vrot.lane.b32.xlu1 %v7531_v2, %s7677_s30 }
 0x3be   : > { %7597 = vrot.lane.b32.xlu0 %v7536_v42, %s7677_s30  ;;  %v5443_v42 = vld [vmem:[%s9398_s5 + $0xf8] sm:$0xff] }
 0x3c0   : > { %7602 = vrot.lane.b32.xlu1 %v7541_v12, %s7677_s30  ;;  %v2266_v12 = vld [vmem:[%s9398_s5 + $0x8] sm:$0xff] }
 0x3c2   : > { %3260 = vrot.lane.b32.xlu0 %v8367_v15, %s7677_s30 }
 0x3c4   : > { %3498 = vperm.xlu1 %7525, %v3480_v17  }
 0x3c6   : > { %3503 = vperm.xlu0 %7524, %v3481_v18   ;;  %v2268_v18 = vld [vmem:[%s9398_s5 + $0x18] sm:$0xff] }
 0x3c8   : > { %3508 = vperm.xlu1 %7525, %v3482_v19   ;;  %v2269_v19 = vld [vmem:[%s9398_s5 + $0x20] sm:$0xff] }
 0x3ca   : > { %3513 = vperm.xlu0 %7524, %v3483_v20  }
 0x3cc   : > { %3518 = vperm.xlu1 %7525, %v3484_v21  }
 0x3ce   : > { %3523 = vperm.xlu0 %7524, %v3485_v22  }
 0x3d0   : > { %3528 = vperm.xlu1 %7525, %v3486_v23   ;;  %v2270_v23 = vld [vmem:[%s9398_s5 + $0x28] sm:$0xff] }
 0x3d2   : > { %3533 = vperm.xlu0 %7524, %v3487_v24   ;;  %v2271_v24 = vld [vmem:[%s9398_s5 + $0x30] sm:$0xff] }
 0x3d4   : > { %3538 = vperm.xlu1 %7525, %v3488_v25  }
 0x3d6   : > { %3543 = vperm.xlu0 %7524, %v3489_v26  }
 0x3d8   : > { %3548 = vperm.xlu1 %7525, %v3490_v27   ;;  %v2272_v27 = vld [vmem:[%s9398_s5 + $0x38] sm:$0xff] }
 0x3da   : > { %3553 = vperm.xlu0 %7524, %v3491_v28   ;;  %v2273_v28 = vld [vmem:[%s9398_s5 + $0x40] sm:$0xff] }
 0x3dc   : > { %3558 = vperm.xlu1 %7525, %v3492_v29  }
 0x3de   : > { %3563 = vperm.xlu0 %7524, %v3493_v30  }
 0x3e0   : > { %3568 = vperm.xlu1 %7525, %v3494_v31  }
 0x3e2   : > { %3573 = vperm.xlu0 %7524, %v3495_v32   ;;  %v2274_v32 = vld [vmem:[%s9398_s5 + $0x48] sm:$0xff] }
 0x3fc   : > { %v7528_v33 = vpop.permute.xlu1 %7527 }
 0x3fd   : > { %v7530_v34 = vunpack.i.h.bf16 %v7528_v33  ;;  %v7529_v45 = vunpack.i.l.bf16 %v7528_v33  ;;  %v2275_v33 = vld [vmem:[%s9398_s5 + $0x50] sm:$0xff] }
 0x3ff   : > { %v7040_v35 = vpack.c.bf16 %v7530_v34, %v7529_v45  ;;  %v2276_v45 = vld [vmem:[%s9398_s5 + $0x58] sm:$0xff] }
 0x401   : > { %7041 = vmatprep.subr.bf16.mxu1 %v7040_v35 }
 0x402   : > { %7043 = vmatpush3.bf16.msra.mxu1 %v7040_v35  ;;  %v2277_v35 = vld [vmem:[%s9398_s5 + $0x60] sm:$0xff] }
 0x404   : > { %v7533_v46 = vpop.permute.xlu0 %7532 }
 0x405   : > { %v7535_v47 = vunpack.i.h.bf16 %v7533_v46  ;;  %v7534_v48 = vunpack.i.l.bf16 %v7533_v46  ;;  %v2278_v46 = vld [vmem:[%s9398_s5 + $0x68] sm:$0xff] }
 0x407   : > { %v7044_v49 = vpack.c.bf16 %v7535_v47, %v7534_v48  ;;  %v2279_v47 = vld [vmem:[%s9398_s5 + $0x70] sm:$0xff] }
 0x409   : > { %7045 = vmatprep.subr.bf16.mxu1 %v7044_v49 }
 0x40a   : > { %7047 = vmatpush3.bf16.msra.mxu1 %v7044_v49  ;;  %v2280_v49 = vld [vmem:[%s9398_s5 + $0x78] sm:$0xff] }
 0x40c   : > { %v7538_v36 = vpop.permute.xlu1 %7537 }
 0x40d   : > { %v7540_v50 = vunpack.i.h.bf16 %v7538_v36  ;;  %v7539_v51 = vunpack.i.l.bf16 %v7538_v36  ;;  %v5476_v36 = vld [vmem:[%s9398_s5 + $0x100] sm:$0xff] }
 0x40f   : > { %v7048_v37 = vpack.c.bf16 %v7540_v50, %v7539_v51 }
 0x411   : > { %7049 = vmatprep.subr.bf16.mxu1 %v7048_v37 }
 0x412   : > { %7051 = vmatpush3.bf16.msra.mxu1 %v7048_v37 }
 0x414   : > { %v7543_v52 = vpop.permute.xlu0 %7542 }
 0x415   : > { %v7545_v53 = vunpack.i.h.bf16 %v7543_v52  ;;  %v7544_v54 = vunpack.i.l.bf16 %v7543_v52  ;;  %v5477_v52 = vld [vmem:[%s9398_s5 + $0x108] sm:$0xff] }
 0x416   : > { %v2324_v56 = vpop.permute.xlu1 %2323 }
 0x417   : > { %v7052_v55 = vpack.c.bf16 %v7545_v53, %v7544_v54  ;;  %v5478_v53 = vld [vmem:[%s9398_s5 + $0x110] sm:$0xff] }
 0x418   : > { %v7548_v60 = vpop.permute.xlu0 %7547 }
 0x419   : > { %7053 = vmatprep.subr.bf16.mxu1 %v7052_v55  ;;  %v7550_v40 = vunpack.i.h.bf16 %v7548_v60  ;;  %v7549_v63 = vunpack.i.l.bf16 %v7548_v60  ;;  %v5481_v60 = vld [vmem:[%s9398_s5 + $0x128] sm:$0xff] }
 0x41a   : > { %7055 = vmatpush3.bf16.msra.mxu1 %v7052_v55  ;;  %v7553_v6 = vpop.permute.xlu1 %7552 }
 0x41b   : > { %6363 = vmatprep.subr.mxu1 %v2324_v56  ;;  %v7072_v2 = vpack.c.bf16 %v7550_v40, %v7549_v63  ;;  %v7555_v44 = vunpack.i.h.bf16 %v7553_v6  ;;  %v7554_v8 = vunpack.i.l.bf16 %v7553_v6  ;;  %v5483_v63 = vld [vmem:[%s9398_s5 + $0x138] sm:$0xff] }
 0x41c   : > { %v7558_v11 = vpop.permute.xlu0 %7557  ;;  %v5487_v6 = vld [vmem:[%s9398_s5 + $0x158] sm:$0xff] }
 0x41d   : > { %v7559_v16 = vunpack.i.l.bf16 %v7558_v11 }
 0x41e   : > { %6364 = vmatpush3.msra.mxu1 %v2324_v56  ;;  %v7563_v17 = vpop.permute.xlu1 %7562 }
 0x41f   : > { %6366 = vmatmul.mubr.msk.f32.vlgmr.msra.gmra.mrb[54].mxu1 %vm2334_vm6, %v5429_v38  ;;  %7057 = vmatprep.subr.bf16.mxu1 %v8351_v62  ;;  %v7565_v21 = vunpack.i.h.bf16 %v7563_v17  ;;  %v7564_v22 = vunpack.i.l.bf16 %v7563_v17 }
 0x420   : > { %7059 = vmatpush3.bf16.msra.mxu1 %v8351_v62  ;;  %6368 = vmatprep.mubr.msk.f32.mxu1 %vm2334_vm6, %v5430_v57  ;;  %v5436_v62 = vld [vmem:[%s9398_s5 + $0xc0] sm:$0xff]  ;;  %v2755_v31 = vpop.permute.xlu0 %2754  ;;  %v5479_v57 = vld [vmem:[%s9398_s5 + $0x118] sm:$0xff] }
 0x421   : > { %7061 = vmatprep.subr.bf16.mxu1 %v8354_v41  ;;  %v7084_v25 = vpack.c.bf16 %v7565_v21, %v7564_v22  ;;  %v5511_v21 = vld [vmem:[%s9398_s5 + $0x198] sm:$0xff]  ;;  %v5512_v22 = vld [vmem:[%s9398_s5 + $0x1a0] sm:$0xff] }
 0x422   : > { %v7568_v26 = vpop.permute.xlu1 %7567 }
 0x423   : > { %6369 = vmatmul.mubr.msk.f32.gmra.mrb[56].mxu1 %vm2334_vm6, %v5431_v58  ;;  %v7570_v29 = vunpack.i.h.bf16 %v7568_v26  ;;  %v7569_v30 = vunpack.i.l.bf16 %v7568_v26  ;;  %v5480_v58 = vld [vmem:[%s9398_s5 + $0x120] sm:$0xff]  ;;  %v5513_v26 = vld [vmem:[%s9398_s5 + $0x1a8] sm:$0xff] }
 0x424   : > { %7063 = vmatpush3.bf16.msra.mxu1 %v8354_v41  ;;  %6371 = vmatprep.mubr.msk.f32.mxu1 %vm2334_vm6, %v5432_v59  ;;  %v5439_v41 = vld [vmem:[%s9398_s5 + $0xd8] sm:$0xff]  ;;  %v7573_v48 = vpop.permute.xlu0 %7572 }
 0x425   : > { %7065 = vmatprep.subr.bf16.mxu1 %v8357_v7  ;;  %v7088_v34 = vpack.c.bf16 %v7570_v29, %v7569_v30  ;;  %v7575_v50 = vunpack.i.h.bf16 %v7573_v48  ;;  %v7574_v51 = vunpack.i.l.bf16 %v7573_v48  ;;  %v5515_v29 = vld [vmem:[%s9398_s5 + $0x1b8] sm:$0xff]  ;;  %v5516_v30 = vld [vmem:[%s9398_s5 + $0x1c0] sm:$0xff] }
 0x426   : > { %v7578_v37 = vpop.permute.xlu1 %7577  ;;  %v5540_v48 = vld [vmem:[%s9398_s5 + $0x200] sm:$0xff] }
 0x427   : > { %6372 = vmatmul.mubr.msk.f32.gmra.mrb[58].mxu1 %vm2334_vm6, %v5433_v39  ;;  %v7092_v54 = vpack.c.bf16 %v7575_v50, %v7574_v51  ;;  %v7580_v55 = vunpack.i.h.bf16 %v7578_v37  ;;  %v7579_v56 = vunpack.i.l.bf16 %v7578_v37  ;;  %v5543_v50 = vld [vmem:[%s9398_s5 + $0x218] sm:$0xff]  ;;  %v5544_v51 = vld [vmem:[%s9398_s5 + $0x220] sm:$0xff]  ;;  %v5545_v37 = vld [vmem:[%s9398_s5 + $0x228] sm:$0xff] }
 0x428   : > { %7067 = vmatpush3.bf16.msra.mxu1 %v8357_v7  ;;  %6374 = vmatprep.mubr.msk.f32.mxu1 %vm2334_vm6, %v5434_v9  ;;  %v2265_v7 = vld [vmem:[%s9398_s5] sm:$0xff]  ;;  %v7583_v38 = vpop.permute.xlu0 %7582 }
 0x429   : > { %7069 = vmatprep.subr.bf16.mxu1 %v8364_v14  ;;  %v7096_v59 = vpack.c.bf16 %v7580_v55, %v7579_v56  ;;  %v7585_v39 = vunpack.i.h.bf16 %v7583_v38  ;;  %v7584_v9 = vunpack.i.l.bf16 %v7583_v38  ;;  %v5549_v55 = vld [vmem:[%s9398_s5 + $0x248] sm:$0xff]  ;;  %v5550_v56 = vld [vmem:[%s9398_s5 + $0x250] sm:$0xff]  ;;  %v5551_v38 = vld [vmem:[%s9398_s5 + $0x258] sm:$0xff] }
 0x42b   : > { %6375 = vmatmul.mubr.msk.f32.gmra.mrb[60].mxu1 %vm2334_vm6, %v5435_v61  ;;  %v5482_v61 = vld [vmem:[%s9398_s5 + $0x130] sm:$0xff] }
 0x42c   : > { %7071 = vmatpush3.bf16.msra.mxu1 %v8364_v14  ;;  %6377 = vmatprep.mubr.msk.f32.mxu1 %vm2334_vm6, %v5436_v62  ;;  %v7076_v14 = vpack.c.bf16 %v7555_v44, %v7554_v8  ;;  %v7100_v62 = vpack.c.bf16 %v7585_v39, %v7584_v9  ;;  %v7588_v40 = vpop.permute.xlu0 %7587  ;;  %v5490_v44 = vld [vmem:[%s9398_s5 + $0x170] sm:$0xff]  ;;  %v5555_v39 = vld [vmem:[%s9398_s5 + $0x278] sm:$0xff] }
 0x42d   : > { %6405 = vmatprep.subr.mxu1 %v8367_v15 }
 0x42f   : > { %6378 = vmatmul.mubr.msk.f32.gmra.mrb[62].mxu1 %vm2334_vm6, %v5437_v0  ;;  %v5484_v0 = vld [vmem:[%s9398_s5 + $0x140] sm:$0xff] }
 0x430   : > { %6406 = vmatpush3.msra.mxu1 %v8367_v15  ;;  %6380 = vmatprep.mubr.msk.f32.mxu1 %vm2334_vm6, %v5438_v1  ;;  %v7560_v15 = vunpack.i.h.bf16 %v7558_v11  ;;  %v7590_v1 = vunpack.i.h.bf16 %v7588_v40  ;;  %v5508_v11 = vld [vmem:[%s9398_s5 + $0x180] sm:$0xff] }
 0x431   : > { %7073 = vmatprep.subr.bf16.mxu1 %v7072_v2 }
 0x432   : > { %v7080_v20 = vpack.c.bf16 %v7560_v15, %v7559_v16  ;;  %v5509_v15 = vld [vmem:[%s9398_s5 + $0x188] sm:$0xff]  ;;  %v5510_v16 = vld [vmem:[%s9398_s5 + $0x190] sm:$0xff] }
 0x433   : > { %6381 = vmatmul.mubr.msk.f32.gmra.mrb[64].mxu1 %vm2334_vm6, %v5439_v41  ;;  %v3008_v41 = vpop.permute.xlu1 %3007 }
 0x434   : > { %6383 = vmatprep.mubr.msk.f32.mxu1 %vm2334_vm6, %v5440_v3  ;;  %v5485_v3 = vld [vmem:[%s9398_s5 + $0x148] sm:$0xff] }
 0x437   : > { %6384 = vmatmul.mubr.msk.f32.gmra.mrb[66].mxu1 %vm2334_vm6, %v5441_v4  ;;  %v5486_v4 = vld [vmem:[%s9398_s5 + $0x150] sm:$0xff]  ;;  %v7593_v8 = vpop.permute.xlu1 %7592 }
 0x438   : > { %6386 = vmatprep.mubr.msk.f32.mxu1 %vm2334_vm6, %v5442_v5 }
 0x43b   : > { %6387 = vmatmul.mubr.msk.f32.gmra.mrb[68].mxu1 %vm2334_vm6, %v5443_v42  ;;  %v5488_v42 = vld [vmem:[%s9398_s5 + $0x160] sm:$0xff] }
 0x43c   : > { %6407 = vmatprep.mubr.msk.f32.mxu1 %vm2334_vm6, %v2265_v7  ;;  %v5489_v7 = vld [vmem:[%s9398_s5 + $0x168] sm:$0xff] }
 0x43f   : > { %6408 = vmatmul.mubr.msk.f32.vlgmr.msra.gmra.mrb[54].mxu1 %vm2334_vm6, %v2266_v12  ;;  %v7595_v12 = vunpack.i.h.bf16 %v7593_v8 }
 0x440   : > { %7075 = vmatpush3.bf16.msra.mxu1 %v7072_v2  ;;  %6410 = vmatprep.mubr.msk.f32.mxu1 %vm2334_vm6, %v2267_v13  ;;  %v7589_v2 = vunpack.i.l.bf16 %v7588_v40  ;;  %v7594_v13 = vunpack.i.l.bf16 %v7593_v8 }
 0x441   : > { %7077 = vmatprep.subr.bf16.mxu1 %v7076_v14 }
 0x442   : > { %v7104_v5 = vpack.c.bf16 %v7590_v1, %v7589_v2  ;;  %v7108_v17 = vpack.c.bf16 %v7595_v12, %v7594_v13 }
 0x443   : > { %6411 = vmatmul.mubr.msk.f32.gmra.mrb[56].mxu1 %vm2334_vm6, %v2268_v18 }
 0x444   : > { %7079 = vmatpush3.bf16.msra.mxu1 %v7076_v14  ;;  %6413 = vmatprep.mubr.msk.f32.mxu1 %vm2334_vm6, %v2269_v19  ;;  %v7598_v14 = vpop.permute.xlu0 %7597 }
 0x445   : > { %7081 = vmatprep.subr.bf16.mxu1 %v7080_v20  ;;  %v7600_v18 = vunpack.i.h.bf16 %v7598_v14  ;;  %v7599_v19 = vunpack.i.l.bf16 %v7598_v14 }
 0x447   : > { %6414 = vmatmul.mubr.msk.f32.gmra.mrb[58].mxu1 %vm2334_vm6, %v2270_v23  ;;  %v7112_v23 = vpack.c.bf16 %v7600_v18, %v7599_v19 }
 0x448   : > { %7083 = vmatpush3.bf16.msra.mxu1 %v7080_v20  ;;  %6416 = vmatprep.mubr.msk.f32.mxu1 %vm2334_vm6, %v2271_v24  ;;  %v7603_v20 = vpop.permute.xlu1 %7602 }
 0x449   : > { %7085 = vmatprep.subr.bf16.mxu1 %v7084_v25  ;;  %v7605_v24 = vunpack.i.h.bf16 %v7603_v20 }
 0x44b   : > { %6417 = vmatmul.mubr.msk.f32.gmra.mrb[60].mxu1 %vm2334_vm6, %v2272_v27  ;;  %v5514_v27 = vld [vmem:[%s9398_s5 + $0x1b0] sm:$0xff] }
 0x44c   : > { %7087 = vmatpush3.bf16.msra.mxu1 %v7084_v25  ;;  %6419 = vmatprep.mubr.msk.f32.mxu1 %vm2334_vm6, %v2273_v28  ;;  %v7604_v25 = vunpack.i.l.bf16 %v7603_v20 }
 0x44d   : > { %6447 = vmatprep.subr.mxu1 %v2755_v31 }
 0x44e   : > { %v7116_v28 = vpack.c.bf16 %v7605_v24, %v7604_v25 }
 0x44f   : > { %6420 = vmatmul.mubr.msk.f32.gmra.mrb[62].mxu1 %vm2334_vm6, %v2274_v32  ;;  %v5517_v32 = vld [vmem:[%s9398_s5 + $0x1c8] sm:$0xff] }
 0x450   : > { %6448 = vmatpush3.msra.mxu1 %v2755_v31  ;;  %6422 = vmatprep.mubr.msk.f32.mxu1 %vm2334_vm6, %v2275_v33  ;;  %v3261_v31 = vpop.permute.xlu0 %3260  ;;  %v5518_v33 = vld [vmem:[%s9398_s5 + $0x1d0] sm:$0xff] }
 0x451   : > { %7089 = vmatprep.subr.bf16.mxu1 %v7088_v34 }
 0x453   : > { %6423 = vmatmul.mubr.msk.f32.gmra.mrb[64].mxu1 %vm2334_vm6, %v2276_v45  ;;  %v5520_v45 = vld [vmem:[%s9398_s5 + $0x1e0] sm:$0xff] }
 0x454   : > { %6425 = vmatprep.mubr.msk.f32.mxu1 %vm2334_vm6, %v2277_v35  ;;  %v5521_v35 = vld [vmem:[%s9398_s5 + $0x1e8] sm:$0xff]  ;;  %v3504_v9 = vpop.permute.xlu0 %3503 }
 0x457   : > { %6426 = vmatmul.mubr.msk.f32.gmra.mrb[66].mxu1 %vm2334_vm6, %v2278_v46  ;;  %v5522_v46 = vld [vmem:[%s9398_s5 + $0x1f0] sm:$0xff] }
 0x458   : > { %6428 = vmatprep.mubr.msk.f32.mxu1 %vm2334_vm6, %v2279_v47  ;;  %v5523_v47 = vld [vmem:[%s9398_s5 + $0x1f8] sm:$0xff] }
 0x45b   : > { %6429 = vmatmul.mubr.msk.f32.gmra.mrb[68].mxu1 %vm2334_vm6, %v2280_v49  ;;  %v5541_v49 = vld [vmem:[%s9398_s5 + $0x208] sm:$0xff] }
 0x45c   : > { %6449 = vmatprep.mubr.msk.f32.mxu1 %vm2334_vm6, %v5476_v36  ;;  %v5542_v36 = vld [vmem:[%s9398_s5 + $0x210] sm:$0xff] }
 0x45f   : > { %6450 = vmatmul.mubr.msk.f32.vlgmr.msra.gmra.mrb[54].mxu1 %vm2334_vm6, %v5477_v52  ;;  %v5546_v52 = vld [vmem:[%s9398_s5 + $0x230] sm:$0xff] }
 0x460   : > { %7091 = vmatpush3.bf16.msra.mxu1 %v7088_v34  ;;  %6452 = vmatprep.mubr.msk.f32.mxu1 %vm2334_vm6, %v5478_v53  ;;  %v5519_v34 = vld [vmem:[%s9398_s5 + $0x1d8] sm:$0xff] }
 0x461   : > { %7093 = vmatprep.subr.bf16.mxu1 %v7092_v54  ;;  %v5547_v53 = vld [vmem:[%s9398_s5 + $0x238] sm:$0xff] }
 0x463   : > { %6453 = vmatmul.mubr.msk.f32.gmra.mrb[56].mxu1 %vm2334_vm6, %v5479_v57  ;;  %v5552_v57 = vld [vmem:[%s9398_s5 + $0x260] sm:$0xff] }
 0x464   : > { %7095 = vmatpush3.bf16.msra.mxu1 %v7092_v54  ;;  %6455 = vmatprep.mubr.msk.f32.mxu1 %vm2334_vm6, %v5480_v58  ;;  %v5548_v54 = vld [vmem:[%s9398_s5 + $0x240] sm:$0xff]  ;;  %v5553_v58 = vld [vmem:[%s9398_s5 + $0x268] sm:$0xff] }
 0x465   : > { %7097 = vmatprep.subr.bf16.mxu1 %v7096_v59 }
 0x467   : > { %6456 = vmatmul.mubr.msk.f32.gmra.mrb[58].mxu1 %vm2334_vm6, %v5481_v60  ;;  %v3499_v60 = vpop.permute.xlu1 %3498 }
 0x468   : > { %7099 = vmatpush3.bf16.msra.mxu1 %v7096_v59  ;;  %6458 = vmatprep.mubr.msk.f32.mxu1 %vm2334_vm6, %v5482_v61  ;;  %v5554_v59 = vld [vmem:[%s9398_s5 + $0x270] sm:$0xff]  ;;  %v3514_v61 = vpop.permute.xlu0 %3513 }
 0x469   : > { %7101 = vmatprep.subr.bf16.mxu1 %v7100_v62 }
 0x46b   : > { %6459 = vmatmul.mubr.msk.f32.gmra.mrb[60].mxu1 %vm2334_vm6, %v5483_v63 }
 0x46c   : > { %7103 = vmatpush3.bf16.msra.mxu1 %v7100_v62  ;;  %6461 = vmatprep.mubr.msk.f32.mxu1 %vm2334_vm6, %v5484_v0  ;;  %v3509_v62 = vpop.permute.xlu1 %3508  ;;  %v3524_v40 = vpop.permute.xlu0 %3523 }
 0x46d   : > { %6489 = vmatprep.subr.mxu1 %v3008_v41 }
 0x46f   : > { %6462 = vmatmul.mubr.msk.f32.gmra.mrb[62].mxu1 %vm2334_vm6, %v5485_v3 }
 0x470   : > { %6490 = vmatpush3.msra.mxu1 %v3008_v41  ;;  %6464 = vmatprep.mubr.msk.f32.mxu1 %vm2334_vm6, %v5486_v4  ;;  %v3519_v63 = vpop.permute.xlu1 %3518  ;;  %v3534_v3 = vpop.permute.xlu0 %3533 }
 0x471   : > { %7105 = vmatprep.subr.bf16.mxu1 %v7104_v5 }
 0x473   : > { %6465 = vmatmul.mubr.msk.f32.gmra.mrb[64].mxu1 %vm2334_vm6, %v5487_v6 }
 0x474   : > { %6467 = vmatprep.mubr.msk.f32.mxu1 %vm2334_vm6, %v5488_v42  ;;  %v3529_v6 = vpop.permute.xlu1 %3528 }
 0x477   : > { %6468 = vmatmul.mubr.msk.f32.gmra.mrb[66].mxu1 %vm2334_vm6, %v5489_v7 }
 0x478   : > { %6470 = vmatprep.mubr.msk.f32.mxu1 %vm2334_vm6, %v5490_v44 }
 0x47b   : > { %6471 = vmatmul.mubr.msk.f32.gmra.mrb[68].mxu1 %vm2334_vm6, %v5491_v10 }
 0x47c   : > { %6491 = vmatprep.mubr.msk.f32.mxu1 %vm2334_vm6, %v5508_v11 }
 0x47f   : > { %6492 = vmatmul.mubr.msk.f32.vlgmr.msra.gmra.mrb[54].mxu1 %vm2334_vm6, %v5509_v15  ;;  %v3544_v15 = vpop.permute.xlu0 %3543 }
 0x480   : > { %7107 = vmatpush3.bf16.msra.mxu1 %v7104_v5  ;;  %6494 = vmatprep.mubr.msk.f32.mxu1 %vm2334_vm6, %v5510_v16 }
 0x481   : > { %7109 = vmatprep.subr.bf16.mxu1 %v7108_v17 }
 0x483   : > { %6495 = vmatmul.mubr.msk.f32.gmra.mrb[56].mxu1 %vm2334_vm6, %v5511_v21  ;;  %v3554_v24 = vpop.permute.xlu0 %3553 }
 0x484   : > { %7111 = vmatpush3.bf16.msra.mxu1 %v7108_v17  ;;  %6497 = vmatprep.mubr.msk.f32.mxu1 %vm2334_vm6, %v5512_v22  ;;  %v3539_v17 = vpop.permute.xlu1 %3538 }
 0x485   : > { %7113 = vmatprep.subr.bf16.mxu1 %v7112_v23 }
 0x487   : > { %6498 = vmatmul.mubr.msk.f32.gmra.mrb[58].mxu1 %vm2334_vm6, %v5513_v26 }
 0x488   : > { %7115 = vmatpush3.bf16.msra.mxu1 %v7112_v23  ;;  %6500 = vmatprep.mubr.msk.f32.mxu1 %vm2334_vm6, %v5514_v27  ;;  %v3549_v27 = vpop.permute.xlu1 %3548 }
 0x489   : > { %7117 = vmatprep.subr.bf16.mxu1 %v7116_v28 }
 0x48b   : > { %6501 = vmatmul.mubr.msk.f32.gmra.mrb[60].mxu1 %vm2334_vm6, %v5515_v29 }
 0x48c   : > { %7119 = vmatpush3.bf16.msra.mxu1 %v7116_v28  ;;  %6503 = vmatprep.mubr.msk.f32.mxu1 %vm2334_vm6, %v5516_v30 }
 0x48d   : > { %6531 = vmatprep.subr.mxu1 %v3261_v31 }
 0x48f   : > { %6504 = vmatmul.mubr.msk.f32.gmra.mrb[62].mxu1 %vm2334_vm6, %v5517_v32 }
 0x490   : > { %6532 = vmatpush3.msra.mxu1 %v3261_v31  ;;  %6506 = vmatprep.mubr.msk.f32.mxu1 %vm2334_vm6, %v5518_v33 }
 0x491   : > { %7152 = vmatprep.subr.bf16.mxu1 %v7680_v43 }
 0x493   : > { %6507 = vmatmul.mubr.msk.f32.gmra.mrb[64].mxu1 %vm2334_vm6, %v5519_v34 }
 0x494   : > { %6509 = vmatprep.mubr.msk.f32.mxu1 %vm2334_vm6, %v5520_v45 }
 0x497   : > { %6510 = vmatmul.mubr.msk.f32.gmra.mrb[66].mxu1 %vm2334_vm6, %v5521_v35 }
 0x498   : > { %6512 = vmatprep.mubr.msk.f32.mxu1 %vm2334_vm6, %v5522_v46  ;;  %v3564_v46 = vpop.permute.xlu0 %3563 }
 0x49b   : > { %6513 = vmatmul.mubr.msk.f32.gmra.mrb[68].mxu1 %vm2334_vm6, %v5523_v47 }
 0x49c   : > { %6533 = vmatprep.mubr.msk.f32.mxu1 %vm2334_vm6, %v5540_v48  ;;  %v3559_v48 = vpop.permute.xlu1 %3558 }
 0x49f   : > { %6534 = vmatmul.mubr.msk.f32.vlgmr.msra.gmra.mrb[54].mxu1 %vm2334_vm6, %v5541_v49 }
 0x4a0   : > { %6536 = vmatprep.mubr.msk.f32.mxu1 %vm2334_vm6, %v5542_v36 }
 0x4a3   : > { %6537 = vmatmul.mubr.msk.f32.gmra.mrb[56].mxu1 %vm2334_vm6, %v5543_v50 }
 0x4a4   : > { %6539 = vmatprep.mubr.msk.f32.mxu1 %vm2334_vm6, %v5544_v51 }
 0x4a7   : > { %6540 = vmatmul.mubr.msk.f32.gmra.mrb[58].mxu1 %vm2334_vm6, %v5545_v37 }
 0x4a8   : > { %6542 = vmatprep.mubr.msk.f32.mxu1 %vm2334_vm6, %v5546_v52 }
 0x4ab   : > { %6543 = vmatmul.mubr.msk.f32.gmra.mrb[60].mxu1 %vm2334_vm6, %v5547_v53  ;;  %v3574_v53 = vpop.permute.xlu0 %3573 }
 0x4ac   : > { %6545 = vmatprep.mubr.msk.f32.mxu1 %vm2334_vm6, %v5548_v54 }
 0x4af   : > { %6546 = vmatmul.mubr.msk.f32.gmra.mrb[62].mxu1 %vm2334_vm6, %v5549_v55 }
 0x4b0   : > { %6548 = vmatprep.mubr.msk.f32.mxu1 %vm2334_vm6, %v5550_v56  ;;  %v3569_v56 = vpop.permute.xlu1 %3568 }
 0x4b3   : > { %6549 = vmatmul.mubr.msk.f32.gmra.mrb[64].mxu1 %vm2334_vm6, %v5551_v38 }
 0x4b4   : > { %6551 = vmatprep.mubr.msk.f32.mxu1 %vm2334_vm6, %v5552_v57 }
 0x4b7   : > { %6552 = vmatmul.mubr.msk.f32.gmra.mrb[66].mxu1 %vm2334_vm6, %v5553_v58 }
 0x4b8   : > { %6554 = vmatprep.mubr.msk.f32.mxu1 %vm2334_vm6, %v5554_v59 }
 0x4bb   : > { %6555 = vmatmul.mubr.msk.f32.gmra.mrb[68].mxu1 %vm2334_vm6, %v5555_v39 }
 0x572   : > { %v6535_v0 = vpop.f32.mrb[54].mxu1 }
 0x573   : > { %v3577_v1 = vadd.f32 %v6535_v0, %v3504_v9  ;;  %v3385_v2 = vpop.f32.mrb[55].mxu1 }
 0x574   : > { %v3576_v41 = vadd.f32 %v3499_v60, %v3385_v2  ;;  %v3608_v60 = vld [vmem:[%s9401_s8] sm:$0xff] }
 0x575   : > { %v3593_v42 = vmax.f32 %v3577_v1, 0.0 }
 0x576   : > { %v3592_v4 = vmax.f32 %v3576_v41, 0.0  ;;  %v6538_v5 = vpop.f32.mrb[56].mxu1 }
 0x577   : > { %v3579_v7 = vadd.f32 %v6538_v5, %v3514_v61  ;;  %v3395_v44 = vpop.f32.mrb[57].mxu1 }
 0x578   : > { %v3578_v8 = vadd.f32 %v3509_v62, %v3395_v44  ;;  %6559 = vmatprep.mubr.msk.f32.mxu0 %vm3617_vm7, %v3592_v4 }
 0x579   : > { %6560 = vmatmul.mubr.msk.f32.vlgmr.msra.gmra.mrb[18].mxu0 %vm3617_vm7, %v3593_v42  ;;  %v3595_v12 = vmax.f32 %v3579_v7, 0.0 }
 0x57a   : > { %v3594_v10 = vmax.f32 %v3578_v8, 0.0  ;;  %v6541_v11 = vpop.f32.mrb[58].mxu1 }
 0x57b   : > { %v3581_v13 = vadd.f32 %v6541_v11, %v3524_v40  ;;  %v3405_v14 = vpop.f32.mrb[59].mxu1 }
 0x57c   : > { %v3580_v16 = vadd.f32 %v3519_v63, %v3405_v14  ;;  %6562 = vmatprep.mubr.msk.f32.mxu0 %vm3617_vm7, %v3594_v10 }
 0x57d   : > { %6563 = vmatmul.mubr.msk.f32.gmra.mrb[20].mxu0 %vm3617_vm7, %v3595_v12  ;;  %v3597_v20 = vmax.f32 %v3581_v13, 0.0 }
 0x57e   : > { %v3596_v18 = vmax.f32 %v3580_v16, 0.0  ;;  %v6544_v19 = vpop.f32.mrb[60].mxu1 }
 0x57f   : > { %v3583_v21 = vadd.f32 %v6544_v19, %v3534_v3  ;;  %v3415_v22 = vpop.f32.mrb[61].mxu1  ;;  %v3610_v19 = vld [vmem:[%s9401_s8 + $0x10] sm:$0xff] }
 0x580   : > { %v3582_v23 = vadd.f32 %v3529_v6, %v3415_v22  ;;  %6565 = vmatprep.mubr.msk.f32.mxu0 %vm3617_vm7, %v3596_v18  ;;  %v3609_v18 = vld [vmem:[%s9401_s8 + $0x8] sm:$0xff] }
 0x581   : > { %6566 = vmatmul.mubr.msk.f32.gmra.mrb[22].mxu0 %vm3617_vm7, %v3597_v20  ;;  %v3599_v28 = vmax.f32 %v3583_v21, 0.0  ;;  %v3611_v20 = vld [vmem:[%s9401_s8 + $0x18] sm:$0xff]  ;;  %v3612_v21 = vld [vmem:[%s9401_s8 + $0x20] sm:$0xff]  ;;  %v3613_v22 = vld [vmem:[%s9401_s8 + $0x28] sm:$0xff] }
 0x582   : > { %v3598_v25 = vmax.f32 %v3582_v23, 0.0  ;;  %v6547_v26 = vpop.f32.mrb[62].mxu1  ;;  %v3614_v23 = vld [vmem:[%s9401_s8 + $0x30] sm:$0xff] }
 0x583   : > { %v3585_v29 = vadd.f32 %v6547_v26, %v3544_v15  ;;  %v3425_v30 = vpop.f32.mrb[63].mxu1 }
 0x584   : > { %v3584_v31 = vadd.f32 %v3539_v17, %v3425_v30  ;;  %6568 = vmatprep.mubr.msk.f32.mxu0 %vm3617_vm7, %v3598_v25 }
 0x585   : > { %6569 = vmatmul.mubr.msk.f32.gmra.mrb[24].mxu0 %vm3617_vm7, %v3599_v28  ;;  %v3601_v34 = vmax.f32 %v3585_v29, 0.0 }
 0x586   : > { %v3600_v32 = vmax.f32 %v3584_v31, 0.0  ;;  %v6550_v33 = vpop.f32.mrb[64].mxu1 }
 0x587   : > { %v3587_v45 = vadd.f32 %v6550_v33, %v3554_v24  ;;  %v3435_v35 = vpop.f32.mrb[65].mxu1  ;;  %v3615_v24 = vld [vmem:[%s9401_s8 + $0x38] sm:$0xff] }
 0x588   : > { %v3586_v47 = vadd.f32 %v3549_v27, %v3435_v35  ;;  %6571 = vmatprep.mubr.msk.f32.mxu0 %vm3617_vm7, %v3600_v32 }
 0x589   : > { %6572 = vmatmul.mubr.msk.f32.gmra.mrb[26].mxu0 %vm3617_vm7, %v3601_v34  ;;  %v3603_v50 = vmax.f32 %v3587_v45, 0.0 }
 0x58a   : > { %v3602_v49 = vmax.f32 %v3586_v47, 0.0  ;;  %v6553_v36 = vpop.f32.mrb[66].mxu1 }
 0x58b   : > { %v3589_v51 = vadd.f32 %v6553_v36, %v3564_v46  ;;  %v3445_v37 = vpop.f32.mrb[67].mxu1  ;;  %v7682_v46 = vmov 0.0  }
 0x58c   : > { %v3588_v52 = vadd.f32 %v3559_v48, %v3445_v37  ;;  %6574 = vmatprep.mubr.msk.f32.mxu0 %vm3617_vm7, %v3602_v49  ;;  %6643 = vmatprep.mubr.msk.f32.mxu1 %vm7681_vm8, %v7682_v46 }
 0x58d   : > { %6575 = vmatmul.mubr.msk.f32.gmra.mrb[28].mxu0 %vm3617_vm7, %v3603_v50  ;;  %v3605_v38 = vmax.f32 %v3589_v51, 0.0 }
 0x58e   : > { %v3604_v54 = vmax.f32 %v3588_v52, 0.0  ;;  %v6556_v55 = vpop.f32.mrb[68].mxu1 }
 0x58f   : > { %v3591_v57 = vadd.f32 %v6556_v55, %v3574_v53  ;;  %v3455_v58 = vpop.f32.mrb[69].mxu1 }
 0x590   : > { %v3590_v59 = vadd.f32 %v3569_v56, %v3455_v58  ;;  %6577 = vmatprep.mubr.msk.f32.mxu0 %vm3617_vm7, %v3604_v54 }
 0x591   : > { %6578 = vmatmul.mubr.msk.f32.gmra.mrb[30].mxu0 %vm3617_vm7, %v3605_v38  ;;  %v3607_v9 = vmax.f32 %v3591_v57, 0.0  ;;  %v3931_v57 = vld [vmem:[%s9402_s9] sm:$0xff] }
 0x592   : > { %v3606_v39 = vmax.f32 %v3590_v59, 0.0 }
 0x594   : > { %6580 = vmatprep.mubr.msk.f32.mxu0 %vm3617_vm7, %v3606_v39 }
 0x595   : > { %6581 = vmatmul.mubr.msk.f32.gmra.mrb[32].mxu0 %vm3617_vm7, %v3607_v9 }
 0x596   : > { %6615 = vmatprep.mubr.f32.mxu0 %v3608_v60 }
 0x64c   : > { %v6561_v61 = vpop.f32.mrb[18].mxu0 }
 0x64d   : > { %v3732_v62 = vpop.f32.mrb[19].mxu0 }
 0x64e   : > { %v7120_v40 = vpack.c.bf16 %v6561_v61, %v3732_v62  ;;  %v3932_v61 = vld [vmem:[%s9402_s9 + $0x8] sm:$0xff] }
 0x650   : > { %v6564_v63 = vpop.f32.mrb[20].mxu0  ;;  %7121 = vmatprep.subr.bf16.mxu0 %v7120_v40 }
 0x651   : > { %v3742_v0 = vpop.f32.mrb[21].mxu0  ;;  %7123 = vmatpush3.bf16.msra.mxu0 %v7120_v40 }
 0x652   : > { %v7124_v1 = vpack.c.bf16 %v6564_v63, %v3742_v0 }
 0x654   : > { %v6567_v2 = vpop.f32.mrb[22].mxu0  ;;  %7125 = vmatprep.subr.bf16.mxu0 %v7124_v1 }
 0x655   : > { %v3752_v41 = vpop.f32.mrb[23].mxu0  ;;  %7127 = vmatpush3.bf16.msra.mxu0 %v7124_v1 }
 0x656   : > { %v7128_v3 = vpack.c.bf16 %v6567_v2, %v3752_v41  ;;  %v3933_v41 = vld [vmem:[%s9402_s9 + $0x10] sm:$0xff] }
 0x658   : > { %v6570_v4 = vpop.f32.mrb[24].mxu0  ;;  %7129 = vmatprep.subr.bf16.mxu0 %v7128_v3 }
 0x659   : > { %v3762_v5 = vpop.f32.mrb[25].mxu0  ;;  %7131 = vmatpush3.bf16.msra.mxu0 %v7128_v3  ;;  %v5603_v3 = vld [vmem:[%s9402_s9 + $0x78] sm:$0xff] }
 0x65a   : > { %v7132_v6 = vpack.c.bf16 %v6570_v4, %v3762_v5 }
 0x65c   : > { %v6573_v42 = vpop.f32.mrb[26].mxu0  ;;  %7133 = vmatprep.subr.bf16.mxu0 %v7132_v6 }
 0x65d   : > { %v3772_v7 = vpop.f32.mrb[27].mxu0  ;;  %7135 = vmatpush3.bf16.msra.mxu0 %v7132_v6 }
 0x65e   : > { %v7136_v44 = vpack.c.bf16 %v6573_v42, %v3772_v7  ;;  %v3934_v7 = vld [vmem:[%s9402_s9 + $0x18] sm:$0xff] }
 0x660   : > { %v6576_v8 = vpop.f32.mrb[28].mxu0  ;;  %7137 = vmatprep.subr.bf16.mxu0 %v7136_v44 }
 0x661   : > { %v3782_v10 = vpop.f32.mrb[29].mxu0  ;;  %7139 = vmatpush3.bf16.msra.mxu0 %v7136_v44  ;;  %v5604_v44 = vld [vmem:[%s9402_s9 + $0x80] sm:$0xff] }
 0x662   : > { %v7140_v11 = vpack.c.bf16 %v6576_v8, %v3782_v10 }
 0x664   : > { %v6579_v12 = vpop.f32.mrb[30].mxu0  ;;  %7141 = vmatprep.subr.bf16.mxu0 %v7140_v11 }
 0x665   : > { %v3792_v13 = vpop.f32.mrb[31].mxu0  ;;  %7143 = vmatpush3.bf16.msra.mxu0 %v7140_v11 }
 0x666   : > { %v7144_v14 = vpack.c.bf16 %v6579_v12, %v3792_v13  ;;  %v3935_v13 = vld [vmem:[%s9402_s9 + $0x20] sm:$0xff] }
 0x668   : > { %v6582_v15 = vpop.f32.mrb[32].mxu0  ;;  %7145 = vmatprep.subr.bf16.mxu0 %v7144_v14 }
 0x669   : > { %v3802_v16 = vpop.f32.mrb[33].mxu0  ;;  %7147 = vmatpush3.bf16.msra.mxu0 %v7144_v14  ;;  %v5605_v14 = vld [vmem:[%s9402_s9 + $0x88] sm:$0xff] }
 0x66a   : > { %v7148_v17 = vpack.c.bf16 %v6582_v15, %v3802_v16 }
 0x66c   : > { %7149 = vmatprep.subr.bf16.mxu0 %v7148_v17 }
 0x66d   : > { %7151 = vmatpush3.bf16.msra.mxu0 %v7148_v17 }
 0x66e   : > { %7164 = vmatprep.subr.bf16.mxu0 %v7680_v43 }
 0x670   : > { %6616 = vmatmul.mubr.f32.vlgmr.msra.gmra.mrb[34].mxu0 %v3609_v18  ;;  %v3936_v18 = vld [vmem:[%s9402_s9 + $0x28] sm:$0xff] }
 0x671   : > { %6618 = vmatprep.mubr.f32.mxu0 %v3610_v19  ;;  %v5606_v19 = vld [vmem:[%s9402_s9 + $0x90] sm:$0xff] }
 0x674   : > { %6619 = vmatmul.mubr.f32.gmra.mrb[36].mxu0 %v3611_v20 }
 0x675   : > { %6621 = vmatprep.mubr.f32.mxu0 %v3612_v21  ;;  %v3937_v21 = vld [vmem:[%s9402_s9 + $0x30] sm:$0xff] }
 0x678   : > { %6622 = vmatmul.mubr.f32.gmra.mrb[38].mxu0 %v3613_v22  ;;  %v5607_v22 = vld [vmem:[%s9402_s9 + $0x98] sm:$0xff] }
 0x679   : > { %6624 = vmatprep.mubr.f32.mxu0 %v3614_v23  ;;  %v3938_v23 = vld [vmem:[%s9402_s9 + $0x38] sm:$0xff] }
 0x67c   : > { %6625 = vmatmul.mubr.f32.gmra.mrb[40].mxu0 %v3615_v24  ;;  %v5608_v24 = vld [vmem:[%s9402_s9 + $0xa0] sm:$0xff] }
 0x67d   : > { %6704 = vmatprep.mubr.msk.f32.mxu0 %vm7681_vm8, %v7682_v46 }
 0x743   : > { %v6617_v25 = vpop.f32.mrb[34].mxu0 }
 0x744   : > { %v3877_v26 = vpop.f32.mrb[35].mxu0 }
 0x745   : > { %v7153_v27 = vpack.c.bf16 %v6617_v25, %v3877_v26  ;;  %v7606_v28 = vpack.i.bf16 %v6617_v25, %v3877_v26  ;;  %v3939_v25 = vld [vmem:[%s9402_s9 + $0x40] sm:$0xff]  ;;  %v5609_v26 = vld [vmem:[%s9402_s9 + $0xa8] sm:$0xff] }
 0x747   : > { %7607 = vrot.lane.b32.xlu1 %v7606_v28, %s7678_s16  ;;  %v6620_v29 = vpop.f32.mrb[36].mxu0  ;;  %7154 = vmatpush3.bf16.msra.mxu1 %v7153_v27  ;;  %v3940_v27 = vld [vmem:[%s9402_s9 + $0x48] sm:$0xff] }
 0x748   : > { %v3887_v30 = vpop.f32.mrb[37].mxu0  ;;  %7155 = vmatprep.subr.bf16.mxu1 %v7680_v43 }
 0x749   : > { %v7156_v31 = vpack.c.bf16 %v6620_v29, %v3887_v30  ;;  %v7611_v32 = vpack.i.bf16 %v6620_v29, %v3887_v30  ;;  %v3941_v29 = vld [vmem:[%s9402_s9 + $0x50] sm:$0xff]  ;;  %v5611_v30 = vld [vmem:[%s9402_s9 + $0xb8] sm:$0xff] }
 0x74b   : > { %7612 = vrot.lane.b32.xlu0 %v7611_v32, %s7678_s16  ;;  %v6623_v33 = vpop.f32.mrb[38].mxu0  ;;  %7157 = vmatpush3.bf16.msra.mxu1 %v7156_v31  ;;  %v3942_v31 = vld [vmem:[%s9402_s9 + $0x58] sm:$0xff] }
 0x74c   : > { %v3897_v34 = vpop.f32.mrb[39].mxu0  ;;  %7158 = vmatprep.subr.bf16.mxu1 %v7680_v43 }
 0x74d   : > { %v7159_v45 = vpack.c.bf16 %v6623_v33, %v3897_v34  ;;  %v7616_v35 = vpack.i.bf16 %v6623_v33, %v3897_v34  ;;  %v3943_v33 = vld [vmem:[%s9402_s9 + $0x60] sm:$0xff]  ;;  %v5613_v34 = vld [vmem:[%s9402_s9 + $0xc8] sm:$0xff] }
 0x74f   : > { %7617 = vrot.lane.b32.xlu1 %v7616_v35, %s7678_s16  ;;  %v6626_v47 = vpop.f32.mrb[40].mxu0  ;;  %7160 = vmatpush3.bf16.msra.mxu1 %v7159_v45  ;;  %v3944_v45 = vld [vmem:[%s9402_s9 + $0x68] sm:$0xff] }
 0x750   : > { %v3907_v48 = vpop.f32.mrb[41].mxu0  ;;  %7161 = vmatprep.subr.bf16.mxu1 %v7680_v43 }
 0x751   : > { %v7162_v49 = vpack.c.bf16 %v6626_v47, %v3907_v48  ;;  %v7621_v36 = vpack.i.bf16 %v6626_v47, %v3907_v48  ;;  %v3945_v47 = vld [vmem:[%s9402_s9 + $0x70] sm:$0xff]  ;;  %v5615_v48 = vld [vmem:[%s9402_s9 + $0xd8] sm:$0xff] }
 0x753   : > { %7627 = vrot.lane.b32.xlu1 %v7606_v28, %s7674_s26  ;;  %7622 = vrot.lane.b32.xlu0 %v7621_v36, %s7678_s16 }
 0x754   : > { %7163 = vmatpush3.bf16.msra.mxu1 %v7162_v49  ;;  %v5616_v49 = vld [vmem:[%s9402_s9 + $0xe0] sm:$0xff] }
 0x755   : > { %7200 = vmatprep.subr.bf16.mxu1 %v7680_v43 }
 0x757   : > { %7637 = vrot.lane.b32.xlu1 %v7616_v35, %s7674_s26  ;;  %7632 = vrot.lane.b32.xlu0 %v7611_v32, %s7674_s26 }
 0x758   : > { %6644 = vmatmul.mubr.msk.f32.vlgmr.msra.gmra.mrb[70].mxu1 %vm3946_vm9, %v3931_v57  ;;  %v5634_v57 = vld [vmem:[%s9402_s9 + $0xf8] sm:$0xff] }
 0x759   : > { %6646 = vmatprep.mubr.msk.f32.mxu1 %vm7681_vm8, %v7682_v46 }
 0x75b   : > { %7647 = vrot.lane.b32.xlu1 %v7606_v28, %s7675_s27  ;;  %7642 = vrot.lane.b32.xlu0 %v7621_v36, %s7674_s26  ;;  %v5610_v28 = vld [vmem:[%s9402_s9 + $0xb0] sm:$0xff] }
 0x75c   : > { %6647 = vmatmul.mubr.msk.f32.gmra.mrb[72].mxu1 %vm3946_vm9, %v3932_v61 }
 0x75d   : > { %6649 = vmatprep.mubr.msk.f32.mxu1 %vm7681_vm8, %v7682_v46 }
 0x75f   : > { %7652 = vrot.lane.b32.xlu0 %v7611_v32, %s7675_s27  ;;  %7657 = vrot.lane.b32.xlu1 %v7616_v35, %s7675_s27  ;;  %v5612_v32 = vld [vmem:[%s9402_s9 + $0xc0] sm:$0xff]  ;;  %v5614_v35 = vld [vmem:[%s9402_s9 + $0xd0] sm:$0xff] }
 0x760   : > { %6650 = vmatmul.mubr.msk.f32.gmra.mrb[74].mxu1 %vm3946_vm9, %v3933_v41  ;;  %v5639_v41 = vld [vmem:[%s9402_s9 + $0x120] sm:$0xff] }
 0x761   : > { %6652 = vmatprep.mubr.msk.f32.mxu1 %vm7681_vm8, %v7682_v46 }
 0x763   : > { %7662 = vrot.lane.b32.xlu0 %v7621_v36, %s7675_s27 }
 0x764   : > { %6653 = vmatmul.mubr.msk.f32.gmra.mrb[76].mxu1 %vm3946_vm9, %v3934_v7  ;;  %v5645_v7 = vld [vmem:[%s9402_s9 + $0x150] sm:$0xff] }
 0x765   : > { %6655 = vmatprep.mubr.msk.f32.mxu1 %vm7681_vm8, %v7682_v46 }
 0x768   : > { %6656 = vmatmul.mubr.msk.f32.gmra.mrb[78].mxu1 %vm3946_vm9, %v3935_v13  ;;  %v5666_v13 = vld [vmem:[%s9402_s9 + $0x180] sm:$0xff] }
 0x769   : > { %6658 = vmatprep.mubr.msk.f32.mxu1 %vm7681_vm8, %v7682_v46 }
 0x76c   : > { %6659 = vmatmul.mubr.msk.f32.gmra.mrb[80].mxu1 %vm3946_vm9, %v3936_v18  ;;  %v5671_v18 = vld [vmem:[%s9402_s9 + $0x1a8] sm:$0xff] }
 0x76d   : > { %6661 = vmatprep.mubr.msk.f32.mxu1 %vm7681_vm8, %v7682_v46 }
 0x770   : > { %6662 = vmatmul.mubr.msk.f32.gmra.mrb[82].mxu1 %vm3946_vm9, %v3937_v21  ;;  %v5674_v21 = vld [vmem:[%s9402_s9 + $0x1c0] sm:$0xff] }
 0x771   : > { %6664 = vmatprep.mubr.msk.f32.mxu1 %vm7681_vm8, %v7682_v46 }
 0x774   : > { %6665 = vmatmul.mubr.msk.f32.gmra.mrb[84].mxu1 %vm3946_vm9, %v3938_v23  ;;  %v5676_v23 = vld [vmem:[%s9402_s9 + $0x1d0] sm:$0xff] }
 0x775   : > { %6667 = vmatprep.mubr.msk.f32.mxu1 %vm7681_vm8, %v7682_v46 }
 0x778   : > { %6668 = vmatmul.mubr.msk.f32.gmra.mrb[86].mxu1 %vm3946_vm9, %v3939_v25 }
 0x779   : > { %6670 = vmatprep.mubr.msk.f32.mxu1 %vm7681_vm8, %v7682_v46 }
 0x77c   : > { %6671 = vmatmul.mubr.msk.f32.gmra.mrb[88].mxu1 %vm3946_vm9, %v3940_v27 }
 0x77d   : > { %6673 = vmatprep.mubr.msk.f32.mxu1 %vm7681_vm8, %v7682_v46 }
 0x780   : > { %6674 = vmatmul.mubr.msk.f32.gmra.mrb[90].mxu1 %vm3946_vm9, %v3941_v29 }
 0x781   : > { %6676 = vmatprep.mubr.msk.f32.mxu1 %vm7681_vm8, %v7682_v46 }
 0x784   : > { %6677 = vmatmul.mubr.msk.f32.gmra.mrb[92].mxu1 %vm3946_vm9, %v3942_v31 }
 0x785   : > { %6679 = vmatprep.mubr.msk.f32.mxu1 %vm7681_vm8, %v7682_v46 }
 0x788   : > { %6680 = vmatmul.mubr.msk.f32.gmra.mrb[94].mxu1 %vm3946_vm9, %v3943_v33 }
 0x789   : > { %6682 = vmatprep.mubr.msk.f32.mxu1 %vm7681_vm8, %v7682_v46 }
 0x78c   : > { %6683 = vmatmul.mubr.msk.f32.gmra.mrb[96].mxu1 %vm3946_vm9, %v3944_v45 }
 0x78d   : > { %6685 = vmatprep.mubr.msk.f32.mxu1 %vm7681_vm8, %v7682_v46 }
 0x790   : > { %6686 = vmatmul.mubr.msk.f32.gmra.mrb[98].mxu1 %vm3946_vm9, %v3945_v47 }
 0x791   : > { %6901 = vmatprep.mubr.msk.f32.mxu1 %vm7681_vm8, %v7682_v46 }
 0x7b9   : > { %v7608_v50 = vpop.permute.xlu1 %7607 }
 0x7ba   : > { %v7610_v51 = vunpack.i.h.bf16 %v7608_v50  ;;  %v7609_v37 = vunpack.i.l.bf16 %v7608_v50  ;;  %v5617_v50 = vld [vmem:[%s9402_s9 + $0xe8] sm:$0xff] }
 0x7bc   : > { %v7165_v52 = vpack.c.bf16 %v7610_v51, %v7609_v37 }
 0x7bd   : > { %v7613_v53 = vpop.permute.xlu0 %7612 }
 0x7be   : > { %v7615_v54 = vunpack.i.h.bf16 %v7613_v53  ;;  %v7614_v55 = vunpack.i.l.bf16 %v7613_v53  ;;  %7166 = vmatpush3.bf16.msra.mxu0 %v7165_v52  ;;  %v5633_v53 = vld [vmem:[%s9402_s9 + $0xf0] sm:$0xff] }
 0x7bf   : > { %7167 = vmatprep.subr.bf16.mxu0 %v7680_v43 }
 0x7c0   : > { %v7168_v56 = vpack.c.bf16 %v7615_v54, %v7614_v55 }
 0x7c1   : > { %v7618_v38 = vpop.permute.xlu1 %7617 }
 0x7c2   : > { %v7620_v58 = vunpack.i.h.bf16 %v7618_v38  ;;  %v7619_v59 = vunpack.i.l.bf16 %v7618_v38  ;;  %7169 = vmatpush3.bf16.msra.mxu0 %v7168_v56 }
 0x7c3   : > { %7170 = vmatprep.subr.bf16.mxu0 %v7680_v43 }
 0x7c4   : > { %v7171_v39 = vpack.c.bf16 %v7620_v58, %v7619_v59 }
 0x7c5   : > { %v7628_v9 = vpop.permute.xlu1 %7627  ;;  %v7623_v60 = vpop.permute.xlu0 %7622 }
 0x7c6   : > { %v7625_v62 = vunpack.i.h.bf16 %v7623_v60  ;;  %v7624_v40 = vunpack.i.l.bf16 %v7623_v60  ;;  %7172 = vmatpush3.bf16.msra.mxu0 %v7171_v39  ;;  %v7630_v63 = vunpack.i.h.bf16 %v7628_v9  ;;  %v7629_v0 = vunpack.i.l.bf16 %v7628_v9  ;;  %v5635_v60 = vld [vmem:[%s9402_s9 + $0x100] sm:$0xff] }
 0x7c7   : > { %7173 = vmatprep.subr.bf16.mxu0 %v7680_v43 }
 0x7c8   : > { %v7174_v1 = vpack.c.bf16 %v7625_v62, %v7624_v40  ;;  %v7177_v4 = vpack.c.bf16 %v7630_v63, %v7629_v0  ;;  %v5636_v63 = vld [vmem:[%s9402_s9 + $0x108] sm:$0xff] }
 0x7c9   : > { %v7633_v2 = vpop.permute.xlu0 %7632  ;;  %v7638_v42 = vpop.permute.xlu1 %7637 }
 0x7ca   : > { %7175 = vmatpush3.bf16.msra.mxu0 %v7174_v1  ;;  %v7635_v5 = vunpack.i.h.bf16 %v7633_v2  ;;  %v7634_v6 = vunpack.i.l.bf16 %v7633_v2  ;;  %v7640_v8 = vunpack.i.h.bf16 %v7638_v42  ;;  %v7639_v10 = vunpack.i.l.bf16 %v7638_v42  ;;  %v5637_v1 = vld [vmem:[%s9402_s9 + $0x110] sm:$0xff]  ;;  %v5638_v2 = vld [vmem:[%s9402_s9 + $0x118] sm:$0xff]  ;;  %v5644_v42 = vld [vmem:[%s9402_s9 + $0x148] sm:$0xff] }
 0x7cb   : > { %7176 = vmatprep.subr.bf16.mxu0 %v7680_v43 }
 0x7cc   : > { %v7180_v11 = vpack.c.bf16 %v7635_v5, %v7634_v6  ;;  %v7183_v15 = vpack.c.bf16 %v7640_v8, %v7639_v10  ;;  %v5642_v5 = vld [vmem:[%s9402_s9 + $0x138] sm:$0xff]  ;;  %v5643_v6 = vld [vmem:[%s9402_s9 + $0x140] sm:$0xff]  ;;  %v5663_v10 = vld [vmem:[%s9402_s9 + $0x168] sm:$0xff] }
 0x7cd   : > { %6705 = vmatmul.mubr.msk.f32.vlgmr.msra.gmra.mrb[42].mxu0 %vm3946_vm9, %v5603_v3  ;;  %v7643_v12 = vpop.permute.xlu0 %7642  ;;  %v7648_v36 = vpop.permute.xlu1 %7647  ;;  %v5640_v3 = vld [vmem:[%s9402_s9 + $0x128] sm:$0xff]  ;;  %v5647_v8 = vld [vmem:[%s9402_s9 + $0x160] sm:$0xff] }
 0x7ce   : > { %6707 = vmatprep.mubr.msk.f32.mxu0 %vm7681_vm8, %v7682_v46  ;;  %7178 = vmatpush3.bf16.msra.mxu0 %v7177_v4  ;;  %v7645_v16 = vunpack.i.h.bf16 %v7643_v12  ;;  %v7644_v17 = vunpack.i.l.bf16 %v7643_v12  ;;  %v7650_v51 = vunpack.i.h.bf16 %v7648_v36  ;;  %v7649_v37 = vunpack.i.l.bf16 %v7648_v36  ;;  %v5641_v4 = vld [vmem:[%s9402_s9 + $0x130] sm:$0xff]  ;;  %v5665_v12 = vld [vmem:[%s9402_s9 + $0x178] sm:$0xff] }
 0x7cf   : > { %7179 = vmatprep.subr.bf16.mxu0 %v7680_v43 }
 0x7d0   : > { %v7186_v20 = vpack.c.bf16 %v7645_v16, %v7644_v17  ;;  %v7189_v54 = vpack.c.bf16 %v7650_v51, %v7649_v37  ;;  %v5669_v16 = vld [vmem:[%s9402_s9 + $0x198] sm:$0xff]  ;;  %v5670_v17 = vld [vmem:[%s9402_s9 + $0x1a0] sm:$0xff] }
 0x7d1   : > { %6708 = vmatmul.mubr.msk.f32.gmra.mrb[44].mxu0 %vm3946_vm9, %v5604_v44  ;;  %v7653_v52 = vpop.permute.xlu0 %7652  ;;  %v7658_v38 = vpop.permute.xlu1 %7657  ;;  %v5646_v44 = vld [vmem:[%s9402_s9 + $0x158] sm:$0xff] }
 0x7d2   : > { %6710 = vmatprep.mubr.msk.f32.mxu0 %vm7681_vm8, %v7682_v46  ;;  %7181 = vmatpush3.bf16.msra.mxu0 %v7180_v11  ;;  %v7655_v55 = vunpack.i.h.bf16 %v7653_v52  ;;  %v7654_v56 = vunpack.i.l.bf16 %v7653_v52  ;;  %v7660_v59 = vunpack.i.h.bf16 %v7658_v38  ;;  %v7659_v39 = vunpack.i.l.bf16 %v7658_v38  ;;  %v5664_v11 = vld [vmem:[%s9402_s9 + $0x170] sm:$0xff] }
 0x7d3   : > { %7182 = vmatprep.subr.bf16.mxu0 %v7680_v43 }
 0x7d4   : > { %v7192_v58 = vpack.c.bf16 %v7655_v55, %v7654_v56  ;;  %v7195_v61 = vpack.c.bf16 %v7660_v59, %v7659_v39 }
 0x7d5   : > { %6711 = vmatmul.mubr.msk.f32.gmra.mrb[46].mxu0 %vm3946_vm9, %v5605_v14  ;;  %v7663_v9 = vpop.permute.xlu0 %7662  ;;  %v5667_v14 = vld [vmem:[%s9402_s9 + $0x188] sm:$0xff] }
 0x7d6   : > { %6713 = vmatprep.mubr.msk.f32.mxu0 %vm7681_vm8, %v7682_v46  ;;  %7184 = vmatpush3.bf16.msra.mxu0 %v7183_v15  ;;  %v7665_v62 = vunpack.i.h.bf16 %v7663_v9  ;;  %v7664_v40 = vunpack.i.l.bf16 %v7663_v9  ;;  %v5668_v15 = vld [vmem:[%s9402_s9 + $0x190] sm:$0xff] }
 0x7d7   : > { %7185 = vmatprep.subr.bf16.mxu0 %v7680_v43 }
 0x7d8   : > { %v7198_v0 = vpack.c.bf16 %v7665_v62, %v7664_v40  ;;  %v3917_v62 = vld [vmem:[%s9403_s10 + $0x8] sm:$0xff] }
 0x7d9   : > { %6714 = vmatmul.mubr.msk.f32.gmra.mrb[48].mxu0 %vm3946_vm9, %v5606_v19  ;;  %v5672_v19 = vld [vmem:[%s9402_s9 + $0x1b0] sm:$0xff] }
 0x7da   : > { %6716 = vmatprep.mubr.msk.f32.mxu0 %vm7681_vm8, %v7682_v46  ;;  %7187 = vmatpush3.bf16.msra.mxu0 %v7186_v20  ;;  %v5673_v20 = vld [vmem:[%s9402_s9 + $0x1b8] sm:$0xff] }
 0x7db   : > { %7188 = vmatprep.subr.bf16.mxu0 %v7680_v43 }
 0x7dd   : > { %6717 = vmatmul.mubr.msk.f32.gmra.mrb[50].mxu0 %vm3946_vm9, %v5607_v22  ;;  %v5675_v22 = vld [vmem:[%s9402_s9 + $0x1c8] sm:$0xff] }
 0x7de   : > { %6719 = vmatprep.mubr.msk.f32.mxu0 %vm7681_vm8, %v7682_v46 }
 0x7e1   : > { %6720 = vmatmul.mubr.msk.f32.gmra.mrb[52].mxu0 %vm3946_vm9, %v5608_v24  ;;  %v5677_v24 = vld [vmem:[%s9402_s9 + $0x1d8] sm:$0xff] }
 0x7e2   : > { %6722 = vmatprep.mubr.msk.f32.mxu0 %vm7681_vm8, %v7682_v46 }
 0x7e5   : > { %6723 = vmatmul.mubr.msk.f32.gmra.mrb[54].mxu0 %vm3946_vm9, %v5609_v26 }
 0x7e6   : > { %6725 = vmatprep.mubr.msk.f32.mxu0 %vm7681_vm8, %v7682_v46 }
 0x7e9   : > { %6726 = vmatmul.mubr.msk.f32.gmra.mrb[56].mxu0 %vm3946_vm9, %v5610_v28 }
 0x7ea   : > { %6728 = vmatprep.mubr.msk.f32.mxu0 %vm7681_vm8, %v7682_v46 }
 0x7ed   : > { %6729 = vmatmul.mubr.msk.f32.gmra.mrb[58].mxu0 %vm3946_vm9, %v5611_v30 }
 0x7ee   : > { %6731 = vmatprep.mubr.msk.f32.mxu0 %vm7681_vm8, %v7682_v46 }
 0x7f1   : > { %6732 = vmatmul.mubr.msk.f32.gmra.mrb[60].mxu0 %vm3946_vm9, %v5612_v32 }
 0x7f2   : > { %6734 = vmatprep.mubr.msk.f32.mxu0 %vm7681_vm8, %v7682_v46 }
 0x7f5   : > { %6735 = vmatmul.mubr.msk.f32.gmra.mrb[62].mxu0 %vm3946_vm9, %v5613_v34 }
 0x7f6   : > { %6737 = vmatprep.mubr.msk.f32.mxu0 %vm7681_vm8, %v7682_v46 }
 0x7f9   : > { %6738 = vmatmul.mubr.msk.f32.gmra.mrb[64].mxu0 %vm3946_vm9, %v5614_v35 }
 0x7fa   : > { %6740 = vmatprep.mubr.msk.f32.mxu0 %vm7681_vm8, %v7682_v46 }
 0x7fd   : > { %6741 = vmatmul.mubr.msk.f32.gmra.mrb[66].mxu0 %vm3946_vm9, %v5615_v48 }
 0x7fe   : > { %6743 = vmatprep.mubr.msk.f32.mxu0 %vm7681_vm8, %v7682_v46 }
 0x801   : > { %6744 = vmatmul.mubr.msk.f32.gmra.mrb[68].mxu0 %vm3946_vm9, %v5616_v49 }
 0x802   : > { %6746 = vmatprep.mubr.msk.f32.mxu0 %vm7681_vm8, %v7682_v46 }
 0x805   : > { %6747 = vmatmul.mubr.msk.f32.gmra.mrb[70].mxu0 %vm3946_vm9, %v5617_v50 }
 0x806   : > { %6765 = vmatprep.mubr.msk.f32.mxu0 %vm7681_vm8, %v7682_v46 }
 0x809   : > { %6766 = vmatmul.mubr.msk.f32.vlgmr.msra.gmra.mrb[42].mxu0 %vm3946_vm9, %v5633_v53 }
 0x80a   : > { %7190 = vmatpush3.bf16.msra.mxu0 %v7189_v54  ;;  %6768 = vmatprep.mubr.msk.f32.mxu0 %vm7681_vm8, %v7682_v46 }
 0x80b   : > { %7191 = vmatprep.subr.bf16.mxu0 %v7680_v43 }
 0x80d   : > { %6769 = vmatmul.mubr.msk.f32.gmra.mrb[44].mxu0 %vm3946_vm9, %v5634_v57 }
 0x80e   : > { %7193 = vmatpush3.bf16.msra.mxu0 %v7192_v58  ;;  %6771 = vmatprep.mubr.msk.f32.mxu0 %vm7681_vm8, %v7682_v46 }
 0x80f   : > { %7194 = vmatprep.subr.bf16.mxu0 %v7680_v43 }
 0x811   : > { %6772 = vmatmul.mubr.msk.f32.gmra.mrb[46].mxu0 %vm3946_vm9, %v5635_v60  ;;  %v3916_v60 = vld [vmem:[%s9403_s10] sm:$0xff] }
 0x812   : > { %7196 = vmatpush3.bf16.msra.mxu0 %v7195_v61  ;;  %6774 = vmatprep.mubr.msk.f32.mxu0 %vm7681_vm8, %v7682_v46 }
 0x813   : > { %7197 = vmatprep.subr.bf16.mxu0 %v7680_v43 }
 0x815   : > { %6775 = vmatmul.mubr.msk.f32.gmra.mrb[48].mxu0 %vm3946_vm9, %v5636_v63 }
 0x816   : > { %7199 = vmatpush3.bf16.msra.mxu0 %v7198_v0  ;;  %6777 = vmatprep.mubr.msk.f32.mxu0 %vm7681_vm8, %v7682_v46 }
 0x819   : > { %6778 = vmatmul.mubr.msk.f32.gmra.mrb[50].mxu0 %vm3946_vm9, %v5637_v1 }
 0x81a   : > { %6780 = vmatprep.mubr.msk.f32.mxu0 %vm7681_vm8, %v7682_v46 }
 0x81d   : > { %6781 = vmatmul.mubr.msk.f32.gmra.mrb[52].mxu0 %vm3946_vm9, %v5638_v2  ;;  %v3918_v2 = vld [vmem:[%s9403_s10 + $0x10] sm:$0xff] }
 0x81e   : > { %6783 = vmatprep.mubr.msk.f32.mxu0 %vm7681_vm8, %v7682_v46 }
 0x821   : > { %6784 = vmatmul.mubr.msk.f32.gmra.mrb[54].mxu0 %vm3946_vm9, %v5639_v41 }
 0x822   : > { %6786 = vmatprep.mubr.msk.f32.mxu0 %vm7681_vm8, %v7682_v46 }
 0x825   : > { %6787 = vmatmul.mubr.msk.f32.gmra.mrb[56].mxu0 %vm3946_vm9, %v5640_v3 }
 0x826   : > { %6789 = vmatprep.mubr.msk.f32.mxu0 %vm7681_vm8, %v7682_v46 }
 0x829   : > { %6790 = vmatmul.mubr.msk.f32.gmra.mrb[58].mxu0 %vm3946_vm9, %v5641_v4 }
 0x82a   : > { %6792 = vmatprep.mubr.msk.f32.mxu0 %vm7681_vm8, %v7682_v46 }
 0x82b   : > { %v4058_v25 = vpop.f32.mrb[70].mxu1 }
 0x82c   : > { %v6645_v26 = vpop.f32.mrb[71].mxu1  ;;  %v4132_v61 = vadd.f32 %v4058_v25, %v3916_v60 }
 0x82d   : > { %6793 = vmatmul.mubr.msk.f32.gmra.mrb[60].mxu0 %vm3946_vm9, %v5642_v5  ;;  %v3922_v26 = vld [vmem:[%s9403_s10 + $0x30] sm:$0xff] }
 0x82e   : > { %6795 = vmatprep.mubr.msk.f32.mxu0 %vm7681_vm8, %v7682_v46 }
 0x82f   : > { %v4063_v27 = vpop.f32.mrb[72].mxu1 }
 0x830   : > { %v6648_v28 = vpop.f32.mrb[73].mxu1  ;;  %v4133_v1 = vadd.f32 %v4063_v27, %v3917_v62 }
 0x831   : > { %6796 = vmatmul.mubr.msk.f32.gmra.mrb[62].mxu0 %vm3946_vm9, %v5643_v6  ;;  %v3919_v6 = vld [vmem:[%s9403_s10 + $0x18] sm:$0xff] }
 0x832   : > { %6798 = vmatprep.mubr.msk.f32.mxu0 %vm7681_vm8, %v7682_v46 }
 0x833   : > { %v4068_v29 = vpop.f32.mrb[74].mxu1 }
 0x834   : > { %v6651_v30 = vpop.f32.mrb[75].mxu1  ;;  %v4134_v5 = vadd.f32 %v4068_v29, %v3918_v2 }
 0x835   : > { %6799 = vmatmul.mubr.msk.f32.gmra.mrb[64].mxu0 %vm3946_vm9, %v5644_v42 }
 0x836   : > { %6801 = vmatprep.mubr.msk.f32.mxu0 %vm7681_vm8, %v7682_v46 }
 0x837   : > { %v4073_v31 = vpop.f32.mrb[76].mxu1 }
 0x838   : > { %v6654_v32 = vpop.f32.mrb[77].mxu1 }
 0x839   : > { %6802 = vmatmul.mubr.msk.f32.gmra.mrb[66].mxu0 %vm3946_vm9, %v5645_v7 }
 0x83a   : > { %6804 = vmatprep.mubr.msk.f32.mxu0 %vm7681_vm8, %v7682_v46 }
 0x83b   : > { %v4078_v33 = vpop.f32.mrb[78].mxu1 }
 0x83c   : > { %v6657_v34 = vpop.f32.mrb[79].mxu1 }
 0x83d   : > { %6805 = vmatmul.mubr.msk.f32.gmra.mrb[68].mxu0 %vm3946_vm9, %v5646_v44 }
 0x83e   : > { %6807 = vmatprep.mubr.msk.f32.mxu0 %vm7681_vm8, %v7682_v46 }
 0x83f   : > { %v4083_v45 = vpop.f32.mrb[80].mxu1 }
 0x840   : > { %v6660_v35 = vpop.f32.mrb[81].mxu1 }
 0x841   : > { %6808 = vmatmul.mubr.msk.f32.gmra.mrb[70].mxu0 %vm3946_vm9, %v5647_v8 }
 0x842   : > { %6826 = vmatprep.mubr.msk.f32.mxu0 %vm7681_vm8, %v7682_v46 }
 0x843   : > { %v4088_v47 = vpop.f32.mrb[82].mxu1 }
 0x844   : > { %v6663_v48 = vpop.f32.mrb[83].mxu1  ;;  %v4138_v30 = vadd.f32 %v4088_v47, %v3922_v26 }
 0x845   : > { %6827 = vmatmul.mubr.msk.f32.vlgmr.msra.gmra.mrb[42].mxu0 %vm3946_vm9, %v5663_v10 }
 0x846   : > { %6829 = vmatprep.mubr.msk.f32.mxu0 %vm7681_vm8, %v7682_v46 }
 0x847   : > { %v9197_v49 = vpop.f32.mrb[84].mxu1 }
 0x848   : > { %v6666_v36 = vpop.f32.mrb[85].mxu1 }
 0x849   : > { %6830 = vmatmul.mubr.msk.f32.gmra.mrb[44].mxu0 %vm3946_vm9, %v5664_v11 }
 0x84a   : > { %6832 = vmatprep.mubr.msk.f32.mxu0 %vm7681_vm8, %v7682_v46 }
 0x84b   : > { %v9199_v50 = vpop.f32.mrb[86].mxu1 }
 0x84c   : > { %v6669_v51 = vpop.f32.mrb[87].mxu1 }
 0x84d   : > { %6833 = vmatmul.mubr.msk.f32.gmra.mrb[46].mxu0 %vm3946_vm9, %v5665_v12  ;;  %v4135_v12 = vadd.f32 %v4073_v31, %v3919_v6  ;;  %v3923_v31 = vld [vmem:[%s9403_s10 + $0x38] sm:$0xff]  ;;  %v3924_v51 = vld [vmem:[%s9403_s10 + $0x40] sm:$0xff] }
 0x84e   : > { %6835 = vmatprep.mubr.msk.f32.mxu0 %vm7681_vm8, %v7682_v46  ;;  %v4139_v36 = vadd.f32 %v9197_v49, %v3923_v31  ;;  %v4894_v31 = vld [vmem:[%s9404_s11 + $0x20] sm:$0xff] }
 0x84f   : > { %v9201_v37 = vpop.f32.mrb[88].mxu1 }
 0x850   : > { %v6672_v52 = vpop.f32.mrb[89].mxu1 }
 0x851   : > { %6836 = vmatmul.mubr.msk.f32.gmra.mrb[48].mxu0 %vm3946_vm9, %v5666_v13  ;;  %v3920_v13 = vld [vmem:[%s9403_s10 + $0x20] sm:$0xff] }
 0x852   : > { %6838 = vmatprep.mubr.msk.f32.mxu0 %vm7681_vm8, %v7682_v46 }
 0x853   : > { %v9203_v53 = vpop.f32.mrb[90].mxu1 }
 0x854   : > { %v6675_v54 = vpop.f32.mrb[91].mxu1 }
 0x855   : > { %6839 = vmatmul.mubr.msk.f32.gmra.mrb[50].mxu0 %vm3946_vm9, %v5667_v14 }
 0x856   : > { %6841 = vmatprep.mubr.msk.f32.mxu0 %vm7681_vm8, %v7682_v46 }
 0x857   : > { %v9205_v55 = vpop.f32.mrb[92].mxu1 }
 0x858   : > { %v6678_v56 = vpop.f32.mrb[93].mxu1 }
 0x859   : > { %6842 = vmatmul.mubr.msk.f32.gmra.mrb[52].mxu0 %vm3946_vm9, %v5668_v15  ;;  %v4140_v56 = vadd.f32 %v9199_v50, %v3924_v51  ;;  %v4901_v51 = vld [vmem:[%s9405_s12] sm:$0xff] }
 0x85a   : > { %6844 = vmatprep.mubr.msk.f32.mxu0 %vm7681_vm8, %v7682_v46 }
 0x85b   : > { %v9207_v38 = vpop.f32.mrb[94].mxu1 }
 0x85c   : > { %v6681_v57 = vpop.f32.mrb[95].mxu1 }
 0x85d   : > { %6845 = vmatmul.mubr.msk.f32.gmra.mrb[54].mxu0 %vm3946_vm9, %v5669_v16  ;;  %v3925_v57 = vld [vmem:[%s9403_s10 + $0x48] sm:$0xff] }
 0x85e   : > { %6847 = vmatprep.mubr.msk.f32.mxu0 %vm7681_vm8, %v7682_v46 }
 0x85f   : > { %v9209_v58 = vpop.f32.mrb[96].mxu1 }
 0x860   : > { %v6684_v59 = vpop.f32.mrb[97].mxu1 }
 0x861   : > { %6848 = vmatmul.mubr.msk.f32.gmra.mrb[56].mxu0 %vm3946_vm9, %v5670_v17  ;;  %v4136_v17 = vadd.f32 %v4078_v33, %v3920_v13 }
 0x862   : > { %6850 = vmatprep.mubr.msk.f32.mxu0 %vm7681_vm8, %v7682_v46 }
 0x863   : > { %v9211_v39 = vpop.f32.mrb[98].mxu1 }
 0x864   : > { %v6687_v9 = vpop.f32.mrb[99].mxu1 }
 0x865   : > { %6851 = vmatmul.mubr.msk.f32.gmra.mrb[58].mxu0 %vm3946_vm9, %v5671_v18  ;;  %v3921_v18 = vld [vmem:[%s9403_s10 + $0x28] sm:$0xff] }
 0x866   : > { %6853 = vmatprep.mubr.msk.f32.mxu0 %vm7681_vm8, %v7682_v46  ;;  %v4137_v25 = vadd.f32 %v4083_v45, %v3921_v18 }
 0x869   : > { %6854 = vmatmul.mubr.msk.f32.gmra.mrb[60].mxu0 %vm3946_vm9, %v5672_v19 }
 0x86a   : > { %6856 = vmatprep.mubr.msk.f32.mxu0 %vm7681_vm8, %v7682_v46 }
 0x86d   : > { %6857 = vmatmul.mubr.msk.f32.gmra.mrb[62].mxu0 %vm3946_vm9, %v5673_v20 }
 0x86e   : > { %6859 = vmatprep.mubr.msk.f32.mxu0 %vm7681_vm8, %v7682_v46 }
 0x871   : > { %6860 = vmatmul.mubr.msk.f32.gmra.mrb[64].mxu0 %vm3946_vm9, %v5674_v21 }
 0x872   : > { %6862 = vmatprep.mubr.msk.f32.mxu0 %vm7681_vm8, %v7682_v46 }
 0x875   : > { %6863 = vmatmul.mubr.msk.f32.gmra.mrb[66].mxu0 %vm3946_vm9, %v5675_v22 }
 0x876   : > { %6865 = vmatprep.mubr.msk.f32.mxu0 %vm7681_vm8, %v7682_v46 }
 0x879   : > { %6866 = vmatmul.mubr.msk.f32.gmra.mrb[68].mxu0 %vm3946_vm9, %v5676_v23 }
 0x87a   : > { %6868 = vmatprep.mubr.msk.f32.mxu0 %vm7681_vm8, %v7682_v46 }
 0x87d   : > { %6869 = vmatmul.mubr.msk.f32.gmra.mrb[70].mxu0 %vm3946_vm9, %v5677_v24 }
 0x918   : > { %v4786_v40 = vpop.f32.mrb[42].mxu0 }
 0x919   : > { %v7260_v63 = vadd.f32 %v4786_v40, %v4132_v61  ;;  %v6828_v0 = vpop.f32.mrb[43].mxu0  ;;  %v4141_v40 = vadd.f32 %v9201_v37, %v3925_v57 }
 0x91b   : > { %v4875_v42 = vmax.f32 %v7260_v63, 0.0  ;;  %v3926_v63 = vld [vmem:[%s9403_s10 + $0x50] sm:$0xff] }
 0x91c   : > { %v4791_v41 = vpop.f32.mrb[44].mxu0  ;;  %v4142_v2 = vadd.f32 %v9203_v53, %v3926_v63  ;;  %v4904_v63 = vld [vmem:[%s9405_s12 + $0x18] sm:$0xff] }
 0x91d   : > { %v7262_v3 = vadd.f32 %v4791_v41, %v4133_v1  ;;  %v6831_v4 = vpop.f32.mrb[45].mxu0  ;;  %v3927_v41 = vld [vmem:[%s9403_s10 + $0x58] sm:$0xff] }
 0x91f   : > { %v4876_v7 = vmax.f32 %v7262_v3, 0.0 }
 0x920   : > { %v4796_v44 = vpop.f32.mrb[46].mxu0 }
 0x921   : > { %v7201_v8 = vpack.c.bf16 %v4876_v7, %v4875_v42  ;;  %v7264_v10 = vadd.f32 %v4796_v44, %v4134_v5  ;;  %v6834_v11 = vpop.f32.mrb[47].mxu0  ;;  %v4143_v7 = vadd.f32 %v9205_v55, %v3927_v41  ;;  %v3928_v44 = vld [vmem:[%s9403_s10 + $0x60] sm:$0xff] }
 0x922   : > { %v4144_v11 = vadd.f32 %v9207_v38, %v3928_v44 }
 0x923   : > { %7202 = vmatpush3.bf16.msra.mxu1 %v7201_v8  ;;  %v4877_v19 = vmax.f32 %v7264_v10, 0.0 }
 0x924   : > { %v4801_v14 = vpop.f32.mrb[48].mxu0  ;;  %7203 = vmatprep.subr.bf16.mxu1 %v7680_v43 }
 0x925   : > { %v7266_v15 = vadd.f32 %v4801_v14, %v4135_v12  ;;  %v6837_v16 = vpop.f32.mrb[49].mxu0  ;;  %v3929_v12 = vld [vmem:[%s9403_s10 + $0x68] sm:$0xff] }
 0x926   : > { %v4145_v18 = vadd.f32 %v9209_v58, %v3929_v12  ;;  %v4907_v12 = vld [vmem:[%s9405_s12 + $0x30] sm:$0xff] }
 0x927   : > { %v4878_v20 = vmax.f32 %v7266_v15, 0.0 }
 0x928   : > { %v4806_v21 = vpop.f32.mrb[50].mxu0 }
 0x929   : > { %v7204_v22 = vpack.c.bf16 %v4878_v20, %v4877_v19  ;;  %v7268_v23 = vadd.f32 %v4806_v21, %v4136_v17  ;;  %v6840_v24 = vpop.f32.mrb[51].mxu0  ;;  %v3930_v19 = vld [vmem:[%s9403_s10 + $0x70] sm:$0xff] }
 0x92b   : > { %7205 = vmatpush3.bf16.msra.mxu1 %v7204_v22  ;;  %v4879_v32 = vmax.f32 %v7268_v23, 0.0  ;;  %v4146_v22 = vadd.f32 %v9211_v39, %v3930_v19  ;;  %v4892_v39 = vld [vmem:[%s9404_s11 + $0x10] sm:$0xff] }
 0x92c   : > { %v4811_v27 = vpop.f32.mrb[52].mxu0  ;;  %7206 = vmatprep.subr.bf16.mxu1 %v7680_v43 }
 0x92d   : > { %v7270_v28 = vadd.f32 %v4811_v27, %v4137_v25  ;;  %v6843_v29 = vpop.f32.mrb[53].mxu0 }
 0x92e   : > { %v4890_v29 = vld [vmem:[%s9404_s11] sm:$0xff] }
 0x92f   : > { %v4880_v33 = vmax.f32 %v7270_v28, 0.0 }
 0x930   : > { %v4816_v34 = vpop.f32.mrb[54].mxu0 }
 0x931   : > { %v7207_v35 = vpack.c.bf16 %v4880_v33, %v4879_v32  ;;  %v7272_v45 = vadd.f32 %v4816_v34, %v4138_v30  ;;  %v6846_v48 = vpop.f32.mrb[55].mxu0  ;;  %v4893_v30 = vld [vmem:[%s9404_s11 + $0x18] sm:$0xff]  ;;  %v4895_v32 = vld [vmem:[%s9404_s11 + $0x28] sm:$0xff]  ;;  %v4896_v33 = vld [vmem:[%s9404_s11 + $0x30] sm:$0xff] }
 0x932   : > { %v4897_v34 = vld [vmem:[%s9404_s11 + $0x38] sm:$0xff]  ;;  %v4900_v48 = vld [vmem:[%s9404_s11 + $0x50] sm:$0xf] }
 0x933   : > { %7208 = vmatpush3.bf16.msra.mxu1 %v7207_v35  ;;  %v4881_v59 = vmax.f32 %v7272_v45, 0.0  ;;  %v4898_v35 = vld [vmem:[%s9404_s11 + $0x40] sm:$0xff]  ;;  %v4899_v45 = vld [vmem:[%s9404_s11 + $0x48] sm:$0xff] }
 0x934   : > { %v4821_v52 = vpop.f32.mrb[56].mxu0  ;;  %7209 = vmatprep.subr.bf16.mxu1 %v7680_v43 }
 0x935   : > { %v7274_v47 = vadd.f32 %v4821_v52, %v4139_v36  ;;  %v6849_v54 = vpop.f32.mrb[57].mxu0  ;;  %v5077_v36 = vld [vmem:[%s9406_s13] sm:$0xff] }
 0x937   : > { %v4882_v9 = vmax.f32 %v7274_v47, 0.0 }
 0x938   : > { %v4826_v60 = vpop.f32.mrb[58].mxu0 }
 0x939   : > { %v7210_v49 = vpack.c.bf16 %v4882_v9, %v4881_v59  ;;  %v7276_v61 = vadd.f32 %v4826_v60, %v4140_v56  ;;  %v6852_v62 = vpop.f32.mrb[59].mxu0 }
 0x93b   : > { %7211 = vmatpush3.bf16.msra.mxu1 %v7210_v49  ;;  %v4883_v3 = vmax.f32 %v7276_v61, 0.0  ;;  %v4903_v49 = vld [vmem:[%s9405_s12 + $0x10] sm:$0xff] }
 0x93c   : > { %v4831_v0 = vpop.f32.mrb[60].mxu0  ;;  %7212 = vmatprep.subr.bf16.mxu1 %v7680_v43 }
 0x93d   : > { %v7278_v50 = vadd.f32 %v4831_v0, %v4141_v40  ;;  %v6855_v1 = vpop.f32.mrb[61].mxu0 }
 0x93f   : > { %v4884_v4 = vmax.f32 %v7278_v50, 0.0 }
 0x940   : > { %v4836_v5 = vpop.f32.mrb[62].mxu0 }
 0x941   : > { %v7213_v37 = vpack.c.bf16 %v4884_v4, %v4883_v3  ;;  %v7280_v6 = vadd.f32 %v4836_v5, %v4142_v2  ;;  %v6858_v42 = vpop.f32.mrb[63].mxu0  ;;  %v4905_v4 = vld [vmem:[%s9405_s12 + $0x20] sm:$0xff] }
 0x942   : > { %v4906_v42 = vld [vmem:[%s9405_s12 + $0x28] sm:$0xff] }
 0x943   : > { %7214 = vmatpush3.bf16.msra.mxu1 %v7213_v37  ;;  %v4885_v13 = vmax.f32 %v7280_v6, 0.0 }
 0x944   : > { %v4841_v8 = vpop.f32.mrb[64].mxu0  ;;  %7215 = vmatprep.subr.bf16.mxu1 %v7680_v43 }
 0x945   : > { %v7282_v53 = vadd.f32 %v4841_v8, %v4143_v7  ;;  %v6861_v10 = vpop.f32.mrb[65].mxu0 }
 0x947   : > { %v4886_v14 = vmax.f32 %v7282_v53, 0.0 }
 0x948   : > { %v4846_v15 = vpop.f32.mrb[66].mxu0 }
 0x949   : > { %v7216_v55 = vpack.c.bf16 %v4886_v14, %v4885_v13  ;;  %v7284_v16 = vadd.f32 %v4846_v15, %v4144_v11  ;;  %v6864_v17 = vpop.f32.mrb[67].mxu0 }
 0x94b   : > { %7217 = vmatpush3.bf16.msra.mxu1 %v7216_v55  ;;  %v4887_v23 = vmax.f32 %v7284_v16, 0.0  ;;  %v4908_v55 = vld [vmem:[%s9405_s12 + $0x38] sm:$0xff] }
 0x94c   : > { %v4851_v20 = vpop.f32.mrb[68].mxu0  ;;  %7218 = vmatprep.subr.bf16.mxu1 %v7680_v43  ;;  %v4891_v43 = vld [vmem:[%s9404_s11 + $0x8] sm:$0xff] }
 0x94d   : > { %v7286_v38 = vadd.f32 %v4851_v20, %v4145_v18  ;;  %v6867_v21 = vpop.f32.mrb[69].mxu0 }
 0x94e   : > { %v4909_v21 = vld [vmem:[%s9405_s12 + $0x40] sm:$0xff] }
 0x94f   : > { %v4888_v24 = vmax.f32 %v7286_v38, 0.0 }
 0x950   : > { %v4856_v25 = vpop.f32.mrb[70].mxu0 }
 0x951   : > { %v7219_v26 = vpack.c.bf16 %v4888_v24, %v4887_v23  ;;  %v7288_v27 = vadd.f32 %v4856_v25, %v4146_v22  ;;  %v6870_v28 = vpop.f32.mrb[71].mxu0  ;;  %v4910_v25 = vld [vmem:[%s9405_s12 + $0x48] sm:$0xff] }
 0x953   : > { %7220 = vmatpush3.bf16.msra.mxu1 %v7219_v26  ;;  %v4889_v58 = vmax.f32 %v7288_v27, 0.0 }
 0x954   : > { %6899 = vmatprep.subr.mxu1 %v7682_v46 }
 0x957   : > { %6900 = vmatpush3.msra.mxu1 %v4889_v58 }
 0x958   : > { %6902 = vmatmul.mubr.msk.f32.vlgmr.msra.gmra.mrb[100].mxu1 %vm4912_vm10, %v4890_v29  ;;  %v4911_v29 = vld [vmem:[%s9405_s12 + $0x50] sm:$0xf] }
 0x959   : > { %6904 = vmatprep.mubr.msk.f32.mxu1 %vm7681_vm8, %v7682_v46 }
 0x95c   : > { %6905 = vmatmul.mubr.msk.f32.gmra.mrb[102].mxu1 %vm4912_vm10, %v4891_v43 }
 0x95d   : > { %6907 = vmatprep.mubr.msk.f32.mxu1 %vm7681_vm8, %v7682_v46 }
 0x960   : > { %6908 = vmatmul.mubr.msk.f32.gmra.mrb[104].mxu1 %vm4912_vm10, %v4892_v39 }
 0x961   : > { %6910 = vmatprep.mubr.msk.f32.mxu1 %vm7681_vm8, %v7682_v46 }
 0x964   : > { %6911 = vmatmul.mubr.msk.f32.gmra.mrb[106].mxu1 %vm4912_vm10, %v4893_v30 }
 0x965   : > { %6913 = vmatprep.mubr.msk.f32.mxu1 %vm7681_vm8, %v7682_v46 }
 0x968   : > { %6914 = vmatmul.mubr.msk.f32.gmra.mrb[108].mxu1 %vm4912_vm10, %v4894_v31 }
 0x969   : > { %6916 = vmatprep.mubr.msk.f32.mxu1 %vm7681_vm8, %v7682_v46 }
 0x96c   : > { %6917 = vmatmul.mubr.msk.f32.gmra.mrb[110].mxu1 %vm4912_vm10, %v4895_v32 }
 0x96d   : > { %6919 = vmatprep.mubr.msk.f32.mxu1 %vm7681_vm8, %v7682_v46 }
 0x970   : > { %6920 = vmatmul.mubr.msk.f32.gmra.mrb[112].mxu1 %vm4912_vm10, %v4896_v33 }
 0x971   : > { %6922 = vmatprep.mubr.msk.f32.mxu1 %vm7681_vm8, %v7682_v46 }
 0x974   : > { %6923 = vmatmul.mubr.msk.f32.gmra.mrb[114].mxu1 %vm4912_vm10, %v4897_v34 }
 0x975   : > { %6925 = vmatprep.mubr.msk.f32.mxu1 %vm7681_vm8, %v7682_v46 }
 0x978   : > { %6926 = vmatmul.mubr.msk.f32.gmra.mrb[116].mxu1 %vm4912_vm10, %v4898_v35  ;;  %v5078_v35 = vld [vmem:[%s9406_s13 + $0x8] sm:$0x3] }
 0x979   : > { %6928 = vmatprep.mubr.msk.f32.mxu1 %vm7681_vm8, %v7682_v46 }
 0x97c   : > { %6929 = vmatmul.mubr.msk.f32.gmra.mrb[118].mxu1 %vm4912_vm10, %v4899_v45  ;;  %v5080_v45 = vld [vmem:[%s9407_s14 + $0x8] sm:$0x3] }
 0x97d   : > { %6931 = vmatprep.mubr.msk.f32.mxu1 %vm7681_vm8, %v7682_v46  ;;  %v4902_v46 = vld [vmem:[%s9405_s12 + $0x8] sm:$0xff] }
 0x980   : > { %6932 = vmatmul.mubr.msk.f32.gmra.mrb[120].mxu1 %vm4912_vm10, %v4900_v48  ;;  %v5079_v48 = vld [vmem:[%s9407_s14] sm:$0xff] }
 0x981   : > { %6956 = vmatprep.mubr.msk.f32.mxu1 %vm5081_vm11, %v5077_v36 }
 0xa2b   : > { %v5012_v52 = vpop.f32.mrb[100].mxu1 }
 0xa2c   : > { %v6903_v47 = vpop.f32.mrb[101].mxu1  ;;  %v5013_v54 = vadd.f32 %v5012_v52, %v4901_v51 }
 0xa2e   : > { %v5066_v9 = vmax.f32 %v5013_v54, 0.0 }
 0xa2f   : > { %v5017_v56 = vpop.f32.mrb[102].mxu1 }
 0xa30   : > { %v5018_v57 = vadd.f32 %v5017_v56, %v4902_v46  ;;  %v6906_v59 = vpop.f32.mrb[103].mxu1 }
 0xa32   : > { %v5067_v60 = vmax.f32 %v5018_v57, 0.0 }
 0xa33   : > { %v5022_v61 = vpop.f32.mrb[104].mxu1 }
 0xa34   : > { %v7221_v62 = vpack.c.bf16 %v5067_v60, %v5066_v9  ;;  %v6909_v40 = vpop.f32.mrb[105].mxu1  ;;  %v5023_v0 = vadd.f32 %v5022_v61, %v4903_v49 }
 0xa36   : > { %7222 = vmatprep.subr.bf16.mxu1 %v7221_v62  ;;  %v5068_v41 = vmax.f32 %v5023_v0, 0.0 }
 0xa37   : > { %v5027_v50 = vpop.f32.mrb[106].mxu1  ;;  %7224 = vmatpush3.bf16.msra.mxu1 %v7221_v62 }
 0xa38   : > { %v5028_v1 = vadd.f32 %v5027_v50, %v4904_v63  ;;  %v6912_v2 = vpop.f32.mrb[107].mxu1 }
 0xa3a   : > { %v5069_v3 = vmax.f32 %v5028_v1, 0.0 }
 0xa3b   : > { %v5032_v5 = vpop.f32.mrb[108].mxu1 }
 0xa3c   : > { %v7225_v37 = vpack.c.bf16 %v5069_v3, %v5068_v41  ;;  %v6915_v6 = vpop.f32.mrb[109].mxu1  ;;  %v5033_v7 = vadd.f32 %v5032_v5, %v4905_v4 }
 0xa3e   : > { %7226 = vmatprep.subr.bf16.mxu1 %v7225_v37  ;;  %v5070_v10 = vmax.f32 %v5033_v7, 0.0 }
 0xa3f   : > { %v5037_v44 = vpop.f32.mrb[110].mxu1  ;;  %7228 = vmatpush3.bf16.msra.mxu1 %v7225_v37 }
 0xa40   : > { %v5038_v8 = vadd.f32 %v5037_v44, %v4906_v42  ;;  %v6918_v53 = vpop.f32.mrb[111].mxu1 }
 0xa42   : > { %v5071_v11 = vmax.f32 %v5038_v8, 0.0 }
 0xa43   : > { %v5042_v13 = vpop.f32.mrb[112].mxu1 }
 0xa44   : > { %v7229_v14 = vpack.c.bf16 %v5071_v11, %v5070_v10  ;;  %v6921_v15 = vpop.f32.mrb[113].mxu1  ;;  %v5043_v16 = vadd.f32 %v5042_v13, %v4907_v12 }
 0xa46   : > { %7230 = vmatprep.subr.bf16.mxu1 %v7229_v14  ;;  %v5072_v20 = vmax.f32 %v5043_v16, 0.0 }
 0xa47   : > { %v5047_v17 = vpop.f32.mrb[114].mxu1  ;;  %7232 = vmatpush3.bf16.msra.mxu1 %v7229_v14 }
 0xa48   : > { %v5048_v18 = vadd.f32 %v5047_v17, %v4908_v55  ;;  %v6924_v19 = vpop.f32.mrb[115].mxu1 }
 0xa4a   : > { %v5073_v38 = vmax.f32 %v5048_v18, 0.0 }
 0xa4b   : > { %v5052_v22 = vpop.f32.mrb[116].mxu1 }
 0xa4c   : > { %v7233_v23 = vpack.c.bf16 %v5073_v38, %v5072_v20  ;;  %v6927_v24 = vpop.f32.mrb[117].mxu1  ;;  %v5053_v26 = vadd.f32 %v5052_v22, %v4909_v21 }
 0xa4e   : > { %7234 = vmatprep.subr.bf16.mxu1 %v7233_v23  ;;  %v5074_v43 = vmax.f32 %v5053_v26, 0.0 }
 0xa4f   : > { %v5057_v27 = vpop.f32.mrb[118].mxu1  ;;  %7236 = vmatpush3.bf16.msra.mxu1 %v7233_v23 }
 0xa50   : > { %v5058_v28 = vadd.f32 %v5057_v27, %v4910_v25  ;;  %v6930_v58 = vpop.f32.mrb[119].mxu1 }
 0xa52   : > { %v5075_v39 = vmax.f32 %v5058_v28, 0.0 }
 0xa53   : > { %v5062_v30 = vpop.f32.mrb[120].mxu1 }
 0xa54   : > { %v7237_v31 = vpack.c.bf16 %v5075_v39, %v5074_v43  ;;  %v5063_v32 = vadd.f32 %v5062_v30, %v4911_v29  ;;  %v6933_v33 = vpop.f32.mrb[121].mxu1 }
 0xa56   : > { %7238 = vmatprep.subr.bf16.mxu1 %v7237_v31  ;;  %v5076_v34 = vmax.f32 %v5063_v32, 0.0 }
 0xa57   : > { %7240 = vmatpush3.bf16.msra.mxu1 %v7237_v31 }
 0xa58   : > { %6954 = vmatprep.subr.msk.mxu1 %vm606_vm1, %v5076_v34 }
 0xa5b   : > { %6955 = vmatpush3.msk.msra.mxu1 %vm606_vm1, %v5076_v34 }
 0xa5c   : > { %6957 = vmatmul.mubr.msk.f32.vlgmr.msra.gmra.mrb[122].mxu1 %vm5081_vm11, %v5078_v35 }
 0xb2f   : > { %v6958_v36 = vpop.f32.mrb[122].mxu1 }
 0xb30   : > { %v5163_v51 = vadd.f32 %v6958_v36, %v5080_v45  ;;  %v5157_v52 = vpop.f32.mrb[123].mxu1 }
 0xb31   : > { %v5158_v47 = vadd.f32 %v5157_v52, %v5079_v48 }
 0xb32   : > { %5169 = vst.msk [vmem:[%s494_s17 + $0x8] sm:$0x3] %vm5168_vm12, %v5163_v51 }
 0xb33   : > { %5167 = vst.msk [vmem:[%s494_s17] sm:$0xff] %vm5166_vm13, %v5158_v47 }
 0xb34 PF: > { %s25_s18 = sadd.s32 1, %s7672_s18  }
 0xb35   : > { %p22_p4 = scmp.ge.s32.totalorder %s25_s18, 4  }
 0xb37   :  { %24 = sbr.rel (!%p22_p4) target bundleno = 1 (0x1), region = 121 }

</bundles_post_ra>
